<compile_context>
chip_gen: v6e
topology: v6e:2x2x1
jax: 0.10.0
libtpu: 0.0.40
codegen_flags: <defaults>
</compile_context>

<pallas_src>
import jax
import jax.numpy as jnp
import numpy as np
from jax.experimental import pallas as pl
from jax.experimental.pallas import tpu as pltpu


# ------------------------------ tiling helpers ------------------------------

def _pick_tile_m(M, max_tile=512, quantum=128, min_steps=2):
    """Largest multiple of `quantum` dividing M that is <= max_tile, preferring
    tiles that give at least `min_steps` grid steps (v7x has 2 TensorCores)."""
    cands = [t for t in range(quantum, min(M, max_tile) + 1, quantum) if M % t == 0]
    if not cands:
        return M
    good = [t for t in cands if M // t >= min_steps]
    return max(good) if good else max(cands)


def _pick_query_tile(N, max_tile=512):
    """Query-pixel tile: prefer lane-dense multiples of 128 with >= 2 grid steps,
    fall back to N//2 (keeps both v7x TensorCores busy), then a single block."""
    cands = [t for t in range(128, min(N, max_tile) + 1, 128) if N % t == 0]
    good = [t for t in cands if N // t >= 2]
    if good:
        return max(good)
    if N % 2 == 0 and (N // 2) % 8 == 0:
        return N // 2
    return max(cands) if cands else N


# ----------------------------- Pallas kernels -------------------------------

# --- fused patch-embedding / projection matmul (bf16 MXU, f32 accumulate) ---

def _matmul_bias_kernel(a_ref, w_ref, b_ref, o_ref):
    acc = jnp.dot(a_ref[...], w_ref[...],
                  preferred_element_type=jnp.float32) + b_ref[...]
    o_ref[...] = acc.astype(o_ref.dtype)


def pallas_matmul_bias(a_bf16, w_bf16, bias_f32):
    M, K = a_bf16.shape
    N = w_bf16.shape[1]
    tm = _pick_tile_m(M)
    return pl.pallas_call(
        _matmul_bias_kernel,
        grid=(M // tm,),
        in_specs=[
            pl.BlockSpec((tm, K), lambda i: (i, 0)),
            pl.BlockSpec((K, N), lambda i: (0, 0)),       # weights resident
            pl.BlockSpec((1, N), lambda i: (0, 0)),
        ],
        out_specs=pl.BlockSpec((tm, N), lambda i: (i, 0)),
        out_shape=jax.ShapeDtypeStruct((M, N), jnp.bfloat16),   # bf16 feature store
        compiler_params=pltpu.CompilerParams(dimension_semantics=("parallel",)),
    )(a_bf16, w_bf16, bias_f32.reshape(1, N))


# --- prototype extraction for ALL shots / both modes in one launch ----------

def _proto_kernel(pool_ref, poolt_ref, feats_ref, masks_ref, protos_ref, pooled_ref):
    """pool_ref   [G2, HW]       grid average-pool matrix
       poolt_ref  [HW, G2]       its transpose (avoids an in-kernel transpose)
       feats_ref  [N_sb, HW, C]  support features (bf16), N_sb = B * n_shot
       masks_ref  [2*N_sb, HW]   downsampled masks: bg rows then fg rows
       protos_ref [P_pad, C]     out: safe-normalized prototype bank
                                 rows [n*G2,(n+1)*G2) = local protos of (shot,b)=n
                                 row  N_sb*G2 + n     = fg global proto of n
                                 remaining rows       = zero padding
       pooled_ref [2*N_sb, G2]   out: grid-average-pooled masks (bg then fg)"""
    N_sb, HW, _ = feats_ref.shape
    G2 = pool_ref.shape[0]
    pool = pool_ref[...]
    # pooled support masks for both modes: one plain matmul
    pooled_ref[...] = jnp.dot(masks_ref[...], poolt_ref[...],
                              preferred_element_type=jnp.float32)
    protos_ref[...] = jnp.zeros_like(protos_ref)       # keep padding rows finite
    glb_rows = []
    for n in range(N_sb):                               # N_sb is tiny: static unroll
        f = feats_ref[n].astype(jnp.float32)            # [HW, C]
        loc = jnp.dot(pool, f, preferred_element_type=jnp.float32)   # [G2, C]
        frow = masks_ref[pl.ds(N_sb + n, 1), :]         # fg mask row [1, HW]
        num = jnp.dot(frow, f, preferred_element_type=jnp.float32)   # [1, C]
        glb_rows.append(num / (jnp.sum(frow) + 1e-5))
        # safe_norm hoisted here: prototypes are grid-invariant in predict
        loc_n = loc * jax.lax.rsqrt(
            jnp.maximum(jnp.sum(loc * loc, axis=-1, keepdims=True), 1e-8))
        protos_ref[pl.ds(n * G2, G2), :] = loc_n
    glb = jnp.concatenate(glb_rows, axis=0)             # [N_sb, C]
    glb_n = glb * jax.lax.rsqrt(
        jnp.maximum(jnp.sum(glb * glb, axis=-1, keepdims=True), 1e-8))
    protos_ref[pl.ds(N_sb * G2, N_sb), :] = glb_n


def pallas_protos(pool, supp_feat, masks_all, P_pad):
    G2 = pool.shape[0]
    N_sb, _, Cf = supp_feat.shape
    return pl.pallas_call(
        _proto_kernel,
        out_shape=(
            jax.ShapeDtypeStruct((P_pad, Cf), jnp.float32),
            jax.ShapeDtypeStruct((2 * N_sb, G2), jnp.float32),
        ),
    )(pool, pool.T, supp_feat, masks_all)


# --- fused safe_norm + cosine*20 + per-bank masked softmax + fg argmax ------

def _predict_kernel(q_ref, p_ref, bias_ref, out_ref):
    """q_ref    [1, C, t]            query tile, channels on sublanes (no vxpose)
       p_ref    [P_pad, C]           safe-normalized prototype bank (resident)
       bias_ref [2*n_shot, P_pad, t] 0 for valid slots, -1e30 otherwise (resident)
       out_ref  [1, 3, t]            rows: bg score, fg score, fg hard assignment"""
    n_banks = bias_ref.shape[0]
    n_shot = n_banks // 2
    q = q_ref[0].astype(jnp.float32)                                # [C, t]
    # fused safe_norm of the query: scale distance columns by 1/max(||q||, 1e-4)
    inv_qn = jax.lax.rsqrt(
        jnp.maximum(jnp.sum(q * q, axis=0, keepdims=True), 1e-8))   # [1, t]
    d_base = jnp.dot(p_ref[...], q,
                     preferred_element_type=jnp.float32) * (20.0 * inv_qn)  # [P_pad, t]
    bg = fg = d_fg = None
    for k in range(n_banks):                      # banks: bg shots then fg shots
        d = d_base + bias_ref[k]
        m = jnp.max(d, axis=0, keepdims=True)
        e = jnp.exp(d - m)                        # invalid rows underflow to 0
        s = jnp.sum(e, axis=0, keepdims=True)
        pred = jnp.sum(e * d, axis=0, keepdims=True) * pl.reciprocal(s, approx=True)
        if k < n_shot:
            bg = pred if bg is None else jnp.maximum(bg, pred)
        else:
            fg = pred if fg is None else jnp.maximum(fg, pred)
            d_fg = d                              # assignment uses the last fg shot
    mf = jnp.max(d_fg, axis=0, keepdims=True)     # first-max argmax over prototypes
    idx = jax.lax.broadcasted_iota(jnp.int32, d_fg.shape, 0)
    assign = jnp.min(jnp.where(d_fg >= mf, idx, jnp.int32(2 ** 30)),
                     axis=0, keepdims=True).astype(jnp.float32)
    out_ref[0] = jnp.concatenate([bg, fg, assign], axis=0)


def pallas_predict(q_t, protos, bias_b):
    nt, Cf, t = q_t.shape
    n_banks, P_pad, _ = bias_b.shape
    return pl.pallas_call(
        _predict_kernel,
        grid=(nt,),
        in_specs=[
            pl.BlockSpec((1, Cf, t), lambda i: (i, 0, 0)),
            pl.BlockSpec((P_pad, Cf), lambda i: (0, 0)),              # resident
            pl.BlockSpec((n_banks, P_pad, t), lambda i: (0, 0, 0)),   # resident
        ],
        out_specs=pl.BlockSpec((1, 3, t), lambda i: (i, 0, 0)),
        out_shape=jax.ShapeDtypeStruct((nt, 3, t), jnp.float32),
        compiler_params=pltpu.CompilerParams(dimension_semantics=("parallel",)),
    )(q_t, protos, bias_b)


# --- separable bilinear upsample (lane-dense W-direction dot first) ---------

def _upsample_kernel(wh_ref, wwt_ref, x_ref, o_ref):
    n_img = o_ref.shape[0]
    hf = wh_ref.shape[1]
    tmp = jnp.dot(x_ref[...], wwt_ref[...],
                  preferred_element_type=jnp.float32)        # [n_img*hf, W] lane-dense
    wh = wh_ref[...]
    for n in range(n_img):                                   # n_img = B*2: static unroll
        o_ref[n] = jnp.dot(wh, tmp[n * hf:(n + 1) * hf, :],
                           preferred_element_type=jnp.float32)


def pallas_bilinear_upsample(x2d, wh, wwt, n_img):
    H, W = wh.shape[0], wwt.shape[1]
    return pl.pallas_call(
        _upsample_kernel,
        out_shape=jax.ShapeDtypeStruct((n_img, H, W), jnp.float32),
    )(wh, wwt, x2d)


# ------------------------------- glue / setup -------------------------------

def bilinear_matrix(out_size, in_size):
    """Row-interpolation matrix matching F.interpolate(bilinear, align_corners=False)."""
    scale = in_size / out_size
    dst = np.arange(out_size, dtype=np.float64)
    src = np.maximum((dst + 0.5) * scale - 0.5, 0.0)
    x0 = np.floor(src)
    lam = src - x0
    x0 = np.clip(x0.astype(np.int64), 0, in_size - 1)
    x1 = np.clip(x0 + 1, 0, in_size - 1)
    w = np.zeros((out_size, in_size), np.float32)
    rows = np.arange(out_size)
    np.add.at(w, (rows, x0), 1.0 - lam)
    np.add.at(w, (rows, x1), lam)
    return w


def pool_matrix(hf, wf, grid_size):
    """AvgPool2d(kernel=(hf//G, wf//G)) expressed as a [G*G, hf*wf] matrix."""
    kh, kw = hf // grid_size, wf // grid_size
    m = np.zeros((grid_size * grid_size, hf * wf), np.float32)
    r = 0
    for gy in range(grid_size):
        for gx in range(grid_size):
            cell = np.zeros((hf, wf), np.float32)
            cell[gy * kh:(gy + 1) * kh, gx * kw:(gx + 1) * kw] = 1.0 / (kh * kw)
            m[r] = cell.reshape(-1)
            r += 1
    return m


def init_params(key, in_ch=3, patch=16, backbone_dim=2048, embed_dim=256):
    k1, k2, k3, k4 = jax.random.split(key, 4)
    w_enc = 0.02 * jax.random.normal(k1, (in_ch * patch * patch, backbone_dim), jnp.float32)
    b_enc = 0.02 * jax.random.normal(k2, (backbone_dim,), jnp.float32)
    w_proj = 0.02 * jax.random.normal(k3, (backbone_dim, embed_dim), jnp.float32)
    b_proj = 0.02 * jax.random.normal(k4, (embed_dim,), jnp.float32)
    # No nonlinearity between the two linear layers -> fold them once:
    # 768 -> 2048 -> 256 becomes a single 768 -> 256 matmul (bf16 weights).
    w_fused = (w_enc @ w_proj).astype(jnp.bfloat16)
    b_fused = (b_enc @ w_proj + b_proj).astype(jnp.float32)
    return {"patch": patch, "w_fused": w_fused, "b_fused": b_fused}


def get_features(imgs, w_fused, b_fused, patch):
    # TODO(synk): the fcn_resnet50 backbone is replaced by a deterministic
    # stride-16 patch-embedding fused with the 1x1 feature_proj conv
    # (3*16*16 -> 256); pretrained weights are not loadable here.
    Bn, C, H, W = imgs.shape
    hf, wf = H // patch, W // patch
    x = imgs.reshape(Bn, C, hf, patch, wf, patch)
    x = jnp.transpose(x, (0, 2, 4, 1, 3, 5)).reshape(Bn * hf * wf, C * patch * patch)
    feats = pallas_matmul_bias(x.astype(jnp.bfloat16), w_fused, b_fused)
    return feats, hf, wf          # [Bn*hf*wf, 256] bf16, image-major row order


def few_shot_seg_forward(w_fused, b_fused, supp_imgs, fore_mask, back_mask, qry_imgs,
                         *, patch=16, proto_grid_size=4, thresh=0.95):
    B, n_shot, C, H, W = supp_imgs.shape
    N_sb = B * n_shot
    # one feature matmul for support AND query (amortizes launch + weight DMA,
    # and guarantees a >= 2-step "parallel" grid for v7x's two TensorCores)
    imgs_all = jnp.concatenate([supp_imgs.reshape(N_sb, C, H, W),
                                qry_imgs.reshape(B, C, H, W)], axis=0)
    feats_all, hf, wf = get_features(imgs_all, w_fused, b_fused, patch)
    HW = hf * wf
    Cf = feats_all.shape[1]
    supp_feat = feats_all[:N_sb * HW].reshape(N_sb, HW, Cf)
    qry_feat = feats_all[N_sb * HW:]                         # [B*HW, Cf] bf16

    # nearest-neighbour mask downsampling (== F.interpolate(mode='nearest'))
    iy = (np.arange(hf) * H) // hf
    ix = (np.arange(wf) * W) // wf
    fore_rs = fore_mask[:, :, 0][:, :, iy][:, :, :, ix].reshape(N_sb, HW)
    back_rs = back_mask[:, :, 0][:, :, iy][:, :, :, ix].reshape(N_sb, HW)
    masks_all = jnp.concatenate([back_rs, fore_rs], axis=0).astype(jnp.float32)

    # one prototype-extraction launch for all shots / both modes
    G2 = proto_grid_size * proto_grid_size
    pool = jnp.asarray(pool_matrix(hf, wf, proto_grid_size))
    P_all = N_sb * (G2 + 1)
    P_pad = ((P_all + 7) // 8) * 8            # pad the bank to full sublanes
    protos, pooled = pallas_protos(pool, supp_feat, masks_all, P_pad)
    pooled_bg, pooled_fg = pooled[:N_sb], pooled[N_sb:]

    # per-(mode, shot) validity -> -1e30 softmax bias.  This is a few-hundred-
    # byte jnp op on the [2*N_sb, G2] pooled output (replaces torch.nonzero /
    # boolean prototype selection); padded slots are masked the same way.
    n_banks = 2 * n_shot
    valid = jnp.zeros((n_banks, P_pad), jnp.bool_)
    for s in range(n_shot):
        lo, hi = s * B * G2, (s + 1) * B * G2
        valid = valid.at[s, lo:hi].set(
            (pooled_bg[s * B:(s + 1) * B] > thresh).reshape(-1))
        valid = valid.at[n_shot + s, lo:hi].set(
            (pooled_fg[s * B:(s + 1) * B] > thresh).reshape(-1))
        valid = valid.at[n_shot + s,
                         N_sb * G2 + s * B:N_sb * G2 + (s + 1) * B].set(True)
    # TODO(synk): the data-dependent 'gridconv'->'mask' fallback (no grid cell
    # above thresh) is not implemented; example masks guarantee hits.
    bias = jnp.where(valid, 0.0, -1e30).astype(jnp.float32)

    # one predict launch for all banks; query pre-transposed to [nt, C, t] so
    # the kernel runs a plain [P, C] @ [C, t] matmul (no in-kernel transpose)
    Nq = B * HW
    t = _pick_query_tile(Nq)
    nt = Nq // t
    q_t = qry_feat.T.reshape(Cf, nt, t).transpose(1, 0, 2)
    bias_b = jnp.broadcast_to(bias[:, :, None], (n_banks, P_pad, t))  # lane-dense bias
    out = pallas_predict(q_t, protos, bias_b)                 # [nt, 3, t]
    out = out.transpose(1, 0, 2).reshape(3, Nq)
    bg_score = out[0].reshape(B, 1, hf, wf)
    fg_score = out[1].reshape(B, 1, hf, wf)
    fg_assign = out[2].reshape(B, hf, wf)
    pf_last = pooled_fg[(n_shot - 1) * B:]
    fg_proto_grid = jnp.where(pf_last < thresh, 0.0, pf_last).reshape(
        B, 1, proto_grid_size, proto_grid_size)

    # bilinear upsample of the [B, 2, hf, wf] score map back to image size
    pred = jnp.concatenate([bg_score, fg_score], axis=1)
    wh = jnp.asarray(bilinear_matrix(H, hf))
    wwt = jnp.asarray(bilinear_matrix(W, wf).T)
    up = pallas_bilinear_upsample(pred.reshape(B * 2 * hf, wf), wh, wwt, B * 2)
    output = up.reshape(B, 2, H, W)

    align_loss = 0.0     # config['align'] is False / eval mode
    return output, align_loss, [None, None], [[fg_assign]], [fg_proto_grid], None, None


# ----------------------------------- main -----------------------------------

if __name__ == "__main__":
    key = jax.random.PRNGKey(0)
    k_params, k_supp, k_qry = jax.random.split(key, 3)
    params = init_params(k_params)

    B, n_shot, C, H, W = 2, 1, 3, 128, 128
    supp_imgs = jax.random.normal(k_supp, (B, n_shot, C, H, W), jnp.float32)
    qry_imgs = jax.random.normal(k_qry, (B, 1, C, H, W), jnp.float32)
    fore_mask = jnp.zeros((B, n_shot, 1, H, W), jnp.float32)
    fore_mask = fore_mask.at[:, :, :, :64, :64].set(1.0)
    back_mask = 1.0 - fore_mask

    fwd = jax.jit(few_shot_seg_forward, static_argnames=("patch", "proto_grid_size"))
    output, align_loss, _, fg_assigns, fg_proto_grids, _, _ = fwd(
        params["w_fused"], params["b_fused"], supp_imgs, fore_mask, back_mask,
        qry_imgs, patch=params["patch"], proto_grid_size=4)
    output = jax.block_until_ready(output)

    assert output.shape == (B, 2, H, W)
    assert fg_assigns[0][0].shape == (B, H // 16, W // 16)
    assert fg_proto_grids[0].shape == (B, 1, 4, 4)
    assert bool(jnp.all(jnp.isfinite(output)))
    print("KERNEL_OK")
</pallas_src>

<mosaic_0001>
module attributes {stable_mosaic.version = 11 : i64} {
  func.func @_matmul_bias_kernel(%arg0: i32, %arg1: memref<128x768xbf16, #tpu.memory_space<vmem>>, %arg2: memref<768x256xbf16, #tpu.memory_space<vmem>>, %arg3: memref<1x256xf32, #tpu.memory_space<vmem>>, %arg4: memref<128x256xbf16, #tpu.memory_space<vmem>>) attributes {dimension_semantics = [#tpu.dimension_semantics<parallel>], iteration_bounds = array<i64: 2>, scalar_prefetch = 0 : i64, scratch_operands = 0 : i64, tpu.core_type = #tpu.core_type<tc>, window_params = [{transform_indices = @transform_0, window_bounds = array<i64: 128, 768>}, {pipeline_mode = #tpu.pipeline_mode<synchronous>, transform_indices = @transform_1, window_bounds = array<i64: 768, 256>}, {pipeline_mode = #tpu.pipeline_mode<synchronous>, transform_indices = @transform_2, window_bounds = array<i64: 1, 256>}, {transform_indices = @transform_3, window_bounds = array<i64: 128, 256>}]} {
    %c0 = arith.constant 0 : index
    %c0_0 = arith.constant 0 : index
    %0 = vector.load %arg1[%c0, %c0_0] : memref<128x768xbf16, #tpu.memory_space<vmem>>, vector<128x768xbf16>
    %c0_1 = arith.constant 0 : index
    %c0_2 = arith.constant 0 : index
    %1 = vector.load %arg2[%c0_1, %c0_2] : memref<768x256xbf16, #tpu.memory_space<vmem>>, vector<768x256xbf16>
    %cst = arith.constant dense<0.000000e+00> : vector<128x256xf32>
    %2 = tpu.matmul %0, %1, %cst {dimension_numbers = #tpu.dot_dimension_numbers<[1], [0], [0], [1], [0, 0, 1, 1], [], []>} : vector<128x768xbf16>, vector<768x256xbf16>, vector<128x256xf32> -> vector<128x256xf32>
    %c0_3 = arith.constant 0 : index
    %c0_4 = arith.constant 0 : index
    %3 = vector.load %arg3[%c0_3, %c0_4] : memref<1x256xf32, #tpu.memory_space<vmem>>, vector<1x256xf32>
    %4 = vector.broadcast %3 : vector<1x256xf32> to vector<128x256xf32>
    %5 = arith.addf %2, %4 : vector<128x256xf32>
    %6 = arith.truncf %5 : vector<128x256xf32> to vector<128x256xbf16>
    %c0_5 = arith.constant 0 : index
    %c0_6 = arith.constant 0 : index
    %7 = vector.load %arg4[%c0_5, %c0_6] : memref<128x256xbf16, #tpu.memory_space<vmem>>, vector<128x256xbf16>
    tpu.vector_store %arg4[%c0_5, %c0_6], %6 {strides = array<i32>} : memref<128x256xbf16, #tpu.memory_space<vmem>>, vector<128x256xbf16>,
    return
  }
  func.func @transform_0(%arg0: i32) -> (i32, i32) {
    %c0_i32 = arith.constant 0 : i32
    %c0_i32_0 = arith.constant 0 : i32
    return %arg0, %c0_i32 : i32, i32
  }
  func.func @transform_1(%arg0: i32) -> (i32, i32) {
    %c0_i32 = arith.constant 0 : i32
    %c0_i32_0 = arith.constant 0 : i32
    %c0_i32_1 = arith.constant 0 : i32
    return %c0_i32, %c0_i32_0 : i32, i32
  }
  func.func @transform_2(%arg0: i32) -> (i32, i32) {
    %c0_i32 = arith.constant 0 : i32
    %c0_i32_0 = arith.constant 0 : i32
    %c0_i32_1 = arith.constant 0 : i32
    return %c0_i32, %c0_i32_0 : i32, i32
  }
  func.func @transform_3(%arg0: i32) -> (i32, i32) {
    %c0_i32 = arith.constant 0 : i32
    %c0_i32_0 = arith.constant 0 : i32
    return %arg0, %c0_i32 : i32, i32
  }
}

module attributes {stable_mosaic.version = 11 : i64} {
  func.func @_proto_kernel(%arg0: memref<16x64xf32, #tpu.memory_space<vmem>>, %arg1: memref<64x16xf32, #tpu.memory_space<vmem>>, %arg2: memref<2x64x256xbf16, #tpu.memory_space<vmem>>, %arg3: memref<4x64xf32, #tpu.memory_space<vmem>>, %arg4: memref<40x256xf32, #tpu.memory_space<vmem>>, %arg5: memref<4x16xf32, #tpu.memory_space<vmem>>) attributes {dimension_semantics = [], scalar_prefetch = 0 : i64, scratch_operands = 0 : i64, tpu.core_type = #tpu.core_type<tc>} {
    %c0 = arith.constant 0 : index
    %c0_0 = arith.constant 0 : index
    %0 = vector.load %arg0[%c0, %c0_0] : memref<16x64xf32, #tpu.memory_space<vmem>>, vector<16x64xf32>
    %c0_1 = arith.constant 0 : index
    %c0_2 = arith.constant 0 : index
    %1 = vector.load %arg3[%c0_1, %c0_2] : memref<4x64xf32, #tpu.memory_space<vmem>>, vector<4x64xf32>
    %c0_3 = arith.constant 0 : index
    %c0_4 = arith.constant 0 : index
    %2 = vector.load %arg1[%c0_3, %c0_4] : memref<64x16xf32, #tpu.memory_space<vmem>>, vector<64x16xf32>
    %cst = arith.constant dense<0.000000e+00> : vector<4x16xf32>
    %3 = tpu.matmul %1, %2, %cst {dimension_numbers = #tpu.dot_dimension_numbers<[1], [0], [0], [1], [0, 0, 1, 1], [], []>} : vector<4x64xf32>, vector<64x16xf32>, vector<4x16xf32> -> vector<4x16xf32>
    %c0_5 = arith.constant 0 : index
    %c0_6 = arith.constant 0 : index
    %4 = vector.load %arg5[%c0_5, %c0_6] : memref<4x16xf32, #tpu.memory_space<vmem>>, vector<4x16xf32>
    tpu.vector_store %arg5[%c0_5, %c0_6], %3 {strides = array<i32>} : memref<4x16xf32, #tpu.memory_space<vmem>>, vector<4x16xf32>,
    %cst_7 = arith.constant 0.000000e+00 : f32
    %5 = vector.broadcast %cst_7 : f32 to vector<40x256xf32>
    %c0_8 = arith.constant 0 : index
    %c0_9 = arith.constant 0 : index
    %6 = vector.load %arg4[%c0_8, %c0_9] : memref<40x256xf32, #tpu.memory_space<vmem>>, vector<40x256xf32>
    tpu.vector_store %arg4[%c0_8, %c0_9], %5 {strides = array<i32>} : memref<40x256xf32, #tpu.memory_space<vmem>>, vector<40x256xf32>,
    %c0_10 = arith.constant 0 : index
    %c0_11 = arith.constant 0 : index
    %c0_12 = arith.constant 0 : index
    %7 = vector.load %arg2[%c0_10, %c0_11, %c0_12] : memref<2x64x256xbf16, #tpu.memory_space<vmem>>, vector<1x64x256xbf16>
    %8 = vector.shape_cast %7 : vector<1x64x256xbf16> to vector<64x256xbf16>
    %9 = arith.extf %8 : vector<64x256xbf16> to vector<64x256xf32>
    %cst_13 = arith.constant dense<0.000000e+00> : vector<16x256xf32>
    %10 = tpu.matmul %0, %9, %cst_13 {dimension_numbers = #tpu.dot_dimension_numbers<[1], [0], [0], [1], [0, 0, 1, 1], [], []>} : vector<16x64xf32>, vector<64x256xf32>, vector<16x256xf32> -> vector<16x256xf32>
    %c2 = arith.constant 2 : index
    %c0_14 = arith.constant 0 : index
    %11 = vector.load %arg3[%c2, %c0_14] : memref<4x64xf32, #tpu.memory_space<vmem>>, vector<1x64xf32>
    %cst_15 = arith.constant dense<0.000000e+00> : vector<1x256xf32>
    %12 = tpu.matmul %11, %9, %cst_15 {dimension_numbers = #tpu.dot_dimension_numbers<[1], [0], [0], [1], [0, 0, 1, 1], [], []>} : vector<1x64xf32>, vector<64x256xf32>, vector<1x256xf32> -> vector<1x256xf32>
    %13 = vector.shape_cast %11 : vector<1x64xf32> to vector<1x1x64xf32>
    %cst_16 = arith.constant dense<0.000000e+00> : vector<1xf32>
    %14 = vector.multi_reduction <add>, %13, %cst_16 [1, 2] : vector<1x1x64xf32> to vector<1xf32>
    %15 = vector.shape_cast %14 : vector<1xf32> to vector<1x1x1xf32>
    %16 = vector.extract %15[0, 0, 0] : f32 from vector<1x1x1xf32>
    %cst_17 = arith.constant 9.99999974E-6 : f32
    %17 = arith.addf %16, %cst_17 : f32
    %18 = vector.broadcast %17 : f32 to vector<1x256xf32>
    %19 = arith.divf %12, %18 : vector<1x256xf32>
    %20 = arith.mulf %10, %10 : vector<16x256xf32>
    %cst_18 = arith.constant dense<0.000000e+00> : vector<16xf32>
    %21 = vector.multi_reduction <add>, %20, %cst_18 [1] : vector<16x256xf32> to vector<16xf32>
    %22 = vector.shape_cast %21 : vector<16xf32> to vector<16x1xf32>
    %cst_19 = arith.constant 9.99999993E-9 : f32
    %23 = vector.broadcast %cst_19 : f32 to vector<16x1xf32>
    %24 = arith.maximumf %22, %23 : vector<16x1xf32>
    %25 = math.rsqrt %24 : vector<16x1xf32>
    %26 = vector.broadcast %25 : vector<16x1xf32> to vector<16x256xf32>
    %27 = arith.mulf %10, %26 : vector<16x256xf32>
    %c0_20 = arith.constant 0 : index
    %c0_21 = arith.constant 0 : index
    %28 = vector.load %arg4[%c0_20, %c0_21] : memref<40x256xf32, #tpu.memory_space<vmem>>, vector<16x256xf32>
    tpu.vector_store %arg4[%c0_20, %c0_21], %27 {strides = array<i32>} : memref<40x256xf32, #tpu.memory_space<vmem>>, vector<16x256xf32>,
    %c1 = arith.constant 1 : index
    %c0_22 = arith.constant 0 : index
    %c0_23 = arith.constant 0 : index
    %29 = vector.load %arg2[%c1, %c0_22, %c0_23] : memref<2x64x256xbf16, #tpu.memory_space<vmem>>, vector<1x64x256xbf16>
    %30 = vector.shape_cast %29 : vector<1x64x256xbf16> to vector<64x256xbf16>
    %31 = arith.extf %30 : vector<64x256xbf16> to vector<64x256xf32>
    %cst_24 = arith.constant dense<0.000000e+00> : vector<16x256xf32>
    %32 = tpu.matmul %0, %31, %cst_24 {dimension_numbers = #tpu.dot_dimension_numbers<[1], [0], [0], [1], [0, 0, 1, 1], [], []>} : vector<16x64xf32>, vector<64x256xf32>, vector<16x256xf32> -> vector<16x256xf32>
    %c3 = arith.constant 3 : index
    %c0_25 = arith.constant 0 : index
    %33 = vector.load %arg3[%c3, %c0_25] : memref<4x64xf32, #tpu.memory_space<vmem>>, vector<1x64xf32>
    %cst_26 = arith.constant dense<0.000000e+00> : vector<1x256xf32>
    %34 = tpu.matmul %33, %31, %cst_26 {dimension_numbers = #tpu.dot_dimension_numbers<[1], [0], [0], [1], [0, 0, 1, 1], [], []>} : vector<1x64xf32>, vector<64x256xf32>, vector<1x256xf32> -> vector<1x256xf32>
    %35 = vector.shape_cast %33 : vector<1x64xf32> to vector<1x1x64xf32>
    %cst_27 = arith.constant dense<0.000000e+00> : vector<1xf32>
    %36 = vector.multi_reduction <add>, %35, %cst_27 [1, 2] : vector<1x1x64xf32> to vector<1xf32>
    %37 = vector.shape_cast %36 : vector<1xf32> to vector<1x1x1xf32>
    %38 = vector.extract %37[0, 0, 0] : f32 from vector<1x1x1xf32>
    %cst_28 = arith.constant 9.99999974E-6 : f32
    %39 = arith.addf %38, %cst_28 : f32
    %40 = vector.broadcast %39 : f32 to vector<1x256xf32>
    %41 = arith.divf %34, %40 : vector<1x256xf32>
    %42 = arith.mulf %32, %32 : vector<16x256xf32>
    %cst_29 = arith.constant dense<0.000000e+00> : vector<16xf32>
    %43 = vector.multi_reduction <add>, %42, %cst_29 [1] : vector<16x256xf32> to vector<16xf32>
    %44 = vector.shape_cast %43 : vector<16xf32> to vector<16x1xf32>
    %cst_30 = arith.constant 9.99999993E-9 : f32
    %45 = vector.broadcast %cst_30 : f32 to vector<16x1xf32>
    %46 = arith.maximumf %44, %45 : vector<16x1xf32>
    %47 = math.rsqrt %46 : vector<16x1xf32>
    %48 = vector.broadcast %47 : vector<16x1xf32> to vector<16x256xf32>
    %49 = arith.mulf %32, %48 : vector<16x256xf32>
    %c16 = arith.constant 16 : index
    %c0_31 = arith.constant 0 : index
    %50 = vector.load %arg4[%c16, %c0_31] : memref<40x256xf32, #tpu.memory_space<vmem>>, vector<16x256xf32>
    tpu.vector_store %arg4[%c16, %c0_31], %49 {strides = array<i32>} : memref<40x256xf32, #tpu.memory_space<vmem>>, vector<16x256xf32>,
    %51 = tpu.concatenate %19, %41 in 0 : vector<1x256xf32>, vector<1x256xf32> -> vector<2x256xf32>
    %52 = arith.mulf %51, %51 : vector<2x256xf32>
    %cst_32 = arith.constant dense<0.000000e+00> : vector<2xf32>
    %53 = vector.multi_reduction <add>, %52, %cst_32 [1] : vector<2x256xf32> to vector<2xf32>
    %54 = vector.shape_cast %53 : vector<2xf32> to vector<2x1xf32>
    %cst_33 = arith.constant 9.99999993E-9 : f32
    %55 = vector.broadcast %cst_33 : f32 to vector<2x1xf32>
    %56 = arith.maximumf %54, %55 : vector<2x1xf32>
    %57 = math.rsqrt %56 : vector<2x1xf32>
    %58 = vector.broadcast %57 : vector<2x1xf32> to vector<2x256xf32>
    %59 = arith.mulf %51, %58 : vector<2x256xf32>
    %c32 = arith.constant 32 : index
    %c0_34 = arith.constant 0 : index
    %60 = vector.load %arg4[%c32, %c0_34] : memref<40x256xf32, #tpu.memory_space<vmem>>, vector<2x256xf32>
    tpu.vector_store %arg4[%c32, %c0_34], %59 {strides = array<i32>} : memref<40x256xf32, #tpu.memory_space<vmem>>, vector<2x256xf32>,
    return
  }
}

module attributes {stable_mosaic.version = 11 : i64} {
  func.func @_predict_kernel(%arg0: i32, %arg1: memref<1x256x64xbf16, #tpu.memory_space<vmem>>, %arg2: memref<40x256xf32, #tpu.memory_space<vmem>>, %arg3: memref<2x40x64xf32, #tpu.memory_space<vmem>>, %arg4: memref<1x3x64xf32, #tpu.memory_space<vmem>>) attributes {dimension_semantics = [#tpu.dimension_semantics<parallel>], iteration_bounds = array<i64: 2>, scalar_prefetch = 0 : i64, scratch_operands = 0 : i64, tpu.core_type = #tpu.core_type<tc>, window_params = [{transform_indices = @transform_0, window_bounds = array<i64: 1, 256, 64>}, {pipeline_mode = #tpu.pipeline_mode<synchronous>, transform_indices = @transform_1, window_bounds = array<i64: 40, 256>}, {pipeline_mode = #tpu.pipeline_mode<synchronous>, transform_indices = @transform_2, window_bounds = array<i64: 2, 40, 64>}, {transform_indices = @transform_3, window_bounds = array<i64: 1, 3, 64>}]} {
    %c0 = arith.constant 0 : index
    %c0_0 = arith.constant 0 : index
    %c0_1 = arith.constant 0 : index
    %0 = vector.load %arg1[%c0, %c0_0, %c0_1] : memref<1x256x64xbf16, #tpu.memory_space<vmem>>, vector<1x256x64xbf16>
    %1 = vector.shape_cast %0 : vector<1x256x64xbf16> to vector<256x64xbf16>
    %2 = arith.extf %1 : vector<256x64xbf16> to vector<256x64xf32>
    %3 = arith.mulf %2, %2 : vector<256x64xf32>
    %cst = arith.constant dense<0.000000e+00> : vector<64xf32>
    %4 = vector.multi_reduction <add>, %3, %cst [0] : vector<256x64xf32> to vector<64xf32>
    %5 = vector.shape_cast %4 : vector<64xf32> to vector<1x64xf32>
    %cst_2 = arith.constant 9.99999993E-9 : f32
    %6 = vector.broadcast %cst_2 : f32 to vector<1x64xf32>
    %7 = arith.maximumf %5, %6 : vector<1x64xf32>
    %8 = math.rsqrt %7 : vector<1x64xf32>
    %c0_3 = arith.constant 0 : index
    %c0_4 = arith.constant 0 : index
    %9 = vector.load %arg2[%c0_3, %c0_4] : memref<40x256xf32, #tpu.memory_space<vmem>>, vector<40x256xf32>
    %cst_5 = arith.constant dense<0.000000e+00> : vector<40x64xf32>
    %10 = tpu.matmul %9, %2, %cst_5 {dimension_numbers = #tpu.dot_dimension_numbers<[1], [0], [0], [1], [0, 0, 1, 1], [], []>} : vector<40x256xf32>, vector<256x64xf32>, vector<40x64xf32> -> vector<40x64xf32>
    %cst_6 = arith.constant 2.000000e+01 : f32
    %11 = vector.broadcast %cst_6 : f32 to vector<1x64xf32>
    %12 = arith.mulf %11, %8 : vector<1x64xf32>
    %13 = vector.broadcast %12 : vector<1x64xf32> to vector<40x64xf32>
    %14 = arith.mulf %10, %13 : vector<40x64xf32>
    %c0_7 = arith.constant 0 : index
    %c0_8 = arith.constant 0 : index
    %c0_9 = arith.constant 0 : index
    %15 = vector.load %arg3[%c0_7, %c0_8, %c0_9] : memref<2x40x64xf32, #tpu.memory_space<vmem>>, vector<1x40x64xf32>
    %16 = vector.shape_cast %15 : vector<1x40x64xf32> to vector<40x64xf32>
    %17 = arith.addf %14, %16 : vector<40x64xf32>
    %cst_10 = arith.constant dense<0xFF800000> : vector<64xf32>
    %18 = vector.multi_reduction <maximumf>, %17, %cst_10 [0] : vector<40x64xf32> to vector<64xf32>
    %19 = vector.shape_cast %18 : vector<64xf32> to vector<1x64xf32>
    %20 = vector.broadcast %19 : vector<1x64xf32> to vector<40x64xf32>
    %21 = arith.subf %17, %20 : vector<40x64xf32>
    %22 = math.exp %21 : vector<40x64xf32>
    %cst_11 = arith.constant dense<0.000000e+00> : vector<64xf32>
    %23 = vector.multi_reduction <add>, %22, %cst_11 [0] : vector<40x64xf32> to vector<64xf32>
    %24 = vector.shape_cast %23 : vector<64xf32> to vector<1x64xf32>
    %25 = arith.mulf %22, %17 : vector<40x64xf32>
    %cst_12 = arith.constant dense<0.000000e+00> : vector<64xf32>
    %26 = vector.multi_reduction <add>, %25, %cst_12 [0] : vector<40x64xf32> to vector<64xf32>
    %27 = vector.shape_cast %26 : vector<64xf32> to vector<1x64xf32>
    %28 = tpu.reciprocal %24 {approx = true} : vector<1x64xf32> -> vector<1x64xf32>
    %29 = arith.mulf %27, %28 : vector<1x64xf32>
    %c1 = arith.constant 1 : index
    %c0_13 = arith.constant 0 : index
    %c0_14 = arith.constant 0 : index
    %30 = vector.load %arg3[%c1, %c0_13, %c0_14] : memref<2x40x64xf32, #tpu.memory_space<vmem>>, vector<1x40x64xf32>
    %31 = vector.shape_cast %30 : vector<1x40x64xf32> to vector<40x64xf32>
    %32 = arith.addf %14, %31 : vector<40x64xf32>
    %cst_15 = arith.constant dense<0xFF800000> : vector<64xf32>
    %33 = vector.multi_reduction <maximumf>, %32, %cst_15 [0] : vector<40x64xf32> to vector<64xf32>
    %34 = vector.shape_cast %33 : vector<64xf32> to vector<1x64xf32>
    %35 = vector.broadcast %34 : vector<1x64xf32> to vector<40x64xf32>
    %36 = arith.subf %32, %35 : vector<40x64xf32>
    %37 = math.exp %36 : vector<40x64xf32>
    %cst_16 = arith.constant dense<0.000000e+00> : vector<64xf32>
    %38 = vector.multi_reduction <add>, %37, %cst_16 [0] : vector<40x64xf32> to vector<64xf32>
    %39 = vector.shape_cast %38 : vector<64xf32> to vector<1x64xf32>
    %40 = arith.mulf %37, %32 : vector<40x64xf32>
    %cst_17 = arith.constant dense<0.000000e+00> : vector<64xf32>
    %41 = vector.multi_reduction <add>, %40, %cst_17 [0] : vector<40x64xf32> to vector<64xf32>
    %42 = vector.shape_cast %41 : vector<64xf32> to vector<1x64xf32>
    %43 = tpu.reciprocal %39 {approx = true} : vector<1x64xf32> -> vector<1x64xf32>
    %44 = arith.mulf %42, %43 : vector<1x64xf32>
    %cst_18 = arith.constant dense<0xFF800000> : vector<64xf32>
    %45 = vector.multi_reduction <maximumf>, %32, %cst_18 [0] : vector<40x64xf32> to vector<64xf32>
    %46 = vector.shape_cast %45 : vector<64xf32> to vector<1x64xf32>
    %47 = tpu.iota {dimensions = array<i32: 0>} : vector<40x64xi32>
    %48 = vector.broadcast %46 : vector<1x64xf32> to vector<40x64xf32>
    %49 = arith.cmpf oge, %32, %48 : vector<40x64xf32>
    %c1073741824_i32 = arith.constant 1073741824 : i32
    %50 = vector.broadcast %c1073741824_i32 : i32 to vector<40x64xi32>
    %51 = arith.select %49, %47, %50 : vector<40x64xi1>, vector<40x64xi32>
    %cst_19 = arith.constant dense<2147483647> : vector<64xi32>
    %52 = vector.multi_reduction <minsi>, %51, %cst_19 [0] : vector<40x64xi32> to vector<64xi32>
    %53 = vector.shape_cast %52 : vector<64xi32> to vector<1x64xi32>
    %54 = arith.sitofp %53 : vector<1x64xi32> to vector<1x64xf32>
    %55 = tpu.concatenate %29, %44, %54 in 0 : vector<1x64xf32>, vector<1x64xf32>, vector<1x64xf32> -> vector<3x64xf32>
    %c0_20 = arith.constant 0 : index
    %c0_21 = arith.constant 0 : index
    %c0_22 = arith.constant 0 : index
    %56 = vector.load %arg4[%c0_20, %c0_21, %c0_22] : memref<1x3x64xf32, #tpu.memory_space<vmem>>, vector<1x3x64xf32>
    %57 = vector.shape_cast %56 : vector<1x3x64xf32> to vector<3x64xf32>
    %58 = vector.shape_cast %55 : vector<3x64xf32> to vector<1x3x64xf32>
    tpu.vector_store %arg4[%c0_20, %c0_21, %c0_22], %58 {strides = array<i32>} : memref<1x3x64xf32, #tpu.memory_space<vmem>>, vector<1x3x64xf32>,
    return
  }
  func.func @transform_0(%arg0: i32) -> (i32, i32, i32) {
    %c0_i32 = arith.constant 0 : i32
    %c0_i32_0 = arith.constant 0 : i32
    %c0_i32_1 = arith.constant 0 : i32
    return %arg0, %c0_i32, %c0_i32_0 : i32, i32, i32
  }
  func.func @transform_1(%arg0: i32) -> (i32, i32) {
    %c0_i32 = arith.constant 0 : i32
    %c0_i32_0 = arith.constant 0 : i32
    %c0_i32_1 = arith.constant 0 : i32
    return %c0_i32, %c0_i32_0 : i32, i32
  }
  func.func @transform_2(%arg0: i32) -> (i32, i32, i32) {
    %c0_i32 = arith.constant 0 : i32
    %c0_i32_0 = arith.constant 0 : i32
    %c0_i32_1 = arith.constant 0 : i32
    %c0_i32_2 = arith.constant 0 : i32
    return %c0_i32, %c0_i32_0, %c0_i32_1 : i32, i32, i32
  }
  func.func @transform_3(%arg0: i32) -> (i32, i32, i32) {
    %c0_i32 = arith.constant 0 : i32
    %c0_i32_0 = arith.constant 0 : i32
    %c0_i32_1 = arith.constant 0 : i32
    return %arg0, %c0_i32, %c0_i32_0 : i32, i32, i32
  }
}

module attributes {stable_mosaic.version = 11 : i64} {
  func.func @_upsample_kernel(%arg0: memref<128x8xf32, #tpu.memory_space<vmem>>, %arg1: memref<8x128xf32, #tpu.memory_space<vmem>>, %arg2: memref<32x8xf32, #tpu.memory_space<vmem>>, %arg3: memref<4x128x128xf32, #tpu.memory_space<vmem>>) attributes {dimension_semantics = [], scalar_prefetch = 0 : i64, scratch_operands = 0 : i64, tpu.core_type = #tpu.core_type<tc>} {
    %c0 = arith.constant 0 : index
    %c0_0 = arith.constant 0 : index
    %0 = vector.load %arg2[%c0, %c0_0] : memref<32x8xf32, #tpu.memory_space<vmem>>, vector<32x8xf32>
    %c0_1 = arith.constant 0 : index
    %c0_2 = arith.constant 0 : index
    %1 = vector.load %arg1[%c0_1, %c0_2] : memref<8x128xf32, #tpu.memory_space<vmem>>, vector<8x128xf32>
    %cst = arith.constant dense<0.000000e+00> : vector<32x128xf32>
    %2 = tpu.matmul %0, %1, %cst {dimension_numbers = #tpu.dot_dimension_numbers<[1], [0], [0], [1], [0, 0, 1, 1], [], []>} : vector<32x8xf32>, vector<8x128xf32>, vector<32x128xf32> -> vector<32x128xf32>
    %c0_3 = arith.constant 0 : index
    %c0_4 = arith.constant 0 : index
    %3 = vector.load %arg0[%c0_3, %c0_4] : memref<128x8xf32, #tpu.memory_space<vmem>>, vector<128x8xf32>
    %4 = vector.extract_strided_slice %2 {offsets = [0, 0], sizes = [8, 128], strides = [1, 1]} : vector<32x128xf32> to vector<8x128xf32>
    %cst_5 = arith.constant dense<0.000000e+00> : vector<128x128xf32>
    %5 = tpu.matmul %3, %4, %cst_5 {dimension_numbers = #tpu.dot_dimension_numbers<[1], [0], [0], [1], [0, 0, 1, 1], [], []>} : vector<128x8xf32>, vector<8x128xf32>, vector<128x128xf32> -> vector<128x128xf32>
    %c0_6 = arith.constant 0 : index
    %c0_7 = arith.constant 0 : index
    %c0_8 = arith.constant 0 : index
    %6 = vector.load %arg3[%c0_6, %c0_7, %c0_8] : memref<4x128x128xf32, #tpu.memory_space<vmem>>, vector<1x128x128xf32>
    %7 = vector.shape_cast %6 : vector<1x128x128xf32> to vector<128x128xf32>
    %8 = vector.shape_cast %5 : vector<128x128xf32> to vector<1x128x128xf32>
    tpu.vector_store %arg3[%c0_6, %c0_7, %c0_8], %8 {strides = array<i32>} : memref<4x128x128xf32, #tpu.memory_space<vmem>>, vector<1x128x128xf32>,
    %9 = vector.extract_strided_slice %2 {offsets = [8, 0], sizes = [8, 128], strides = [1, 1]} : vector<32x128xf32> to vector<8x128xf32>
    %cst_9 = arith.constant dense<0.000000e+00> : vector<128x128xf32>
    %10 = tpu.matmul %3, %9, %cst_9 {dimension_numbers = #tpu.dot_dimension_numbers<[1], [0], [0], [1], [0, 0, 1, 1], [], []>} : vector<128x8xf32>, vector<8x128xf32>, vector<128x128xf32> -> vector<128x128xf32>
    %c1 = arith.constant 1 : index
    %c0_10 = arith.constant 0 : index
    %c0_11 = arith.constant 0 : index
    %11 = vector.load %arg3[%c1, %c0_10, %c0_11] : memref<4x128x128xf32, #tpu.memory_space<vmem>>, vector<1x128x128xf32>
    %12 = vector.shape_cast %11 : vector<1x128x128xf32> to vector<128x128xf32>
    %13 = vector.shape_cast %10 : vector<128x128xf32> to vector<1x128x128xf32>
    tpu.vector_store %arg3[%c1, %c0_10, %c0_11], %13 {strides = array<i32>} : memref<4x128x128xf32, #tpu.memory_space<vmem>>, vector<1x128x128xf32>,
    %14 = vector.extract_strided_slice %2 {offsets = [16, 0], sizes = [8, 128], strides = [1, 1]} : vector<32x128xf32> to vector<8x128xf32>
    %cst_12 = arith.constant dense<0.000000e+00> : vector<128x128xf32>
    %15 = tpu.matmul %3, %14, %cst_12 {dimension_numbers = #tpu.dot_dimension_numbers<[1], [0], [0], [1], [0, 0, 1, 1], [], []>} : vector<128x8xf32>, vector<8x128xf32>, vector<128x128xf32> -> vector<128x128xf32>
    %c2 = arith.constant 2 : index
    %c0_13 = arith.constant 0 : index
    %c0_14 = arith.constant 0 : index
    %16 = vector.load %arg3[%c2, %c0_13, %c0_14] : memref<4x128x128xf32, #tpu.memory_space<vmem>>, vector<1x128x128xf32>
    %17 = vector.shape_cast %16 : vector<1x128x128xf32> to vector<128x128xf32>
    %18 = vector.shape_cast %15 : vector<128x128xf32> to vector<1x128x128xf32>
    tpu.vector_store %arg3[%c2, %c0_13, %c0_14], %18 {strides = array<i32>} : memref<4x128x128xf32, #tpu.memory_space<vmem>>, vector<1x128x128xf32>,
    %19 = vector.extract_strided_slice %2 {offsets = [24, 0], sizes = [8, 128], strides = [1, 1]} : vector<32x128xf32> to vector<8x128xf32>
    %cst_15 = arith.constant dense<0.000000e+00> : vector<128x128xf32>
    %20 = tpu.matmul %3, %19, %cst_15 {dimension_numbers = #tpu.dot_dimension_numbers<[1], [0], [0], [1], [0, 0, 1, 1], [], []>} : vector<128x8xf32>, vector<8x128xf32>, vector<128x128xf32> -> vector<128x128xf32>
    %c3 = arith.constant 3 : index
    %c0_16 = arith.constant 0 : index
    %c0_17 = arith.constant 0 : index
    %21 = vector.load %arg3[%c3, %c0_16, %c0_17] : memref<4x128x128xf32, #tpu.memory_space<vmem>>, vector<1x128x128xf32>
    %22 = vector.shape_cast %21 : vector<1x128x128xf32> to vector<128x128xf32>
    %23 = vector.shape_cast %20 : vector<128x128xf32> to vector<1x128x128xf32>
    tpu.vector_store %arg3[%c3, %c0_16, %c0_17], %23 {strides = array<i32>} : memref<4x128x128xf32, #tpu.memory_space<vmem>>, vector<1x128x128xf32>,
    return
  }
}

</mosaic_0001>

<bundles_post_ra>
// kernel: few_shot_seg_forward.4
= control target key start
LH: loop header
LB: loop body
LE: loop exit
PB: predicated region body
PF: predicated region fallthrough
CT: control target
= control target key end

     0   :  { %s2038_s12 = smov 0   ;;  %s2624_s0 = inlined_call_operand.vmem [shape: bf16[256,768], index: 0, kind: input, shape index: {}]   ;;  %s2625_s1 = inlined_call_operand.vmem [shape: bf16[768,256], index: 1, kind: input, shape index: {}]   ;;  %s2626_s2 = inlined_call_operand.vmem [shape: f32[1,256], index: 2, kind: input, shape index: {}]   ;;  %s2627_s3 = inlined_call_operand.vmem [shape: bf16[256,256], index: 3, kind: output, shape index: {}]  }
   0x1 LB: > { %s1564_s13 = sadd.s32 4294967295, %s2016_s12   ;;  %p1568_p0 = scmp.ge.s32.totalorder %s2016_s12, 1  ;;  %s2016_s12 = sphi %s2038_s12, %s13_s12  }
   0x2   : > { %p139_p1 = scmp.lt.s32.totalorder %s2016_s12, 3 }
   0x4   : > { %p140_p2 = pnand %p1568_p0, %p139_p1 }
   0x6   : > { %143 = sbr.rel (%p140_p2) target bundleno = 369 (0x171), region = 32 }
   0xb   : > { %v1794_v0 = vld [vmem:[%s2625_s1 + $0x74] ss:$8 sps:$4 sm:$0xff]   ;;  %v1798_v2 = vld [vmem:[%s2625_s1 + $0x70] ss:$8 sps:$4 sm:$0xff]   ;;  %v1800_v4 = vld [vmem:[%s2625_s1 + $0x64] ss:$8 sps:$4 sm:$0xff]  }
   0xc   : > { %v1796_v1 = vld [vmem:[%s2625_s1 + $0x174] ss:$8 sps:$4 sm:$0xff]   ;;  %1055 = vmatprep.subr.bf16.mxu0 %v1794_v0  ;;  %v1799_v3 = vld [vmem:[%s2625_s1 + $0x170] ss:$8 sps:$4 sm:$0xff]   ;;  %v1802_v5 = vld [vmem:[%s2625_s1 + $0x164] ss:$8 sps:$4 sm:$0xff]  }
   0xd   : > { %1168 = vmatprep.subr.bf16.mxu1 %v1796_v1  ;;  %1056 = vmatpush1.bf16.msra.mxu0 %v1798_v2  ;;  %v1804_v6 = vld [vmem:[%s2625_s1 + $0x60] ss:$8 sps:$4 sm:$0xff]   ;;  %v1806_v8 = vld [vmem:[%s2625_s1 + $0x54] ss:$8 sps:$4 sm:$0xff]   ;;  %v1810_v10 = vld [vmem:[%s2625_s1 + $0x50] ss:$8 sps:$4 sm:$0xff]  }
   0xe   : > { %1169 = vmatpush1.bf16.msra.mxu1 %v1799_v3  ;;  %1057 = vmatprep.subr.bf16.mxu0 %v1800_v4  ;;  %v1805_v7 = vld [vmem:[%s2625_s1 + $0x160] ss:$8 sps:$4 sm:$0xff]   ;;  %v1808_v9 = vld [vmem:[%s2625_s1 + $0x154] ss:$8 sps:$4 sm:$0xff]   ;;  %v1811_v11 = vld [vmem:[%s2625_s1 + $0x150] ss:$8 sps:$4 sm:$0xff]  }
   0xf   : > { %1170 = vmatprep.subr.bf16.mxu1 %v1802_v5  ;;  %v1812_v12 = vld [vmem:[%s2625_s1 + $0x44] ss:$8 sps:$4 sm:$0xff]   ;;  %v1816_v14 = vld [vmem:[%s2625_s1 + $0x40] ss:$8 sps:$4 sm:$0xff]   ;;  %v1818_v16 = vld [vmem:[%s2625_s1 + $0x34] ss:$8 sps:$4 sm:$0xff]  }
  0x10   : > { %v1814_v13 = vld [vmem:[%s2625_s1 + $0x144] ss:$8 sps:$4 sm:$0xff]   ;;  %v1817_v15 = vld [vmem:[%s2625_s1 + $0x140] ss:$8 sps:$4 sm:$0xff]   ;;  %v1820_v17 = vld [vmem:[%s2625_s1 + $0x134] ss:$8 sps:$4 sm:$0xff]  }
  0x11   : > { %1058 = vmatpush1.bf16.msra.mxu0 %v1804_v6  ;;  %v1822_v18 = vld [vmem:[%s2625_s1 + $0x30] ss:$8 sps:$4 sm:$0xff]   ;;  %v1824_v20 = vld [vmem:[%s2625_s1 + $0x24] ss:$8 sps:$4 sm:$0xff]   ;;  %v1828_v22 = vld [vmem:[%s2625_s1 + $0x20] ss:$8 sps:$4 sm:$0xff]  }
  0x12   : > { %1171 = vmatpush1.bf16.msra.mxu1 %v1805_v7  ;;  %1059 = vmatprep.subr.bf16.mxu0 %v1806_v8  ;;  %v1823_v19 = vld [vmem:[%s2625_s1 + $0x130] ss:$8 sps:$4 sm:$0xff]   ;;  %v1826_v21 = vld [vmem:[%s2625_s1 + $0x124] ss:$8 sps:$4 sm:$0xff]   ;;  %v1829_v23 = vld [vmem:[%s2625_s1 + $0x120] ss:$8 sps:$4 sm:$0xff]  }
  0x13   : > { %1172 = vmatprep.subr.bf16.mxu1 %v1808_v9  ;;  %v1830_v24 = vld [vmem:[%s2625_s1 + $0x14] ss:$8 sps:$4 sm:$0xff]   ;;  %v1834_v26 = vld [vmem:[%s2625_s1 + $0x10] ss:$8 sps:$4 sm:$0xff]   ;;  %v1836_v28 = vld [vmem:[%s2625_s1 + $0x4] ss:$8 sps:$4 sm:$0xff]  }
  0x14   : > { %v1832_v25 = vld [vmem:[%s2625_s1 + $0x114] ss:$8 sps:$4 sm:$0xff]   ;;  %v1835_v27 = vld [vmem:[%s2625_s1 + $0x110] ss:$8 sps:$4 sm:$0xff]   ;;  %v1838_v29 = vld [vmem:[%s2625_s1 + $0x104] ss:$8 sps:$4 sm:$0xff]  }
  0x15   : > { %1060 = vmatpush1.bf16.msra.mxu0 %v1810_v10  ;;  %s1569_s24 = sshll.u32 %s1564_s13, 4  ;;  %v1840_v30 = vld [vmem:[%s2625_s1] ss:$8 sps:$4 sm:$0xff]   ;;  %v1842_v32 = vld [vmem:[%s2625_s1 + $0xf4] ss:$8 sps:$4 sm:$0xff]  }
  0x16   : > { %1173 = vmatpush1.bf16.msra.mxu1 %v1811_v11  ;;  %1061 = vmatprep.subr.bf16.mxu0 %v1812_v12  ;;  %v1841_v31 = vld [vmem:[%s2625_s1 + $0x100] ss:$8 sps:$4 sm:$0xff]   ;;  %p166_p3 = scmp.lt.s32.totalorder %s1569_s24, 31  ;;  %v1844_v33 = vld [vmem:[%s2625_s1 + $0x1f4] ss:$8 sps:$4 sm:$0xff]  }
  0x17   : > { %1174 = vmatprep.subr.bf16.mxu1 %v1814_v13  ;;  %v1846_v34 = vld [vmem:[%s2625_s1 + $0xf0] ss:$8 sps:$4 sm:$0xff]   ;;  %v1848_v36 = vld [vmem:[%s2625_s1 + $0xe4] ss:$8 sps:$4 sm:$0xff]   ;;  %v1852_v38 = vld [vmem:[%s2625_s1 + $0xe0] ss:$8 sps:$4 sm:$0xff]  }
  0x18   : > { %v1847_v35 = vld [vmem:[%s2625_s1 + $0x1f0] ss:$8 sps:$4 sm:$0xff]   ;;  %s2657_s24 = smov (!%p166_p3, %s1569_s24), 31  ;;  %v1850_v37 = vld [vmem:[%s2625_s1 + $0x1e4] ss:$8 sps:$4 sm:$0xff]  }
  0x19   : > { %1062 = vmatpush1.bf16.msra.mxu0 %v1816_v14  ;;  %v1853_v39 = vld [vmem:[%s2625_s1 + $0x1e0] ss:$8 sps:$4 sm:$0xff]   ;;  %v1854_v40 = vld [vmem:[%s2625_s1 + $0xd4] ss:$8 sps:$4 sm:$0xff]   ;;  %s1785_s21 = smul.u32 24, %s2657_s24  ;;  %s1736_s15 = sshll.u32 %s2657_s24, 3 }
  0x1a   : > { %1175 = vmatpush1.bf16.msra.mxu1 %v1817_v15  ;;  %1063 = vmatprep.subr.bf16.mxu0 %v1818_v16  ;;  %v1856_v41 = vld [vmem:[%s2625_s1 + $0x1d4] ss:$8 sps:$4 sm:$0xff]   ;;  %v1858_v42 = vld [vmem:[%s2625_s1 + $0xd0] ss:$8 sps:$4 sm:$0xff]   ;;  %v1860_v44 = vld [vmem:[%s2625_s1 + $0xc4] ss:$8 sps:$4 sm:$0xff]   ;;  %s2537_s17 = scalar_lea.vmem %s2627_s3, %s1736_s15 }
  0x1b   : > { %1176 = vmatprep.subr.bf16.mxu1 %v1820_v17  ;;  %v1859_v43 = vld [vmem:[%s2625_s1 + $0x1d0] ss:$8 sps:$4 sm:$0xff]   ;;  %s2189_s13 = scalar_lea.vmem %s2624_s0, %s1785_s21  ;;  %v1862_v45 = vld [vmem:[%s2625_s1 + $0x1c4] ss:$8 sps:$4 sm:$0xff]   ;;  %v1864_v46 = vld [vmem:[%s2625_s1 + $0xc0] ss:$8 sps:$4 sm:$0xff]  }
  0x1c   : > { %v1865_v47 = vld [vmem:[%s2625_s1 + $0x1c0] ss:$8 sps:$4 sm:$0xff]   ;;  %v1866_v48 = vld [vmem:[%s2625_s1 + $0xb4] ss:$8 sps:$4 sm:$0xff]   ;;  %v1895_v51 = vld [vmem:[%s2189_s13 + $0xc] ss:$24 sps:$4 sm:$0xff]  }
  0x1d   : > { %1064 = vmatpush1.bf16.msra.mxu0 %v1822_v18  ;;  %v1892_v49 = vld [vmem:[%s2189_s13 + $0x4] ss:$24 sps:$4 sm:$0xff]   ;;  %v1870_v52 = vld [vmem:[%s2625_s1 + $0xb0] ss:$8 sps:$4 sm:$0xff]   ;;  %1200 = vmatprep.mubr.bf16.mxu1 %v1895_v51  ;;  %v1876_v56 = vld [vmem:[%s2625_s1 + $0xa0] ss:$8 sps:$4 sm:$0xff]  }
  0x1e   : > { %1177 = vmatpush1.bf16.msra.mxu1 %v1823_v19  ;;  %1065 = vmatprep.subr.bf16.mxu0 %v1824_v20  ;;  %v1868_v50 = vld [vmem:[%s2625_s1 + $0x1b4] ss:$8 sps:$4 sm:$0xff]   ;;  %v1871_v53 = vld [vmem:[%s2625_s1 + $0x1b0] ss:$8 sps:$4 sm:$0xff]   ;;  %v1872_v54 = vld [vmem:[%s2625_s1 + $0xa4] ss:$8 sps:$4 sm:$0xff]  }
  0x1f   : > { %1178 = vmatprep.subr.bf16.mxu1 %v1826_v21  ;;  %1087 = vmatprep.mubr.bf16.mxu0 %v1892_v49  ;;  %v1874_v55 = vld [vmem:[%s2625_s1 + $0x1a4] ss:$8 sps:$4 sm:$0xff]   ;;  %v1877_v57 = vld [vmem:[%s2625_s1 + $0x1a0] ss:$8 sps:$4 sm:$0xff]   ;;  %v1878_v58 = vld [vmem:[%s2625_s1 + $0x94] ss:$8 sps:$4 sm:$0xff]  }
  0x20   : > { %v1880_v59 = vld [vmem:[%s2625_s1 + $0x194] ss:$8 sps:$4 sm:$0xff]   ;;  %v1882_v60 = vld [vmem:[%s2625_s1 + $0x90] ss:$8 sps:$4 sm:$0xff]   ;;  %v1884_v62 = vld [vmem:[%s2625_s1 + $0x84] ss:$8 sps:$4 sm:$0xff]  }
  0x21   : > { %1066 = vmatpush1.bf16.msra.mxu0 %v1828_v22  ;;  %v1883_v61 = vld [vmem:[%s2625_s1 + $0x190] ss:$8 sps:$4 sm:$0xff]   ;;  %v1886_v63 = vld [vmem:[%s2625_s1 + $0x184] ss:$8 sps:$4 sm:$0xff]   ;;  %v1888_v0 = vld [vmem:[%s2625_s1 + $0x80] ss:$8 sps:$4 sm:$0xff]  }
  0x22   : > { %1179 = vmatpush1.bf16.msra.mxu1 %v1829_v23  ;;  %1067 = vmatprep.subr.bf16.mxu0 %v1830_v24  ;;  %v1889_v1 = vld [vmem:[%s2625_s1 + $0x180] ss:$8 sps:$4 sm:$0xff]   ;;  %v1898_v2 = vld [vmem:[%s2625_s1 + $0x274] ss:$8 sps:$4 sm:$0xff]   ;;  %v1896_v5 = vld [vmem:[%s2625_s1 + $0x270] ss:$8 sps:$4 sm:$0xff]  }
  0x23   : > { %1180 = vmatprep.subr.bf16.mxu1 %v1832_v25  ;;  %v1890_v3 = vld [vmem:[%s2189_s13] ss:$24 sps:$4 sm:$0xff]   ;;  %v1901_v6 = vld [vmem:[%s2625_s1 + $0x264] ss:$8 sps:$4 sm:$0xff]   ;;  %v1904_v8 = vld [vmem:[%s2189_s13 + $0x3c] ss:$24 sps:$4 sm:$0xff]  }
  0x24   : > { %v1893_v4 = vld [vmem:[%s2189_s13 + $0x8] ss:$24 sps:$4 sm:$0xff]   ;;  %v1902_v7 = vld [vmem:[%s2189_s13 + $0x34] ss:$24 sps:$4 sm:$0xff]   ;;  %v1907_v12 = vld [vmem:[%s2189_s13 + $0x38] ss:$24 sps:$4 sm:$0xff]  }
  0x25   : > { %1068 = vmatpush1.bf16.msra.mxu0 %v1834_v26  ;;  %v1899_v9 = vld [vmem:[%s2625_s1 + $0x260] ss:$8 sps:$4 sm:$0xff]   ;;  %v1910_v10 = vld [vmem:[%s2625_s1 + $0x254] ss:$8 sps:$4 sm:$0xff]   ;;  %v1908_v13 = vld [vmem:[%s2625_s1 + $0x250] ss:$8 sps:$4 sm:$0xff]  }
  0x26   : > { %1181 = vmatpush1.bf16.msra.mxu1 %v1835_v27  ;;  %1069 = vmatprep.subr.bf16.mxu0 %v1836_v28  ;;  %v1906_v11 = vld [vmem:[%s2189_s13 + $0x30] ss:$24 sps:$4 sm:$0xff]   ;;  %v1913_v14 = vld [vmem:[%s2625_s1 + $0x244] ss:$8 sps:$4 sm:$0xff]   ;;  %v1922_v18 = vld [vmem:[%s2625_s1 + $0x234] ss:$8 sps:$4 sm:$0xff]  }
  0x27   : > { %1182 = vmatprep.subr.bf16.mxu1 %v1838_v29  ;;  %v1914_v15 = vld [vmem:[%s2189_s13 + $0x64] ss:$24 sps:$4 sm:$0xff]   ;;  %v1911_v17 = vld [vmem:[%s2625_s1 + $0x240] ss:$8 sps:$4 sm:$0xff]   ;;  %v1920_v21 = vld [vmem:[%s2625_s1 + $0x230] ss:$8 sps:$4 sm:$0xff]  }
  0x28   : > { %v1916_v16 = vld [vmem:[%s2189_s13 + $0x6c] ss:$24 sps:$4 sm:$0xff]   ;;  %v1918_v19 = vld [vmem:[%s2189_s13 + $0x60] ss:$24 sps:$4 sm:$0xff]   ;;  %v1928_v24 = vld [vmem:[%s2189_s13 + $0x9c] ss:$24 sps:$4 sm:$0xff]  }
  0x29   : > { %1070 = vmatpush1.bf16.msra.mxu0 %v1840_v30  ;;  %v1919_v20 = vld [vmem:[%s2189_s13 + $0x68] ss:$24 sps:$4 sm:$0xff]   ;;  %v1925_v22 = vld [vmem:[%s2625_s1 + $0x224] ss:$8 sps:$4 sm:$0xff]   ;;  %v1934_v26 = vld [vmem:[%s2625_s1 + $0x214] ss:$8 sps:$4 sm:$0xff]  }
  0x2a   : > { %1183 = vmatpush1.bf16.msra.mxu1 %v1841_v31  ;;  %1071 = vmatprep.subr.bf16.mxu0 %v1842_v32  ;;  %v1926_v23 = vld [vmem:[%s2189_s13 + $0x94] ss:$24 sps:$4 sm:$0xff]   ;;  %v1923_v25 = vld [vmem:[%s2625_s1 + $0x220] ss:$8 sps:$4 sm:$0xff]   ;;  %v1931_v28 = vld [vmem:[%s2189_s13 + $0x98] ss:$24 sps:$4 sm:$0xff]  }
  0x2b   : > { %1184 = vmatprep.subr.bf16.mxu1 %v1844_v33  ;;  %v1930_v27 = vld [vmem:[%s2189_s13 + $0x90] ss:$24 sps:$4 sm:$0xff]   ;;  %v1937_v30 = vld [vmem:[%s2625_s1 + $0x204] ss:$8 sps:$4 sm:$0xff]   ;;  %v1966_v51 = vld [vmem:[%s2189_s13 + $0x120] ss:$24 sps:$4 sm:$0xff]  }
  0x2c   : > { %v1932_v29 = vld [vmem:[%s2625_s1 + $0x210] ss:$8 sps:$4 sm:$0xff]   ;;  %v1938_v31 = vld [vmem:[%s2189_s13 + $0xc4] ss:$24 sps:$4 sm:$0xff]   ;;  %v1935_v33 = vld [vmem:[%s2625_s1 + $0x200] ss:$8 sps:$4 sm:$0xff]  }
  0x2d   : > { %1072 = vmatpush2.bf16.msra.mxu0 %v1846_v34  ;;  %v1940_v32 = vld [vmem:[%s2189_s13 + $0xcc] ss:$24 sps:$4 sm:$0xff]   ;;  %v1946_v34 = vld [vmem:[%s2625_s1 + $0x2f4] ss:$8 sps:$4 sm:$0xff]   ;;  %v1959_v49 = vld [vmem:[%s2625_s1 + $0x2c0] ss:$8 sps:$4 sm:$0xff]  }
  0x2e   : > { %1185 = vmatpush2.bf16.msra.mxu1 %v1847_v35  ;;  %1073 = vmatprep.subr.bf16.mxu0 %v1848_v36  ;;  %v1942_v35 = vld [vmem:[%s2189_s13 + $0xc0] ss:$24 sps:$4 sm:$0xff]  }
  0x2f   : > { %1186 = vmatprep.subr.bf16.mxu1 %v1850_v37  ;;  %v1943_v36 = vld [vmem:[%s2189_s13 + $0xc8] ss:$24 sps:$4 sm:$0xff]   ;;  %v1944_v37 = vld [vmem:[%s2625_s1 + $0x2f0] ss:$8 sps:$4 sm:$0xff]  }
  0x31   : > { %1074 = vmatpush2.bf16.msra.mxu0 %v1852_v38  ;;  %v1949_v38 = vld [vmem:[%s2625_s1 + $0x2e4] ss:$8 sps:$4 sm:$0xff]  }
  0x32   : > { %1187 = vmatpush2.bf16.msra.mxu1 %v1853_v39  ;;  %1075 = vmatprep.subr.bf16.mxu0 %v1854_v40  ;;  %v1950_v39 = vld [vmem:[%s2189_s13 + $0xf4] ss:$24 sps:$4 sm:$0xff]  }
  0x33   : > { %1188 = vmatprep.subr.bf16.mxu1 %v1856_v41  ;;  %v1952_v40 = vld [vmem:[%s2189_s13 + $0xfc] ss:$24 sps:$4 sm:$0xff]   ;;  %v1947_v41 = vld [vmem:[%s2625_s1 + $0x2e0] ss:$8 sps:$4 sm:$0xff]  }
  0x35   : > { %1076 = vmatpush2.bf16.msra.mxu0 %v1858_v42  ;;  %v1958_v42 = vld [vmem:[%s2625_s1 + $0x2d4] ss:$8 sps:$4 sm:$0xff]  }
  0x36   : > { %1189 = vmatpush2.bf16.msra.mxu1 %v1859_v43  ;;  %1077 = vmatprep.subr.bf16.mxu0 %v1860_v44  ;;  %v1954_v43 = vld [vmem:[%s2189_s13 + $0xf0] ss:$24 sps:$4 sm:$0xff]  }
  0x37   : > { %1190 = vmatprep.subr.bf16.mxu1 %v1862_v45  ;;  %v1955_v44 = vld [vmem:[%s2189_s13 + $0xf8] ss:$24 sps:$4 sm:$0xff]  }
  0x38   : > { %v1956_v45 = vld [vmem:[%s2625_s1 + $0x2d0] ss:$8 sps:$4 sm:$0xff]  }
  0x39   : > { %1078 = vmatpush2.bf16.msra.mxu0 %v1864_v46  ;;  %v1961_v46 = vld [vmem:[%s2625_s1 + $0x2c4] ss:$8 sps:$4 sm:$0xff]  }
  0x3a   : > { %1191 = vmatpush2.bf16.msra.mxu1 %v1865_v47  ;;  %1079 = vmatprep.subr.bf16.mxu0 %v1866_v48  ;;  %v1962_v47 = vld [vmem:[%s2189_s13 + $0x124] ss:$24 sps:$4 sm:$0xff]  }
  0x3b   : > { %1192 = vmatprep.subr.bf16.mxu1 %v1868_v50  ;;  %v1964_v48 = vld [vmem:[%s2189_s13 + $0x12c] ss:$24 sps:$4 sm:$0xff]   ;;  %v1970_v50 = vld [vmem:[%s2625_s1 + $0x2b4] ss:$8 sps:$4 sm:$0xff]  }
  0x3d   : > { %1080 = vmatpush2.bf16.msra.mxu0 %v1870_v52  ;;  %v1967_v52 = vld [vmem:[%s2189_s13 + $0x128] ss:$24 sps:$4 sm:$0xff]  }
  0x3e   : > { %1193 = vmatpush2.bf16.msra.mxu1 %v1871_v53  ;;  %1081 = vmatprep.subr.bf16.mxu0 %v1872_v54  ;;  %v1968_v53 = vld [vmem:[%s2625_s1 + $0x2b0] ss:$8 sps:$4 sm:$0xff]   ;;  %v1973_v54 = vld [vmem:[%s2625_s1 + $0x2a4] ss:$8 sps:$4 sm:$0xff]  }
  0x3f   : > { %1194 = vmatprep.subr.bf16.mxu1 %v1874_v55  ;;  %v1974_v55 = vld [vmem:[%s2189_s13 + $0x154] ss:$24 sps:$4 sm:$0xff]  }
  0x41   : > { %1082 = vmatpush2.bf16.msra.mxu0 %v1876_v56  ;;  %v1976_v56 = vld [vmem:[%s2189_s13 + $0x15c] ss:$24 sps:$4 sm:$0xff]  }
  0x42   : > { %1195 = vmatpush2.bf16.msra.mxu1 %v1877_v57  ;;  %1083 = vmatprep.subr.bf16.mxu0 %v1878_v58  ;;  %v1971_v57 = vld [vmem:[%s2625_s1 + $0x2a0] ss:$8 sps:$4 sm:$0xff]   ;;  %v1982_v58 = vld [vmem:[%s2625_s1 + $0x294] ss:$8 sps:$4 sm:$0xff]  }
  0x43   : > { %1196 = vmatprep.subr.bf16.mxu1 %v1880_v59  ;;  %v1978_v59 = vld [vmem:[%s2189_s13 + $0x150] ss:$24 sps:$4 sm:$0xff]  }
  0x45   : > { %1084 = vmatpush2.bf16.msra.mxu0 %v1882_v60  ;;  %v1979_v60 = vld [vmem:[%s2189_s13 + $0x158] ss:$24 sps:$4 sm:$0xff]  }
  0x46   : > { %1197 = vmatpush2.bf16.msra.mxu1 %v1883_v61  ;;  %1085 = vmatprep.subr.bf16.mxu0 %v1884_v62  ;;  %v1980_v61 = vld [vmem:[%s2625_s1 + $0x290] ss:$8 sps:$4 sm:$0xff]   ;;  %v1985_v62 = vld [vmem:[%s2625_s1 + $0x284] ss:$8 sps:$4 sm:$0xff]  }
  0x47   : > { %1198 = vmatprep.subr.bf16.mxu1 %v1886_v63  ;;  %v1988_v63 = vld [vmem:[%s2189_s13 + $0x14] ss:$24 sps:$4 sm:$0xff]  }
  0x49   : > { %1086 = vmatpush2.bf16.msra.mxu0 %v1888_v0  ;;  %v1991_v0 = vld [vmem:[%s2189_s13 + $0xd4] ss:$24 sps:$4 sm:$0xff]  }
  0x4a   : > { %1199 = vmatpush2.bf16.msra.mxu1 %v1889_v1  ;;  %1281 = vmatprep.subr.bf16.mxu0 %v1898_v2  ;;  %v1983_v1 = vld [vmem:[%s2625_s1 + $0x280] ss:$8 sps:$4 sm:$0xff]  }
  0x4b   : > { %1753 = vmatprep.subr.bf16.mxu1 %v1898_v2  ;;  %v1986_v2 = vld [vmem:[%s2189_s13 + $0x10] ss:$24 sps:$4 sm:$0xff]  }
  0x4c   : > { %1088 = vmatmul.mubr.bf16.vlgmr.msra.gmra.mxu0 %v1890_v3  ;;  %v1989_v3 = vld [vmem:[%s2189_s13 + $0xd0] ss:$24 sps:$4 sm:$0xff]  }
  0x4d   : > { %1201 = vmatmul.mubr.bf16.vlgmr.msra.gmra.mxu1 %v1893_v4  ;;  %1282 = vmatpush1.bf16.msra.mxu0 %v1896_v5  ;;  %v1992_v4 = vld [vmem:[%s2189_s13 + $0x44] ss:$24 sps:$4 sm:$0xff]  }
  0x4e   : > { %1769 = vmatpush1.bf16.msra.mxu1 %v1896_v5  ;;  %1283 = vmatprep.subr.bf16.mxu0 %v1901_v6  ;;  %v1994_v5 = vld [vmem:[%s2189_s13 + $0x104] ss:$24 sps:$4 sm:$0xff]  }
  0x4f   : > { %1754 = vmatprep.subr.bf16.mxu1 %v1901_v6  ;;  %1097 = vmatprep.mubr.bf16.mxu0 %v1902_v7  ;;  %v1996_v6 = vld [vmem:[%s2189_s13 + $0x40] ss:$24 sps:$4 sm:$0xff]  }
  0x50   : > { %1210 = vmatprep.mubr.bf16.mxu1 %v1904_v8  ;;  %v1997_v7 = vld [vmem:[%s2189_s13 + $0x100] ss:$24 sps:$4 sm:$0xff]   ;;  %v1998_v8 = vld [vmem:[%s2189_s13 + $0x74] ss:$24 sps:$4 sm:$0xff]  }
  0x51   : > { %1284 = vmatpush1.bf16.msra.mxu0 %v1899_v9 }
  0x52   : > { %1770 = vmatpush1.bf16.msra.mxu1 %v1899_v9  ;;  %1285 = vmatprep.subr.bf16.mxu0 %v1910_v10  ;;  %v2000_v9 = vld [vmem:[%s2189_s13 + $0x134] ss:$24 sps:$4 sm:$0xff]  }
  0x53   : > { %1755 = vmatprep.subr.bf16.mxu1 %v1910_v10  ;;  %v2002_v10 = vld [vmem:[%s2189_s13 + $0x70] ss:$24 sps:$4 sm:$0xff]  }
  0x54   : > { %1098 = vmatmul.mubr.bf16.gmra.mxu0 %v1906_v11  ;;  %v2003_v11 = vld [vmem:[%s2189_s13 + $0x130] ss:$24 sps:$4 sm:$0xff]  }
  0x55   : > { %1211 = vmatmul.mubr.bf16.gmra.mxu1 %v1907_v12  ;;  %1286 = vmatpush1.bf16.msra.mxu0 %v1908_v13  ;;  %v2004_v12 = vld [vmem:[%s2189_s13 + $0xa4] ss:$24 sps:$4 sm:$0xff]  }
  0x56   : > { %1771 = vmatpush1.bf16.msra.mxu1 %v1908_v13  ;;  %1287 = vmatprep.subr.bf16.mxu0 %v1913_v14  ;;  %v2006_v13 = vld [vmem:[%s2189_s13 + $0x164] ss:$24 sps:$4 sm:$0xff]  }
  0x57   : > { %1756 = vmatprep.subr.bf16.mxu1 %v1913_v14  ;;  %1107 = vmatprep.mubr.bf16.mxu0 %v1914_v15  ;;  %v2008_v14 = vld [vmem:[%s2189_s13 + $0xa0] ss:$24 sps:$4 sm:$0xff]  }
  0x58   : > { %1220 = vmatprep.mubr.bf16.mxu1 %v1916_v16  ;;  %v2009_v15 = vld [vmem:[%s2189_s13 + $0x160] ss:$24 sps:$4 sm:$0xff]  }
  0x59   : > { %1288 = vmatpush1.bf16.msra.mxu0 %v1911_v17 }
  0x5a   : > { %1772 = vmatpush1.bf16.msra.mxu1 %v1911_v17  ;;  %1289 = vmatprep.subr.bf16.mxu0 %v1922_v18 }
  0x5b   : > { %1757 = vmatprep.subr.bf16.mxu1 %v1922_v18 }
  0x5c   : > { %1108 = vmatmul.mubr.bf16.gmra.mxu0 %v1918_v19 }
  0x5d   : > { %1221 = vmatmul.mubr.bf16.gmra.mxu1 %v1919_v20  ;;  %1290 = vmatpush1.bf16.msra.mxu0 %v1920_v21 }
  0x5e   : > { %1773 = vmatpush1.bf16.msra.mxu1 %v1920_v21  ;;  %1291 = vmatprep.subr.bf16.mxu0 %v1925_v22 }
  0x5f   : > { %1758 = vmatprep.subr.bf16.mxu1 %v1925_v22  ;;  %1117 = vmatprep.mubr.bf16.mxu0 %v1926_v23 }
  0x60   : > { %1230 = vmatprep.mubr.bf16.mxu1 %v1928_v24 }
  0x61   : > { %1292 = vmatpush1.bf16.msra.mxu0 %v1923_v25 }
  0x62   : > { %1774 = vmatpush1.bf16.msra.mxu1 %v1923_v25  ;;  %1293 = vmatprep.subr.bf16.mxu0 %v1934_v26 }
  0x63   : > { %1759 = vmatprep.subr.bf16.mxu1 %v1934_v26 }
  0x64   : > { %1118 = vmatmul.mubr.bf16.gmra.mxu0 %v1930_v27 }
  0x65   : > { %1231 = vmatmul.mubr.bf16.gmra.mxu1 %v1931_v28  ;;  %1294 = vmatpush1.bf16.msra.mxu0 %v1932_v29 }
  0x66   : > { %1775 = vmatpush1.bf16.msra.mxu1 %v1932_v29  ;;  %1295 = vmatprep.subr.bf16.mxu0 %v1937_v30 }
  0x67   : > { %1760 = vmatprep.subr.bf16.mxu1 %v1937_v30  ;;  %1127 = vmatprep.mubr.bf16.mxu0 %v1938_v31 }
  0x68   : > { %1240 = vmatprep.mubr.bf16.mxu1 %v1940_v32 }
  0x69   : > { %1296 = vmatpush1.bf16.msra.mxu0 %v1935_v33 }
  0x6a   : > { %1776 = vmatpush1.bf16.msra.mxu1 %v1935_v33  ;;  %1297 = vmatprep.subr.bf16.mxu0 %v1946_v34 }
  0x6b   : > { %1761 = vmatprep.subr.bf16.mxu1 %v1946_v34 }
  0x6c   : > { %1128 = vmatmul.mubr.bf16.gmra.mxu0 %v1942_v35 }
  0x6d   : > { %1241 = vmatmul.mubr.bf16.gmra.mxu1 %v1943_v36  ;;  %1298 = vmatpush2.bf16.msra.mxu0 %v1944_v37 }
  0x6e   : > { %1777 = vmatpush2.bf16.msra.mxu1 %v1944_v37  ;;  %1299 = vmatprep.subr.bf16.mxu0 %v1949_v38 }
  0x6f   : > { %1762 = vmatprep.subr.bf16.mxu1 %v1949_v38  ;;  %1137 = vmatprep.mubr.bf16.mxu0 %v1950_v39 }
  0x70   : > { %1250 = vmatprep.mubr.bf16.mxu1 %v1952_v40 }
  0x71   : > { %1300 = vmatpush2.bf16.msra.mxu0 %v1947_v41 }
  0x72   : > { %1778 = vmatpush2.bf16.msra.mxu1 %v1947_v41  ;;  %1301 = vmatprep.subr.bf16.mxu0 %v1958_v42 }
  0x73   : > { %1763 = vmatprep.subr.bf16.mxu1 %v1958_v42 }
  0x74   : > { %1138 = vmatmul.mubr.bf16.gmra.mxu0 %v1954_v43 }
  0x75   : > { %1251 = vmatmul.mubr.bf16.gmra.mxu1 %v1955_v44  ;;  %1302 = vmatpush2.bf16.msra.mxu0 %v1956_v45 }
  0x76   : > { %1779 = vmatpush2.bf16.msra.mxu1 %v1956_v45  ;;  %1303 = vmatprep.subr.bf16.mxu0 %v1961_v46 }
  0x77   : > { %1764 = vmatprep.subr.bf16.mxu1 %v1961_v46  ;;  %1147 = vmatprep.mubr.bf16.mxu0 %v1962_v47 }
  0x78   : > { %1260 = vmatprep.mubr.bf16.mxu1 %v1964_v48 }
  0x79   : > { %1304 = vmatpush2.bf16.msra.mxu0 %v1959_v49 }
  0x7a   : > { %1780 = vmatpush2.bf16.msra.mxu1 %v1959_v49  ;;  %1305 = vmatprep.subr.bf16.mxu0 %v1970_v50 }
  0x7b   : > { %1765 = vmatprep.subr.bf16.mxu1 %v1970_v50 }
  0x7c   : > { %1148 = vmatmul.mubr.bf16.gmra.mxu0 %v1966_v51 }
  0x7d   : > { %1261 = vmatmul.mubr.bf16.gmra.mxu1 %v1967_v52  ;;  %1306 = vmatpush2.bf16.msra.mxu0 %v1968_v53 }
  0x7e   : > { %1781 = vmatpush2.bf16.msra.mxu1 %v1968_v53  ;;  %1307 = vmatprep.subr.bf16.mxu0 %v1973_v54 }
  0x7f   : > { %1766 = vmatprep.subr.bf16.mxu1 %v1973_v54  ;;  %1157 = vmatprep.mubr.bf16.mxu0 %v1974_v55 }
  0x80   : > { %1270 = vmatprep.mubr.bf16.mxu1 %v1976_v56 }
  0x81   : > { %1308 = vmatpush2.bf16.msra.mxu0 %v1971_v57 }
  0x82   : > { %1782 = vmatpush2.bf16.msra.mxu1 %v1971_v57  ;;  %1309 = vmatprep.subr.bf16.mxu0 %v1982_v58 }
  0x83   : > { %1767 = vmatprep.subr.bf16.mxu1 %v1982_v58 }
  0x84   : > { %1158 = vmatmul.mubr.bf16.gmra.mxu0 %v1978_v59 }
  0x85   : > { %1271 = vmatmul.mubr.bf16.gmra.mxu1 %v1979_v60  ;;  %1310 = vmatpush2.bf16.msra.mxu0 %v1980_v61  ;;  %v325_v60 = vlaneseq }
  0x86   : > { %1783 = vmatpush2.bf16.msra.mxu1 %v1980_v61  ;;  %1311 = vmatprep.subr.bf16.mxu0 %v1985_v62 }
  0x87   : > { %1768 = vmatprep.subr.bf16.mxu1 %v1985_v62  ;;  %1313 = vmatprep.mubr.bf16.mxu0 %v1988_v63 }
  0x88   : > { %1353 = vmatprep.mubr.bf16.mxu1 %v1991_v0 }
  0x89   : > { %1312 = vmatpush2.bf16.msra.mxu0 %v1983_v1 }
  0x8a   : > { %1784 = vmatpush2.bf16.msra.mxu1 %v1983_v1  ;;  %v326_v1 = vshrl.u32 %v325_v60, 7 }
  0x8c   : > { %1314 = vmatmul.mubr.bf16.vlgmr.msra.gmra.mxu0 %v1986_v2 }
  0x8d   : > { %1354 = vmatmul.mubr.bf16.vlgmr.msra.gmra.mxu1 %v1989_v3  ;;  %1323 = vmatprep.mubr.bf16.mxu0 %v1992_v4 }
  0x8e   : > { %1363 = vmatprep.mubr.bf16.mxu1 %v1994_v5 }
  0x94   : > { %1324 = vmatmul.mubr.bf16.gmra.mxu0 %v1996_v6  ;;  %v327_v6 = vsub.s32 0, %v326_v1 }
  0x95   : > { %1364 = vmatmul.mubr.bf16.gmra.mxu1 %v1997_v7  ;;  %1333 = vmatprep.mubr.bf16.mxu0 %v1998_v8  ;;  %v331_v7 = vsub.s32 1, %v326_v1 }
  0x96   : > { %1373 = vmatprep.mubr.bf16.mxu1 %v2000_v9 }
  0x9c   : > { %1334 = vmatmul.mubr.bf16.gmra.mxu0 %v2002_v10  ;;  %v323_v10 = vld [vmem:[%s2626_s2] sm:$0x3] }
  0x9d   : > { %1374 = vmatmul.mubr.bf16.gmra.mxu1 %v2003_v11  ;;  %1343 = vmatprep.mubr.bf16.mxu0 %v2004_v12 }
  0x9e   : > { %1383 = vmatprep.mubr.bf16.mxu1 %v2006_v13  ;;  %v2491_v13 = vrot.slane %v323_v10, %v327_v6 }
  0xa4   : > { %1344 = vmatmul.mubr.bf16.gmra.mxu0 %v2008_v14  ;;  %v2493_v14 = vrot.slane %v323_v10, %v331_v7 }
  0xa5   : > { %1384 = vmatmul.mubr.bf16.gmra.mxu1 %v2009_v15 }
 0x10c   : > { %v2392_v16 = vpop.f32.mrf.mxu0 }
 0x10d   : > { %v2394_v17 = vpop.f32.mrf.mxu1 }
 0x10e   : > { %v2396_v18 = vpop.f32.mrf.mxu0 }
 0x10f   : > { %v2398_v19 = vpop.f32.mrf.mxu1 }
 0x110   : > { %v2400_v20 = vpop.f32.mrf.mxu0 }
 0x111   : > { %v2402_v21 = vpop.f32.mrf.mxu1 }
 0x112   : > { %v2404_v22 = vpop.f32.mrf.mxu0 }
 0x113   : > { %v2406_v23 = vpop.f32.mrf.mxu1 }
 0x114   : > { %v2408_v24 = vpop.f32.mrf.mxu0 }
 0x115   : > { %v2410_v25 = vpop.f32.mrf.mxu1 }
 0x116   : > { %v2412_v26 = vpop.f32.mrf.mxu0 }
 0x117   : > { %v2414_v27 = vpop.f32.mrf.mxu1 }
 0x118   : > { %v2416_v28 = vpop.f32.mrf.mxu0 }
 0x119   : > { %v2418_v29 = vpop.f32.mrf.mxu1 }
 0x11a   : > { %v2420_v30 = vpop.f32.mrf.mxu0 }
 0x11b   : > { %v2422_v31 = vpop.f32.mrf.mxu1 }
 0x11c   : > { %v2424_v32 = vpop.f32.mrf.mxu0 }
 0x11d   : > { %v2426_v33 = vpop.f32.mrf.mxu1 }
 0x11e   : > { %v2428_v34 = vpop.f32.mrf.mxu0 }
 0x11f   : > { %v2430_v35 = vpop.f32.mrf.mxu1 }
 0x120   : > { %v2432_v36 = vpop.f32.mrf.mxu0 }
 0x121   : > { %v2434_v37 = vpop.f32.mrf.mxu1 }
 0x122   : > { %v2436_v38 = vpop.f32.mrf.mxu0 }
 0x123   : > { %v2438_v39 = vpop.f32.mrf.mxu1 }
 0x124   : > { %v2440_v40 = vpop.f32.mrf.mxu0 }
 0x125   : > { %v2442_v41 = vpop.f32.mrf.mxu1 }
 0x126   : > { %2628 = vst [vmem:[#allocation2_spill] sm:$0xff] %v2442_v41  ;;  %v2444_v42 = vpop.f32.mrf.mxu0 }
 0x127   : > { %v2446_v43 = vpop.f32.mrf.mxu1 }
 0x128   : > { %2629 = vst [vmem:[#allocation3_spill] sm:$0xff] %v2446_v43  ;;  %v2448_v44 = vpop.f32.mrf.mxu0 }
 0x129   : > { %2630 = vst [vmem:[#allocation4_spill] sm:$0xff] %v2448_v44  ;;  %v2450_v45 = vpop.f32.mrf.mxu1 }
 0x12a   : > { %2631 = vst [vmem:[#allocation5_spill] sm:$0xff] %v2450_v45  ;;  %v2452_v46 = vpop.f32.mrf.mxu0  ;;  %v1090_v45 = vadd.f32 %v2392_v16, %v2491_v13 }
 0x12b   : > { %2632 = vst [vmem:[#allocation6_spill] sm:$0xff] %v2452_v46  ;;  %v2454_v47 = vpop.f32.mrf.mxu1  ;;  %v1092_v46 = vadd.f32 %v2396_v18, %v2493_v14  ;;  %v1094_v18 = vadd.f32 %v2400_v20, %v2491_v13 }
 0x12c   : > { %2633 = vst [vmem:[#allocation7_spill] sm:$0xff] %v2454_v47  ;;  %v1129_v48 = vpop.f32.mrf.mxu0 }
 0x12d   : > { %v1242_v49 = vpop.f32.mrf.mxu1  ;;  %v1130_v7 = vadd.f32 %v1129_v48, %v2491_v13  ;;  %v1205_v16 = vadd.f32 %v2398_v19, %v1092_v46  ;;  %v1102_v19 = vadd.f32 %v2412_v26, %v2493_v14 }
 0x12e   : > { %v1131_v50 = vpop.f32.mrf.mxu0 }
 0x12f   : > { %v1244_v51 = vpop.f32.mrf.mxu1  ;;  %v1132_v10 = vadd.f32 %v1131_v50, %v2493_v14 }
 0x130   : > { %v1133_v52 = vpop.f32.mrf.mxu0 }
 0x131   : > { %v2456_v53 = vpop.f32.mrf.mxu1  ;;  %v1245_v48 = vadd.f32 %v1244_v51, %v1132_v10  ;;  %v1134_v50 = vadd.f32 %v1133_v52, %v2491_v13 }
 0x132   : > { %v1135_v54 = vpop.f32.mrf.mxu0 }
 0x133   : > { %v2458_v55 = vpop.f32.mrf.mxu1 }
 0x134   : > { %v1139_v56 = vpop.f32.mrf.mxu0 }
 0x135   : > { %v2460_v57 = vpop.f32.mrf.mxu1  ;;  %v1140_v52 = vadd.f32 %v1139_v56, %v2491_v13 }
 0x136   : > { %v1141_v58 = vpop.f32.mrf.mxu0 }
 0x137   : > { %v2462_v59 = vpop.f32.mrf.mxu1 }
 0x138   : > { %v2464_v61 = vpop.f32.mrf.mxu0 }
 0x139   : > { %v2466_v62 = vpop.f32.mrf.mxu1 }
 0x13a   : > { %v2468_v63 = vpop.f32.mrf.mxu0 }
 0x13b   : > { %v2470_v0 = vpop.f32.mrf.mxu1 }
 0x13c   : > { %v2472_v2 = vpop.f32.mrf.mxu0 }
 0x13d   : > { %v2474_v3 = vpop.f32.mrf.mxu1 }
 0x13e   : > { %v2476_v4 = vpop.f32.mrf.mxu0 }
 0x13f   : > { %v2478_v5 = vpop.f32.mrf.mxu1 }
 0x140   : > { %v2480_v8 = vpop.f32.mrf.mxu0 }
 0x141   : > { %v2482_v9 = vpop.f32.mrf.mxu1 }
 0x142   : > { %2634 = vst [vmem:[#allocation8_spill] sm:$0xff] %v2482_v9  ;;  %v2487_v11 = vpop.f32.mrf.mxu0 }
 0x143   : > { %v2489_v12 = vpop.f32.mrf.mxu1 }
 0x144   : > { %2635 = vst [vmem:[#allocation9_spill] sm:$0xff] %v2489_v12  ;;  %v2495_v15 = vpop.f32.mrf.mxu0  ;;  %v1243_v12 = vadd.f32 %v1242_v49, %v1130_v7  ;;  %v1207_v49 = vadd.f32 %v2402_v21, %v1094_v18  ;;  %v1146_v18 = vadd.f32 %v2468_v63, %v2493_v14 }
 0x145   : > { %v2497_v60 = vpop.f32.mrf.mxu1 }
 0x146   : > { %2636 = vst [vmem:[#allocation10_spill] sm:$0xff] %v2497_v60  ;;  %v2499_v1 = vpop.f32.mrf.mxu0 }
 0x147   : > { %v2501_v47 = vpop.f32.mrf.mxu1 }
 0x148   : > { %2637 = vst [vmem:[#allocation11_spill] sm:$0xff] %v2501_v47  ;;  %v2507_v44 = vpop.f32.mrf.mxu0  ;;  %v1203_v47 = vadd.f32 %v2394_v17, %v1090_v45  ;;  %v1100_v17 = vadd.f32 %v2408_v24, %v2491_v13 }
 0x149   : > { %2638 = vst [vmem:[#allocation12_spill] sm:$0xff] %v2507_v44  ;;  %v2509_v6 = vpop.f32.mrf.mxu1  ;;  %v1096_v44 = vadd.f32 %v2404_v22, %v2493_v14 }
 0x14a   : > { %2639 = vst [vmem:[#allocation13_spill] sm:$0xff] %v2509_v6  ;;  %v2513_v60 = vpop.f32.mrf.mxu0 }
 0x14b   : > { %2640 = vst [vmem:[#allocation14_spill] sm:$0xff] %v2513_v60  ;;  %v2515_v43 = vpop.f32.mrf.mxu1  ;;  %v1136_v60 = vadd.f32 %v1135_v54, %v2493_v14  ;;  %v1209_v51 = vadd.f32 %v2406_v23, %v1096_v44  ;;  %v1142_v54 = vadd.f32 %v1141_v58, %v2493_v14  ;;  %v1213_v23 = vadd.f32 %v2410_v25, %v1100_v17 }
 0x14c   : > { %2641 = vst [vmem:[#allocation15_spill] sm:$0xff] %v2515_v43  ;;  %v1315_v41 = vpop.f32.mrf.mxu0  ;;  %v1215_v44 = vadd.f32 %v2414_v27, %v1102_v19  ;;  %v1253_v25 = vadd.f32 %v2460_v57, %v1140_v52 }
 0x14d   : > { %v1355_v6 = vpop.f32.mrf.mxu1  ;;  %v1316_v46 = vadd.f32 %v1315_v41, %v1203_v47  ;;  %v1247_v41 = vadd.f32 %v2456_v53, %v1134_v50  ;;  %v1249_v47 = vadd.f32 %v2458_v55, %v1136_v60  ;;  %v1104_v53 = vadd.f32 %v2416_v28, %v2491_v13 }
 0x14e   : > { %v1317_v45 = vpop.f32.mrf.mxu0  ;;  %v1356_v43 = vadd.f32 %v1355_v6, %v1243_v12  ;;  %v1255_v27 = vadd.f32 %v2462_v59, %v1142_v54  ;;  %v1144_v60 = vadd.f32 %v2464_v61, %v2491_v13  ;;  %v1110_v28 = vadd.f32 %v2424_v32, %v2491_v13 }
 0x14f   : > { %v1357_v20 = vpop.f32.mrf.mxu1  ;;  %v1318_v22 = vadd.f32 %v1317_v45, %v1205_v16  ;;  %v1217_v63 = vadd.f32 %v2418_v29, %v1104_v53  ;;  %v1150_v32 = vadd.f32 %v2472_v2, %v2491_v13 }
 0x150   : > { %v1358_v9 = vadd.f32 %v1357_v20, %v1245_v48  ;;  %v1319_v24 = vpop.f32.mrf.mxu0 }
 0x151   : > { %v1359_v26 = vpop.f32.mrf.mxu1  ;;  %v1737_v21 = vpack.c.bf16 %v1318_v22, %v1316_v46  ;;  %v1320_v6 = vadd.f32 %v1319_v24, %v1207_v49  ;;  %v1257_v49 = vadd.f32 %v2466_v62, %v1144_v60  ;;  %v1223_v24 = vadd.f32 %v2426_v33, %v1110_v28  ;;  %v2645_v28 = vld [vmem:[#allocation3_spill] sm:$0xff] }
 0x152   : > { %v1745_v12 = vpack.c.bf16 %v1358_v9, %v1356_v43  ;;  %v1321_v56 = vpop.f32.mrf.mxu0  ;;  %v1360_v7 = vadd.f32 %v1359_v26, %v1247_v41  ;;  %v1106_v43 = vadd.f32 %v2420_v30, %v2493_v14  ;;  %v1112_v30 = vadd.f32 %v2428_v34, %v2493_v14 }
 0x153   : > { %v1361_v58 = vpop.f32.mrf.mxu1  ;;  %1490 = vst [vmem:[%s2537_s17] sm:$0xff] %v1737_v21  ;;  %v1322_v10 = vadd.f32 %v1321_v56, %v1209_v51  ;;  %v1152_v34 = vadd.f32 %v2476_v4, %v2493_v14  ;;  %v1259_v51 = vadd.f32 %v2470_v0, %v1146_v18  ;;  %v1114_v62 = vadd.f32 %v2432_v36, %v2491_v13 }
 0x154   : > { %1498 = vst [vmem:[%s2537_s17 + $0x40] sm:$0xff] %v1745_v12  ;;  %v1362_v16 = vadd.f32 %v1361_v58, %v1249_v47  ;;  %v1325_v55 = vpop.f32.mrf.mxu0  ;;  %v1219_v20 = vadd.f32 %v2422_v31, %v1106_v43  ;;  %v1225_v29 = vadd.f32 %v2430_v35, %v1112_v30  ;;  %v1116_v0 = vadd.f32 %v2436_v38, %v2493_v14 }
 0x155   : > { %v1365_v9 = vpop.f32.mrf.mxu1  ;;  %v1738_v48 = vpack.c.bf16 %v1322_v10, %v1320_v6  ;;  %v1326_v59 = vadd.f32 %v1325_v55, %v1213_v23  ;;  %v1263_v33 = vadd.f32 %v2474_v3, %v1150_v32  ;;  %v1265_v35 = vadd.f32 %v2478_v5, %v1152_v34  ;;  %v2643_v55 = vld [vmem:[#allocation9_spill] sm:$0xff]  ;;  %v2649_v32 = vld [vmem:[#allocation11_spill] sm:$0xff] }
 0x156   : > { %v1746_v50 = vpack.c.bf16 %v1362_v16, %v1360_v7  ;;  %v1327_v17 = vpop.f32.mrf.mxu0  ;;  %v1366_v19 = vadd.f32 %v1365_v9, %v1253_v25  ;;  %v1154_v23 = vadd.f32 %v2480_v8, %v2491_v13  ;;  %v1120_v36 = vadd.f32 %v2440_v40, %v2491_v13  ;;  %v2642_v25 = vld [vmem:[#allocation8_spill] sm:$0xff] }
 0x157   : > { %v1367_v57 = vpop.f32.mrf.mxu1  ;;  %1491 = vst [vmem:[%s2537_s17 + $0x8] sm:$0xff] %v1738_v48  ;;  %v1328_v45 = vadd.f32 %v1327_v17, %v1215_v44  ;;  %v1156_v44 = vadd.f32 %v2487_v11, %v2493_v14  ;;  %v1122_v38 = vadd.f32 %v2444_v42, %v2493_v14  ;;  %v1227_v11 = vadd.f32 %v2434_v37, %v1114_v62  ;;  %v2644_v48 = vld [vmem:[#allocation2_spill] sm:$0xff]  ;;  %v2652_v62 = vld [vmem:[#allocation5_spill] sm:$0xff] }
 0x158   : > { %1499 = vst [vmem:[%s2537_s17 + $0x48] sm:$0xff] %v1746_v50  ;;  %v1368_v61 = vadd.f32 %v1367_v57, %v1255_v27  ;;  %v1329_v46 = vpop.f32.mrf.mxu0  ;;  %v1229_v16 = vadd.f32 %v2438_v39, %v1116_v0  ;;  %v1160_v40 = vadd.f32 %v2495_v15, %v2491_v13  ;;  %v1162_v42 = vadd.f32 %v2499_v1, %v2493_v14 }
 0x159   : > { %v1369_v22 = vpop.f32.mrf.mxu1  ;;  %v1739_v52 = vpack.c.bf16 %v1328_v45, %v1326_v59  ;;  %v1330_v2 = vadd.f32 %v1329_v46, %v1217_v63  ;;  %v1267_v27 = vadd.f32 %v2642_v25, %v1154_v23  ;;  %v1269_v9 = vadd.f32 %v2643_v55, %v1156_v44  ;;  %v2646_v59 = vld [vmem:[#allocation4_spill] sm:$0xff]  ;;  %v2647_v45 = vld [vmem:[#allocation6_spill] sm:$0xff]  ;;  %v2655_v23 = vld [vmem:[#allocation15_spill] sm:$0xff] }
 0x15a   : > { %v1747_v54 = vpack.c.bf16 %v1368_v61, %v1366_v19  ;;  %v1331_v26 = vpop.f32.mrf.mxu0  ;;  %v1370_v41 = vadd.f32 %v1369_v22, %v1257_v49  ;;  %v1233_v50 = vadd.f32 %v2644_v48, %v1120_v36  ;;  %v1235_v37 = vadd.f32 %v2645_v28, %v1122_v38  ;;  %v2648_v63 = vld [vmem:[#allocation10_spill] sm:$0xff]  ;;  %v2650_v49 = vld [vmem:[#allocation12_spill] sm:$0xff] }
 0x15b   : > { %v1371_v31 = vpop.f32.mrf.mxu1  ;;  %1492 = vst [vmem:[%s2537_s17 + $0x10] sm:$0xff] %v1739_v52  ;;  %v1332_v47 = vadd.f32 %v1331_v26, %v1219_v20  ;;  %v1124_v19 = vadd.f32 %v2646_v59, %v2491_v13  ;;  %v1126_v61 = vadd.f32 %v2647_v45, %v2493_v14  ;;  %v1273_v20 = vadd.f32 %v2648_v63, %v1160_v40  ;;  %v2651_v52 = vld [vmem:[#allocation14_spill] sm:$0xff] }
 0x15c   : > { %1500 = vst [vmem:[%s2537_s17 + $0x50] sm:$0xff] %v1747_v54  ;;  %v1372_v4 = vadd.f32 %v1371_v31, %v1259_v51  ;;  %v1335_v21 = vpop.f32.mrf.mxu0  ;;  %v1275_v34 = vadd.f32 %v2649_v32, %v1162_v42  ;;  %v1164_v51 = vadd.f32 %v2650_v49, %v2491_v13  ;;  %v1166_v54 = vadd.f32 %v2651_v52, %v2493_v14  ;;  %v2654_v14 = vld [vmem:[#allocation13_spill] sm:$0xff] }
 0x15d   : > { %v1375_v12 = vpop.f32.mrf.mxu1  ;;  %v1740_v56 = vpack.c.bf16 %v1332_v47, %v1330_v2  ;;  %v1336_v5 = vadd.f32 %v1335_v21, %v1223_v24  ;;  %v1237_v0 = vadd.f32 %v2652_v62, %v1124_v19 }
 0x15e   : > { %v1748_v58 = vpack.c.bf16 %v1372_v4, %v1370_v41  ;;  %v1337_v6 = vpop.f32.mrf.mxu0  ;;  %v1376_v7 = vadd.f32 %v1375_v12, %v1263_v33  ;;  %v2653_v33 = vld [vmem:[#allocation7_spill] sm:$0xff]  ;;  %v1277_v12 = vadd.f32 %v2654_v14, %v1164_v51  ;;  %v1279_v44 = vadd.f32 %v2655_v23, %v1166_v54 }
 0x15f   : > { %v1377_v3 = vpop.f32.mrf.mxu1  ;;  %1493 = vst [vmem:[%s2537_s17 + $0x18] sm:$0xff] %v1740_v56  ;;  %v1338_v10 = vadd.f32 %v1337_v6, %v1225_v29 }
 0x160   : > { %1501 = vst [vmem:[%s2537_s17 + $0x58] sm:$0xff] %v1748_v58  ;;  %v1378_v8 = vadd.f32 %v1377_v3, %v1265_v35  ;;  %v1339_v53 = vpop.f32.mrf.mxu0  ;;  %v1239_v35 = vadd.f32 %v2653_v33, %v1126_v61 }
 0x161   : > { %v1379_v43 = vpop.f32.mrf.mxu1  ;;  %v1741_v60 = vpack.c.bf16 %v1338_v10, %v1336_v5  ;;  %v1340_v15 = vadd.f32 %v1339_v53, %v1227_v11 }
 0x162   : > { %v1749_v18 = vpack.c.bf16 %v1378_v8, %v1376_v7  ;;  %v1341_v30 = vpop.f32.mrf.mxu0  ;;  %v1380_v17 = vadd.f32 %v1379_v43, %v1267_v27 }
 0x163   : > { %v1381_v39 = vpop.f32.mrf.mxu1  ;;  %1494 = vst [vmem:[%s2537_s17 + $0x20] sm:$0xff] %v1741_v60  ;;  %v1342_v1 = vadd.f32 %v1341_v30, %v1229_v16 }
 0x164   : > { %1502 = vst [vmem:[%s2537_s17 + $0x60] sm:$0xff] %v1749_v18  ;;  %v1382_v57 = vadd.f32 %v1381_v39, %v1269_v9  ;;  %v1345_v46 = vpop.f32.mrf.mxu0 }
 0x165   : > { %v1385_v22 = vpop.f32.mrf.mxu1  ;;  %v1742_v24 = vpack.c.bf16 %v1342_v1, %v1340_v15  ;;  %v1346_v2 = vadd.f32 %v1345_v46, %v1233_v50 }
 0x166   : > { %v1750_v29 = vpack.c.bf16 %v1382_v57, %v1380_v17  ;;  %v1347_v26 = vpop.f32.mrf.mxu0  ;;  %v1386_v41 = vadd.f32 %v1385_v22, %v1273_v20 }
 0x167   : > { %v1387_v31 = vpop.f32.mrf.mxu1  ;;  %1495 = vst [vmem:[%s2537_s17 + $0x28] sm:$0xff] %v1742_v24  ;;  %v1348_v47 = vadd.f32 %v1347_v26, %v1235_v37 }
 0x168   : > { %1503 = vst [vmem:[%s2537_s17 + $0x68] sm:$0xff] %v1750_v29  ;;  %v1388_v4 = vadd.f32 %v1387_v31, %v1275_v34  ;;  %v1349_v13 = vpop.f32.mrf.mxu0 }
 0x169   : > { %v1389_v21 = vpop.f32.mrf.mxu1  ;;  %v1743_v56 = vpack.c.bf16 %v1348_v47, %v1346_v2  ;;  %v1350_v6 = vadd.f32 %v1349_v13, %v1237_v0 }
 0x16a   : > { %v1751_v58 = vpack.c.bf16 %v1388_v4, %v1386_v41  ;;  %v1351_v36 = vpop.f32.mrf.mxu0  ;;  %v1390_v3 = vadd.f32 %v1389_v21, %v1277_v12 }
 0x16b   : > { %v1391_v38 = vpop.f32.mrf.mxu1  ;;  %1496 = vst [vmem:[%s2537_s17 + $0x30] sm:$0xff] %v1743_v56  ;;  %v1352_v5 = vadd.f32 %v1351_v36, %v1239_v35 }
 0x16c   : > { %1504 = vst [vmem:[%s2537_s17 + $0x70] sm:$0xff] %v1751_v58  ;;  %v1392_v7 = vadd.f32 %v1391_v38, %v1279_v44 }
 0x16d   : > { %v1744_v10 = vpack.c.bf16 %v1352_v5, %v1350_v6 }
 0x16e   : > { %v1752_v8 = vpack.c.bf16 %v1392_v7, %v1390_v3 }
 0x16f   : > { %1497 = vst [vmem:[%s2537_s17 + $0x38] sm:$0xff] %v1744_v10 }
 0x170   : > { %1505 = vst [vmem:[%s2537_s17 + $0x78] sm:$0xff] %v1752_v8 }
 0x171 PF: > { %s13_s12 = sadd.s32 1, %s2016_s12  }
 0x172   : > { %p10_p4 = scmp.ge.s32.totalorder %s13_s12, 4  }
 0x174   :  { %12 = sbr.rel (!%p10_p4) target bundleno = 1 (0x1), region = 62 }

// kernel: few_shot_seg_forward.5
= control target key start
LH: loop header
LB: loop body
LE: loop exit
PB: predicated region body
PF: predicated region fallthrough
CT: control target
= control target key end

     0   :  { %v644_v0 = vmov 0.0   ;;  %vm645_vm0 = vmmov 0   ;;  %vm298_vm1 = vcmask 516096   ;;  %vm30_vm2 = vcmask 523264   ;;  %s949_s1 = inlined_call_operand.vmem [shape: f32[64,16], index: 1, kind: input, shape index: {}]   ;;  %s950_s2 = inlined_call_operand.vmem [shape: bf16[2,64,256], index: 2, kind: input, shape index: {}]   ;;  %s951_s3 = inlined_call_operand.vmem [shape: f32[4,64], index: 3, kind: input, shape index: {}]   ;;  %s952_s0 = inlined_call_operand.vmem [shape: f32[16,64], index: 0, kind: input, shape index: {}]   ;;  %s953_s4 = inlined_call_operand.vmem [shape: f32[40,256], index: 4, kind: output, shape index: {0}]   ;;  %s954_s5 = inlined_call_operand.vmem [shape: f32[4,16], index: 5, kind: output, shape index: {1}]  }
   0x1   :  { %605 = vmatprep.subr.mxu0 %v644_v0  ;;  %v29_v1 = vld [vmem:[%s949_s1 + $0x38] sm:$0xff]  ;;  %v28_v2 = vld [vmem:[%s949_s1 + $0x30] sm:$0xff]  ;;  %621 = vmatprep.mubr.msk.f32.mxu0 %vm645_vm0, %v644_v0  ;;  %v27_v7 = vld [vmem:[%s949_s1 + $0x28] sm:$0xff]  ;;  %114 = vst [vmem:[%s953_s4 + $0x40] sm:$0xff] %v644_v0  ;;  %vm104_vm3 = vcmask 125952   ;;  %vm556_vm4 = vcmask 1040384  }
   0x2   :  { %v686_v3 = vld [vmem:[%s950_s2 + $0x38] sm:$0xff]  ;;  %606 = vmatpush3.msra.mxu0 %v29_v1  ;;  %v694_v6 = vld [vmem:[%s950_s2 + $0x30] sm:$0xff]  ;;  %210 = vmatprep.mubr.f32.mxu1 %v644_v0  ;;  %v706_v10 = vld [vmem:[%s950_s2 + $0x28] sm:$0xff]  ;;  %115 = vst [vmem:[%s953_s4 + $0x48] sm:$0xff] %v644_v0  ;;  %vm561_vm5 = vcmask 1041408  }
   0x3   :  { %v139_v4 = vunpack.c.h.bf16 %v686_v3  ;;  %v138_v5 = vunpack.c.l.bf16 %v686_v3  ;;  %607 = vmatprep.subr.mxu0 %v644_v0  ;;  %v137_v8 = vunpack.c.h.bf16 %v694_v6  ;;  %v136_v9 = vunpack.c.l.bf16 %v694_v6  ;;  %v714_v12 = vld [vmem:[%s951_s3 + $0x2] sm:$0x1]  ;;  %v733_v16 = vld [vmem:[%s950_s2 + $0x18] sm:$0xff]  ;;  %v750_v21 = vld [vmem:[%s950_s2 + $0x10] sm:$0xff] }
   0x4   :  { %608 = vmatpush3.msra.mxu0 %v28_v2  ;;  %v135_v11 = vunpack.c.h.bf16 %v706_v10  ;;  %v719_v13 = vld [vmem:[%s950_s2 + $0x20] sm:$0xff]  ;;  %v134_v15 = vunpack.c.l.bf16 %v706_v10  ;;  %v299_v17 = vsel %vm298_vm1, %v714_v12, 0.0  ;;  %v25_v18 = vld [vmem:[%s949_s1 + $0x18] sm:$0xff]  ;;  %v24_v22 = vld [vmem:[%s949_s1 + $0x10] sm:$0xff]  ;;  %v131_v23 = vunpack.c.h.bf16 %v733_v16 }
   0x5   :  { %162 = vmatprep.subr.mxu1 %v139_v4  ;;  %609 = vmatprep.subr.mxu0 %v644_v0  ;;  %v26_v14 = vld [vmem:[%s949_s1 + $0x20] sm:$0xff]  ;;  %v133_v19 = vunpack.c.h.bf16 %v719_v13  ;;  %v132_v20 = vunpack.c.l.bf16 %v719_v13  ;;  %v130_v24 = vunpack.c.l.bf16 %v733_v16  ;;  %v763_v25 = vld [vmem:[%s950_s2 + $0x8] sm:$0xff]  ;;  %v129_v27 = vunpack.c.h.bf16 %v750_v21  ;;  %v800_v35 = vld [vmem:[%s950_s2 + $0x78] sm:$0xff] }
   0x6   :  { %163 = vmatpush1.msra.mxu1 %v138_v5  ;;  %610 = vmatpush3.msra.mxu0 %v27_v7  ;;  %v23_v26 = vld [vmem:[%s949_s1 + $0x8] sm:$0xff]  ;;  %v128_v28 = vunpack.c.l.bf16 %v750_v21  ;;  %v778_v29 = vld [vmem:[%s950_s2] sm:$0xff]  ;;  %v127_v31 = vunpack.c.h.bf16 %v763_v25  ;;  %v126_v33 = vunpack.c.l.bf16 %v763_v25  ;;  %v816_v38 = vld [vmem:[%s950_s2 + $0x70] sm:$0xff]  ;;  %v360_v40 = vunpack.c.h.bf16 %v800_v35 }
   0x7   :  { %164 = vmatprep.subr.mxu1 %v137_v8  ;;  %611 = vmatprep.subr.mxu0 %v644_v0  ;;  %v22_v30 = vld [vmem:[%s949_s1] sm:$0xff]  ;;  %v125_v34 = vunpack.c.h.bf16 %v778_v29  ;;  %v124_v36 = vunpack.c.l.bf16 %v778_v29  ;;  %v359_v41 = vunpack.c.l.bf16 %v800_v35  ;;  %v358_v43 = vunpack.c.h.bf16 %v816_v38  ;;  %v841_v44 = vld [vmem:[%s950_s2 + $0x68] sm:$0xff]  ;;  %v588_v50 = vld [vmem:[%s950_s2 + $0x58] sm:$0xff] }
   0x8   :  { %165 = vmatpush1.msra.mxu1 %v136_v9  ;;  %612 = vmatpush3.msra.mxu0 %v26_v14  ;;  %v21_v32 = vld [vmem:[%s951_s3] sm:$0xf]  ;;  %v357_v45 = vunpack.c.l.bf16 %v816_v38  ;;  %v356_v47 = vunpack.c.h.bf16 %v841_v44  ;;  %v20_v48 = vld [vmem:[%s952_s0 + $0x8] sm:$0xff]  ;;  %v355_v49 = vunpack.c.l.bf16 %v841_v44  ;;  %v587_v53 = vld [vmem:[%s950_s2 + $0x50] sm:$0xff]  ;;  %v352_v54 = vunpack.c.h.bf16 %v588_v50 }
   0x9   :  { %166 = vmatprep.subr.mxu1 %v135_v11  ;;  %613 = vmatprep.subr.mxu0 %v644_v0  ;;  %v808_v37 = vld [vmem:[%s951_s3 + $0x3] sm:$0x1]  ;;  %v351_v55 = vunpack.c.l.bf16 %v588_v50  ;;  %v350_v56 = vunpack.c.h.bf16 %v587_v53  ;;  %v586_v57 = vld [vmem:[%s950_s2 + $0x48] sm:$0xff]  ;;  %v349_v58 = vunpack.c.l.bf16 %v587_v53 }
   0xa   :  { %167 = vmatpush1.msra.mxu1 %v134_v15  ;;  %300 = vadd.xlane.f32.xlu0 %v299_v17  ;;  %v825_v39 = vld [vmem:[%s952_s0] sm:$0xff]  ;;  %v513_v42 = vsel %vm298_vm1, %v808_v37, 0.0  ;;  %v348_v60 = vunpack.c.h.bf16 %v586_v57  ;;  %v347_v61 = vunpack.c.l.bf16 %v586_v57 }
   0xb   :  { %614 = vmatpush3.msra.mxu0 %v25_v18  ;;  %168 = vmatprep.subr.mxu1 %v133_v19  ;;  %v589_v46 = vld [vmem:[%s950_s2 + $0x60] sm:$0xff] }
   0xc   :  { %615 = vmatprep.subr.mxu0 %v644_v0  ;;  %169 = vmatpush1.msra.mxu1 %v132_v20  ;;  %v354_v51 = vunpack.c.h.bf16 %v589_v46  ;;  %v353_v52 = vunpack.c.l.bf16 %v589_v46  ;;  %v585_v59 = vld [vmem:[%s950_s2 + $0x40] sm:$0xff] }
   0xd   :  { %616 = vmatpush3.msra.mxu0 %v24_v22  ;;  %170 = vmatprep.subr.mxu1 %v131_v23  ;;  %v346_v62 = vunpack.c.h.bf16 %v585_v59  ;;  %v345_v63 = vunpack.c.l.bf16 %v585_v59 }
   0xe   :  { %617 = vmatprep.subr.mxu0 %v644_v0  ;;  %171 = vmatpush1.msra.mxu1 %v130_v24 }
   0xf   :  { %618 = vmatpush3.msra.mxu0 %v23_v26  ;;  %172 = vmatprep.subr.mxu1 %v129_v27 }
  0x10   :  { %619 = vmatprep.subr.mxu0 %v644_v0  ;;  %173 = vmatpush1.msra.mxu1 %v128_v28 }
  0x11   :  { %620 = vmatpush3.msra.mxu0 %v22_v30  ;;  %174 = vmatprep.subr.mxu1 %v127_v31 }
  0x12   :  { %622 = vmatmul.mubr.msk.f32.vlgmr.msra.gmra.mxu0 %vm30_vm2, %v21_v32  ;;  %175 = vmatpush1.msra.mxu1 %v126_v33 }
  0x13   :  { %243 = vmatprep.subr.mxu0 %v139_v4  ;;  %176 = vmatprep.subr.mxu1 %v125_v34 }
  0x14   :  { %244 = vmatpush1.msra.mxu0 %v138_v5  ;;  %177 = vmatpush1.msra.mxu1 %v124_v36 }
  0x15   :  { %245 = vmatprep.subr.mxu0 %v137_v8  ;;  %582 = vmatmul.mubr.msk.f32.vlgmr.msra.gmra.mxu1 %vm30_vm2, %v825_v39 }
  0x16   :  { %246 = vmatpush1.msra.mxu0 %v136_v9  ;;  %377 = vmatprep.subr.mxu1 %v360_v40 }
  0x17   :  { %514 = vadd.xlane.f32.xlu0 %v513_v42  ;;  %247 = vmatprep.subr.mxu0 %v135_v11 }
  0x18   :  { %378 = vmatpush1.msra.mxu1 %v359_v41  ;;  %248 = vmatpush1.msra.mxu0 %v134_v15 }
  0x19   :  { %379 = vmatprep.subr.mxu1 %v358_v43  ;;  %216 = vmatprep.mubr.f32.mxu1 %v644_v0 }
  0x1a   :  { %249 = vmatprep.subr.mxu0 %v133_v19  ;;  %380 = vmatpush1.msra.mxu1 %v357_v45 }
  0x1b   :  { %250 = vmatpush1.msra.mxu0 %v132_v20  ;;  %583 = vmatmul.mubr.msk.f32.gmra.mxu1 %vm30_vm2, %v20_v48 }
  0x1c   :  { %381 = vmatprep.subr.mxu1 %v356_v47  ;;  %251 = vmatprep.subr.mxu0 %v131_v23 }
  0x1d   :  { %382 = vmatpush1.msra.mxu1 %v355_v49  ;;  %252 = vmatpush1.msra.mxu0 %v130_v24 }
  0x1e   :  { %383 = vmatprep.subr.mxu1 %v354_v51  ;;  %253 = vmatprep.subr.mxu0 %v129_v27 }
  0x1f   :  { %384 = vmatpush1.msra.mxu1 %v353_v52  ;;  %254 = vmatpush1.msra.mxu0 %v128_v28 }
  0x20   :  { %385 = vmatprep.subr.mxu1 %v352_v54  ;;  %255 = vmatprep.subr.mxu0 %v127_v31 }
  0x21   :  { %386 = vmatpush1.msra.mxu1 %v351_v55  ;;  %256 = vmatpush1.msra.mxu0 %v126_v33 }
  0x22   :  { %387 = vmatprep.subr.mxu1 %v350_v56  ;;  %257 = vmatprep.subr.mxu0 %v125_v34 }
  0x23   :  { %388 = vmatpush1.msra.mxu1 %v349_v58  ;;  %258 = vmatpush1.msra.mxu0 %v124_v36 }
  0x24   :  { %291 = vmatprep.mubr.f32.mxu0 %v644_v0  ;;  %389 = vmatprep.subr.mxu1 %v348_v60 }
  0x25   :  { %584 = vmatmul.mubr.msk.f32.vlgmr.msra.gmra.mxu0 %vm30_vm2, %v714_v12  ;;  %390 = vmatpush1.msra.mxu1 %v347_v61 }
  0x26   :  { %458 = vmatprep.subr.mxu0 %v360_v40  ;;  %391 = vmatprep.subr.mxu1 %v346_v62 }
  0x27   :  { %459 = vmatpush1.msra.mxu0 %v359_v41  ;;  %392 = vmatpush1.msra.mxu1 %v345_v63 }
  0x28   :  { %425 = vmatprep.mubr.f32.mxu1 %v644_v0  ;;  %460 = vmatprep.subr.mxu0 %v358_v43 }
  0x29   :  { %593 = vmatmul.mubr.msk.f32.vlgmr.msra.gmra.mxu1 %vm30_vm2, %v825_v39  ;;  %461 = vmatpush1.msra.mxu0 %v357_v45 }
  0x2a   :  { %431 = vmatprep.mubr.f32.mxu1 %v644_v0  ;;  %462 = vmatprep.subr.mxu0 %v356_v47 }
  0x2b   :  { %506 = vmatprep.mubr.f32.mxu0 %v644_v0  ;;  %463 = vmatpush1.msra.mxu0 %v355_v49 }
  0x2c   :  { %464 = vmatprep.subr.mxu0 %v354_v51 }
  0x2d   :  { %594 = vmatmul.mubr.msk.f32.gmra.mxu1 %vm30_vm2, %v20_v48  ;;  %465 = vmatpush1.msra.mxu0 %v353_v52 }
  0x2e   :  { %466 = vmatprep.subr.mxu0 %v352_v54 }
  0x2f   :  { %467 = vmatpush1.msra.mxu0 %v351_v55 }
  0x30   :  { %468 = vmatprep.subr.mxu0 %v350_v56 }
  0x31   :  { %469 = vmatpush1.msra.mxu0 %v349_v58 }
  0x32   :  { %470 = vmatprep.subr.mxu0 %v348_v60 }
  0x33   :  { %471 = vmatpush1.msra.mxu0 %v347_v61 }
  0x34   :  { %472 = vmatprep.subr.mxu0 %v346_v62 }
  0x35   :  { %473 = vmatpush1.msra.mxu0 %v345_v63 }
  0x36   :  { %595 = vmatmul.mubr.msk.f32.vlgmr.msra.gmra.mxu0 %vm30_vm2, %v808_v37 }
  0x93   :  { %v301_v1 = vpop.xlane.xlu0 %300 }
  0x94   :  { %v302_v2 = vrot.slane %v301_v1, 4 }
  0x96   :  { %v303_v3 = vadd.f32 %v302_v2, %v301_v1 }
  0x98   :  { %v304_v4 = vrot.slane %v303_v3, 2 }
  0x9a   :  { %v305_v5 = vadd.f32 %v304_v4, %v303_v3 }
  0x9c   :  { %v306_v6 = vrot.slane %v305_v5, 1 }
  0x9e   :  { %v307_v7 = vadd.f32 %v306_v6, %v305_v5 }
  0xa0   :  { %v515_v8 = vpop.xlane.xlu0 %514  ;;  %624 = vpush %v307_v7 }
  0xa1   :  { %v516_v9 = vrot.slane %v515_v8, 4 }
  0xa3   :  { %v517_v10 = vadd.f32 %v516_v9, %v515_v8 }
  0xa5   :  { %v518_v11 = vrot.slane %v517_v10, 2 }
  0xa7   :  { %v519_v12 = vadd.f32 %v518_v11, %v517_v10 }
  0xa9   :  { %v520_v13 = vrot.slane %v519_v12, 1 }
  0xab   :  { %v521_v14 = vadd.f32 %v520_v13, %v519_v12 }
  0xad   :  { %626 = vpush %v521_v14 }
  0xd1   :  { %s625_s28 = spop %624 }
  0xd2   :  { %v100_v15 = vpop.f32.mrf.mxu0  ;;  %s309_s29 = sadd.f32 1e-05, %s625_s28 }
  0xd3   :  { %105 = vst.msk [vmem:[%s954_s5] sm:$0xf] %vm104_vm3, %v100_v15 }
  0xd4   :  { %v623_v0 = vpop.f32.mrf.mxu0  ;;  %v310_v26 = vstv %s309_s29 }
  0xd5   :  { %v212_v16 = vpop.f32.mrf.mxu1  ;;  %630 = vrcp.f32 %v310_v26 }
  0xd6   :  { %v314_v17 = vmul.f32 %v212_v16, %v212_v16 }
  0xd7   :  { %v214_v18 = vpop.f32.mrf.mxu1 }
  0xd8   :  { %v315_v19 = vmul.f32 %v214_v18, %v214_v18 }
  0xda   :  { %v318_v20 = vadd.f32 %v315_v19, %v314_v17 }
  0xdb   :  { %v914_v21 = vpop.f32.mrf.mxu1 }
  0xdc   :  { %v316_v22 = vmul.f32 %v914_v21, %v914_v21  ;;  %319 = vadd.xlane.f32.xlu1 %v318_v20 }
  0xdd   :  { %v220_v23 = vpop.f32.mrf.mxu1 }
  0xde   :  { %v317_v24 = vmul.f32 %v220_v23, %v220_v23  ;;  %s627_s1 = spop %626 }
  0xdf   :  { %s523_s30 = sadd.f32 1e-05, %s627_s1 }
  0xe0   :  { %v321_v25 = vadd.f32 %v317_v24, %v316_v22 }
  0xe1   :  { %v524_v27 = vstv %s523_s30 }
  0xe2   :  { %322 = vadd.xlane.f32.xlu1 %v321_v25  ;;  %632 = vrcp.f32 %v524_v27  ;;  %v631_v40 = vpop.eup %630 }
  0xe5   :  { %v293_v37 = vpop.f32.mrf.mxu0 }
  0xe6   :  { %v312_v45 = vmul.f32 %v631_v40, %v293_v37 }
  0xe7   :  { %v295_v39 = vpop.f32.mrf.mxu0 }
  0xe8   :  { %v313_v48 = vmul.f32 %v631_v40, %v295_v39 }
  0xe9   :  { %v427_v28 = vpop.f32.mrf.mxu1 }
  0xea   :  { %v528_v29 = vmul.f32 %v427_v28, %v427_v28 }
  0xeb   :  { %v429_v30 = vpop.f32.mrf.mxu1 }
  0xec   :  { %v529_v31 = vmul.f32 %v429_v30, %v429_v30 }
  0xed   :  { %v433_v32 = vpop.f32.mrf.mxu1 }
  0xee   :  { %v530_v33 = vmul.f32 %v433_v32, %v433_v32  ;;  %v532_v34 = vadd.f32 %v529_v31, %v528_v29 }
  0xef   :  { %v435_v35 = vpop.f32.mrf.mxu1  ;;  %v633_v41 = vpop.eup %632 }
  0xf0   :  { %v531_v36 = vmul.f32 %v435_v35, %v435_v35  ;;  %533 = vadd.xlane.f32.xlu0 %v532_v34 }
  0xf2   :  { %v535_v38 = vadd.f32 %v531_v36, %v530_v33 }
  0xf4   :  { %536 = vadd.xlane.f32.xlu1 %v535_v38 }
  0xf6   :  { %v508_v42 = vpop.f32.mrf.mxu0 }
  0xf7   :  { %v526_v43 = vmul.f32 %v633_v41, %v508_v42 }
  0xf8   :  { %v510_v44 = vpop.f32.mrf.mxu0 }
  0xf9   :  { %v552_v46 = vrot.slane %v526_v43, 7  ;;  %v527_v47 = vmul.f32 %v633_v41, %v510_v44 }
  0xfb   :  { %v553_v49 = vrot.slane %v527_v47, 7  ;;  %v557_v50 = vsel %vm556_vm4, %v312_v45, %v552_v46 }
  0xfc   :  { %v559_v51 = vmul.f32 %v557_v50, %v557_v50 }
  0xfd   :  { %v558_v52 = vsel %vm556_vm4, %v313_v48, %v553_v49 }
  0xfe   :  { %v560_v53 = vmul.f32 %v558_v52, %v558_v52  ;;  %v562_v54 = vsel %vm561_vm5, %v559_v51, 0.0 }
 0x100   :  { %v563_v55 = vsel %vm561_vm5, %v560_v53, 0.0 }
 0x101   :  { %v564_v56 = vadd.f32 %v563_v55, %v562_v54 }
 0x103   :  { %565 = vadd.xlane.f32.xlu0 %v564_v56 }
 0x165   :  { %v320_v57 = vpop.xlane.xlu1 %319 }
 0x166   :  { %v324_v58 = vmax.f32 %v320_v57, 1e-08 }
 0x168   :  { %634 = vrsqrt.f32 %v324_v58 }
 0x16b   :  { %v323_v59 = vpop.xlane.xlu1 %322 }
 0x16c   :  { %v325_v60 = vmax.f32 %v323_v59, 1e-08 }
 0x16e   :  { %636 = vrsqrt.f32 %v325_v60 }
 0x175   :  { %v635_v61 = vpop.eup %634 }
 0x176   :  { %v328_v62 = vmul.f32 %v635_v61, %v212_v16  ;;  %v329_v63 = vmul.f32 %v635_v61, %v214_v18 }
 0x178   :  { %332 = vst [vmem:[%s953_s4] sm:$0xff] %v328_v62  ;;  %333 = vst [vmem:[%s953_s4 + $0x8] sm:$0xff] %v329_v63 }
 0x179   :  { %v534_v1 = vpop.xlane.xlu0 %533 }
 0x17a   :  { %v538_v2 = vmax.f32 %v534_v1, 1e-08 }
 0x17b   :  { %v637_v3 = vpop.eup %636 }
 0x17c   :  { %638 = vrsqrt.f32 %v538_v2  ;;  %v330_v4 = vmul.f32 %v637_v3, %v914_v21  ;;  %v331_v5 = vmul.f32 %v637_v3, %v220_v23 }
 0x17d   :  { %v537_v6 = vpop.xlane.xlu1 %536 }
 0x17e   :  { %v539_v7 = vmax.f32 %v537_v6, 1e-08  ;;  %334 = vst [vmem:[%s953_s4 + $0x10] sm:$0xff] %v330_v4  ;;  %335 = vst [vmem:[%s953_s4 + $0x18] sm:$0xff] %v331_v5 }
 0x180   :  { %640 = vrsqrt.f32 %v539_v7 }
 0x189   :  { %v639_v8 = vpop.eup %638 }
 0x18a   :  { %v542_v9 = vmul.f32 %v639_v8, %v427_v28  ;;  %v543_v10 = vmul.f32 %v639_v8, %v429_v30 }
 0x18c   :  { %546 = vst [vmem:[%s953_s4 + $0x20] sm:$0xff] %v542_v9  ;;  %547 = vst [vmem:[%s953_s4 + $0x28] sm:$0xff] %v543_v10  ;;  %v566_v12 = vpop.xlane.xlu0 %565 }
 0x18d   :  { %v641_v11 = vpop.eup %640  ;;  %v567_v15 = vmax.f32 %v566_v12, 1e-08 }
 0x18e   :  { %v544_v13 = vmul.f32 %v641_v11, %v433_v32  ;;  %v545_v14 = vmul.f32 %v641_v11, %v435_v35 }
 0x18f   :  { %642 = vrsqrt.f32 %v567_v15 }
 0x190   :  { %548 = vst [vmem:[%s953_s4 + $0x30] sm:$0xff] %v544_v13  ;;  %549 = vst [vmem:[%s953_s4 + $0x38] sm:$0xff] %v545_v14 }
 0x19c   :  { %v643_v0 = vpop.eup %642 }
 0x19d   :  { %v569_v16 = vmul.f32 %v643_v0, %v557_v50  ;;  %v570_v17 = vmul.f32 %v643_v0, %v558_v52 }
 0x19f   :  { %571 = vst [vmem:[%s953_s4 + $0x40] sm:$0x3] %v569_v16  ;;  %572 = vst [vmem:[%s953_s4 + $0x48] sm:$0x3] %v570_v17 }

// kernel: few_shot_seg_forward.6
= control target key start
LH: loop header
LB: loop body
LE: loop exit
PB: predicated region body
PF: predicated region fallthrough
CT: control target
= control target key end

     0   :  { %s932_s12 = smov 0   ;;  %s1297_s0 = inlined_call_operand.vmem [shape: bf16[2,256,64], index: 0, kind: input, shape index: {}]   ;;  %s1298_s1 = inlined_call_operand.vmem [shape: f32[40,256], index: 1, kind: input, shape index: {}]   ;;  %s1299_s2 = inlined_call_operand.vmem [shape: f32[2,40,64], index: 2, kind: input, shape index: {}]   ;;  %s1300_s3 = inlined_call_operand.vmem [shape: f32[2,3,64], index: 3, kind: output, shape index: {}]  }
   0x1 LB: > { %s696_s13 = sadd.s32 4294967295, %s910_s12   ;;  %p700_p0 = scmp.ge.s32.totalorder %s910_s12, 1  ;;  %s910_s12 = sphi %s932_s12, %s13_s12  }
   0x2   : > { %p137_p1 = scmp.lt.s32.totalorder %s910_s12, 3 }
   0x4   : > { %p138_p2 = pnand %p700_p0, %p137_p1 }
   0x5   : > { %p160_p3 = scmp.lt.s32.totalorder (!%p138_p2), %s696_s13, 1 }
   0x6   : > { %141 = sbr.rel (%p138_p2) target bundleno = 339 (0x153), region = 32 }
   0xb   : > { %v338_v0 = vld [vmem:[%s1298_s1 + $0x8] sm:$0xff]  ;;  %v344_v1 = vld [vmem:[%s1298_s1 + $0x38] sm:$0xff]  ;;  %s1302_s13 = smov (!%p160_p3, %s696_s13), 1  ;;  %vm265_vm0 = vcmask 523264   ;;  %vm637_vm13 = vcmask 1040384   ;;  %vm639_vm14 = vcmask 1041408  }
   0xc   : > { %411 = vmatprep.mubr.f32.mxu0 %v338_v0  ;;  %426 = vmatprep.mubr.f32.mxu1 %v344_v1  ;;  %s711_s18 = sshll.u32 %s1302_s13, 7  ;;  %s703_s6 = sshll.u32 %s1302_s13, 2  ;;  %vm641_vm15 = vcmask 518144  }
   0xd   : > { %s952_s21 = scalar_lea.vmem %s1297_s0, %s711_s18  ;;  %s168_s9 = scalar_lea.vmem %s1300_s3, %s703_s6 }
   0xe   : > { %v790_v2 = vld [vmem:[%s952_s21 + $0x78] sm:$0xff]   ;;  %v789_v4 = vld [vmem:[%s952_s21 + $0x70] sm:$0xff]   ;;  %v788_v12 = vld [vmem:[%s952_s21 + $0x68] sm:$0xff]  }
   0xf   : > { %v782_v3 = vld [vmem:[%s952_s21 + $0x38] sm:$0xff]   ;;  %v957_v5 = vunpack.c.h.bf16 %v790_v2  ;;  %v961_v7 = vunpack.c.l.bf16 %v790_v2  ;;  %v781_v8 = vld [vmem:[%s952_s21 + $0x30] sm:$0xff]   ;;  %v968_v10 = vunpack.c.h.bf16 %v789_v4  ;;  %v977_v13 = vunpack.c.l.bf16 %v789_v4  ;;  %v780_v14 = vld [vmem:[%s952_s21 + $0x28] sm:$0xff]  }
  0x10   : > { %v959_v6 = vunpack.c.h.bf16 %v782_v3  ;;  %v964_v9 = vunpack.c.l.bf16 %v782_v3  ;;  %v972_v11 = vunpack.c.h.bf16 %v781_v8  ;;  %v982_v15 = vunpack.c.l.bf16 %v781_v8  ;;  %v787_v18 = vld [vmem:[%s952_s21 + $0x60] sm:$0xff]   ;;  %v786_v24 = vld [vmem:[%s952_s21 + $0x58] sm:$0xff]   ;;  %v785_v30 = vld [vmem:[%s952_s21 + $0x50] sm:$0xff]  }
  0x11   : > { %791 = vmatprep.subr.mxu0 %v957_v5  ;;  %838 = vmatprep.subr.mxu1 %v957_v5  ;;  %v986_v16 = vunpack.c.h.bf16 %v788_v12  ;;  %v990_v17 = vunpack.c.h.bf16 %v780_v14  ;;  %v995_v19 = vunpack.c.l.bf16 %v788_v12  ;;  %v779_v20 = vld [vmem:[%s952_s21 + $0x20] sm:$0xff]   ;;  %v1000_v21 = vunpack.c.l.bf16 %v780_v14  ;;  %v778_v26 = vld [vmem:[%s952_s21 + $0x18] sm:$0xff]   ;;  %v777_v32 = vld [vmem:[%s952_s21 + $0x10] sm:$0xff]  }
  0x12   : > { %792 = vmatpush3.msra.mxu0 %v959_v6  ;;  %854 = vmatpush3.msra.mxu1 %v959_v6  ;;  %v1004_v22 = vunpack.c.h.bf16 %v787_v18  ;;  %v1008_v23 = vunpack.c.h.bf16 %v779_v20  ;;  %v1013_v25 = vunpack.c.l.bf16 %v787_v18  ;;  %v1018_v27 = vunpack.c.l.bf16 %v779_v20  ;;  %v713_v33 = vld [vmem:[%s952_s21] sm:$0xff]   ;;  %v776_v36 = vld [vmem:[%s952_s21 + $0x8] sm:$0xff]   ;;  %v343_v4 = vld [vmem:[%s1298_s1 + $0x30] sm:$0xff] }
  0x13   : > { %793 = vmatprep.subr.mxu0 %v961_v7  ;;  %839 = vmatprep.subr.mxu1 %v961_v7  ;;  %v1022_v28 = vunpack.c.h.bf16 %v786_v24  ;;  %v1026_v29 = vunpack.c.h.bf16 %v778_v26  ;;  %v1031_v31 = vunpack.c.l.bf16 %v786_v24  ;;  %v726_v34 = vunpack.c.l.bf16 %v778_v26  ;;  %v784_v38 = vld [vmem:[%s952_s21 + $0x48] sm:$0xff]   ;;  %v783_v49 = vld [vmem:[%s952_s21 + $0x40] sm:$0xff]   ;;  %v340_v12 = vld [vmem:[%s1298_s1 + $0x18] sm:$0xff] }
  0x14   : > { %794 = vmatpush3.msra.mxu0 %v964_v9  ;;  %855 = vmatpush3.msra.mxu1 %v964_v9  ;;  %v1039_v35 = vunpack.c.h.bf16 %v785_v30  ;;  %v723_v37 = vunpack.c.h.bf16 %v777_v32  ;;  %v718_v39 = vunpack.c.l.bf16 %v776_v36  ;;  %v715_v40 = vunpack.c.h.bf16 %v713_v33  ;;  %v337_v3 = vld [vmem:[%s1298_s1] sm:$0xff]  ;;  %v346_v14 = vld [vmem:[%s1298_s1 + $0x48] sm:$0xff] }
  0x15   : > { %795 = vmatprep.subr.mxu0 %v968_v10  ;;  %840 = vmatprep.subr.mxu1 %v968_v10  ;;  %v1047_v41 = vunpack.c.l.bf16 %v785_v30  ;;  %v722_v42 = vunpack.c.l.bf16 %v777_v32  ;;  %v719_v43 = vunpack.c.h.bf16 %v776_v36  ;;  %v714_v46 = vunpack.c.l.bf16 %v713_v33  ;;  %v339_v30 = vld [vmem:[%s1298_s1 + $0x10] sm:$0xff]  ;;  %v342_v33 = vld [vmem:[%s1298_s1 + $0x28] sm:$0xff] }
  0x16   : > { %796 = vmatpush3.msra.mxu0 %v972_v11  ;;  %856 = vmatpush3.msra.mxu1 %v972_v11  ;;  %v235_v44 = vmul.f32 %v718_v39, %v718_v39  ;;  %v234_v45 = vmul.f32 %v715_v40, %v715_v40  ;;  %v1051_v47 = vunpack.c.h.bf16 %v784_v38  ;;  %v1057_v52 = vunpack.c.l.bf16 %v784_v38 }
  0x17   : > { %797 = vmatprep.subr.mxu0 %v977_v13  ;;  %841 = vmatprep.subr.mxu1 %v977_v13  ;;  %v236_v48 = vmul.f32 %v719_v43, %v719_v43  ;;  %v233_v51 = vmul.f32 %v714_v46, %v714_v46  ;;  %v237_v53 = vmul.f32 %v722_v42, %v722_v42  ;;  %v1063_v56 = vunpack.c.h.bf16 %v783_v49 }
  0x18   : > { %798 = vmatpush3.msra.mxu0 %v982_v15  ;;  %857 = vmatpush3.msra.mxu1 %v982_v15  ;;  %v267_v50 = vsel %vm265_vm0, %v234_v45, 0.0  ;;  %v269_v54 = vsel %vm265_vm0, %v235_v44, 0.0  ;;  %v238_v58 = vmul.f32 %v723_v37, %v723_v37  ;;  %v746_v60 = vunpack.c.l.bf16 %v783_v49 }
  0x19   : > { %799 = vmatprep.subr.mxu0 %v986_v16  ;;  %842 = vmatprep.subr.mxu1 %v986_v16  ;;  %v266_v55 = vsel %vm265_vm0, %v233_v51, 0.0  ;;  %v271_v59 = vsel %vm265_vm0, %v236_v48, 0.0  ;;  %v239_v62 = vmul.f32 %v726_v34, %v726_v34  ;;  %v273_v63 = vsel %vm265_vm0, %v237_v53, 0.0 }
  0x1a   : > { %800 = vmatpush3.msra.mxu0 %v990_v17  ;;  %858 = vmatpush3.msra.mxu1 %v990_v17  ;;  %v268_v57 = vadd.f32 %v267_v50, %v266_v55  ;;  %v240_v1 = vmul.f32 %v1026_v29, %v1026_v29  ;;  %v275_v2 = vsel %vm265_vm0, %v238_v58, 0.0  ;;  %v241_v18 = vmul.f32 %v1018_v27, %v1018_v27 }
  0x1b   : > { %801 = vmatprep.subr.mxu0 %v995_v19  ;;  %843 = vmatprep.subr.mxu1 %v995_v19  ;;  %v277_v20 = vsel %vm265_vm0, %v239_v62, 0.0  ;;  %v242_v26 = vmul.f32 %v1008_v23, %v1008_v23  ;;  %v246_v44 = vmul.f32 %v972_v11, %v972_v11  ;;  %v248_v50 = vmul.f32 %v959_v6, %v959_v6 }
  0x1c   : > { %802 = vmatpush3.msra.mxu0 %v1000_v21  ;;  %859 = vmatpush3.msra.mxu1 %v1000_v21  ;;  %v270_v61 = vadd.f32 %v269_v54, %v268_v57  ;;  %v249_v54 = vmul.f32 %v746_v60, %v746_v60  ;;  %v250_v57 = vmul.f32 %v1063_v56, %v1063_v56 }
  0x1d   : > { %803 = vmatprep.subr.mxu0 %v1004_v22  ;;  %844 = vmatprep.subr.mxu1 %v1004_v22  ;;  %v283_v38 = vsel %vm265_vm0, %v242_v26, 0.0  ;;  %v295_v11 = vsel %vm265_vm0, %v248_v50, 0.0  ;;  %v252_v6 = vmul.f32 %v1051_v47, %v1051_v47  ;;  %v259_v26 = vmul.f32 %v995_v19, %v995_v19 }
  0x1e   : > { %804 = vmatpush3.msra.mxu0 %v1008_v23  ;;  %860 = vmatpush3.msra.mxu1 %v1008_v23  ;;  %v272_v0 = vadd.f32 %v271_v59, %v270_v61  ;;  %v243_v23 = vmul.f32 %v1000_v21, %v1000_v21  ;;  %v297_v59 = vsel %vm265_vm0, %v249_v54, 0.0  ;;  %v299_v62 = vsel %vm265_vm0, %v250_v57, 0.0 }
  0x1f   : > { %805 = vmatprep.subr.mxu0 %v1013_v25  ;;  %845 = vmatprep.subr.mxu1 %v1013_v25 }
  0x20   : > { %806 = vmatpush3.msra.mxu0 %v1018_v27  ;;  %861 = vmatpush3.msra.mxu1 %v1018_v27  ;;  %v274_v8 = vadd.f32 %v273_v63, %v272_v0  ;;  %v345_v27 = vld [vmem:[%s1298_s1 + $0x40] sm:$0xff]  ;;  %v285_v21 = vsel %vm265_vm0, %v243_v23, 0.0  ;;  %v262_v23 = vmul.f32 %v968_v10, %v968_v10 }
  0x21   : > { %807 = vmatprep.subr.mxu0 %v1022_v28  ;;  %846 = vmatprep.subr.mxu1 %v1022_v28 }
  0x22   : > { %808 = vmatpush3.msra.mxu0 %v1026_v29  ;;  %862 = vmatpush3.msra.mxu1 %v1026_v29  ;;  %v276_v24 = vadd.f32 %v275_v2, %v274_v8  ;;  %v279_v29 = vsel %vm265_vm0, %v240_v1, 0.0  ;;  %v256_v8 = vmul.f32 %v1022_v28, %v1022_v28 }
  0x23   : > { %809 = vmatprep.subr.mxu0 %v1031_v31  ;;  %847 = vmatprep.subr.mxu1 %v1031_v31 }
  0x24   : > { %810 = vmatpush3.msra.mxu0 %v726_v34  ;;  %863 = vmatpush3.msra.mxu1 %v726_v34  ;;  %v278_v32 = vadd.f32 %v277_v20, %v276_v24  ;;  %v281_v34 = vsel %vm265_vm0, %v241_v18, 0.0  ;;  %v258_v20 = vmul.f32 %v1004_v22, %v1004_v22  ;;  %v317_v22 = vsel %vm265_vm0, %v259_v26, 0.0 }
  0x25   : > { %811 = vmatprep.subr.mxu0 %v1039_v35  ;;  %848 = vmatprep.subr.mxu1 %v1039_v35 }
  0x26   : > { %812 = vmatpush3.msra.mxu0 %v723_v37  ;;  %864 = vmatpush3.msra.mxu1 %v723_v37  ;;  %v280_v36 = vadd.f32 %v279_v29, %v278_v32  ;;  %v244_v37 = vmul.f32 %v990_v17, %v990_v17  ;;  %v261_v32 = vmul.f32 %v977_v13, %v977_v13  ;;  %v323_v13 = vsel %vm265_vm0, %v262_v23, 0.0 }
  0x27   : > { %813 = vmatprep.subr.mxu0 %v1047_v41  ;;  %849 = vmatprep.subr.mxu1 %v1047_v41 }
  0x28   : > { %814 = vmatpush3.msra.mxu0 %v722_v42  ;;  %865 = vmatpush3.msra.mxu1 %v722_v42  ;;  %v245_v42 = vmul.f32 %v982_v15, %v982_v15  ;;  %v287_v17 = vsel %vm265_vm0, %v244_v37, 0.0  ;;  %v291_v15 = vsel %vm265_vm0, %v246_v44, 0.0 }
  0x29   : > { %815 = vmatprep.subr.mxu0 %v1051_v47  ;;  %850 = vmatprep.subr.mxu1 %v1051_v47 }
  0x2a   : > { %816 = vmatpush3.msra.mxu0 %v719_v43  ;;  %866 = vmatpush3.msra.mxu1 %v719_v43  ;;  %v289_v48 = vsel %vm265_vm0, %v245_v42, 0.0 }
  0x2b   : > { %817 = vmatprep.subr.mxu0 %v1057_v52  ;;  %851 = vmatprep.subr.mxu1 %v1057_v52 }
  0x2c   : > { %818 = vmatpush3.msra.mxu0 %v718_v39  ;;  %867 = vmatpush3.msra.mxu1 %v718_v39  ;;  %v341_v39 = vld [vmem:[%s1298_s1 + $0x20] sm:$0xff] }
  0x2d   : > { %819 = vmatprep.subr.mxu0 %v1063_v56  ;;  %852 = vmatprep.subr.mxu1 %v1063_v56  ;;  %v254_v56 = vmul.f32 %v1039_v35, %v1039_v35 }
  0x2e   : > { %820 = vmatpush3.msra.mxu0 %v715_v40  ;;  %868 = vmatpush3.msra.mxu1 %v715_v40  ;;  %v282_v40 = vadd.f32 %v281_v34, %v280_v36  ;;  %v263_v36 = vmul.f32 %v961_v7, %v961_v7 }
  0x2f   : > { %821 = vmatprep.subr.mxu0 %v746_v60  ;;  %853 = vmatprep.subr.mxu1 %v746_v60  ;;  %v253_v60 = vmul.f32 %v1047_v41, %v1047_v41  ;;  %v307_v41 = vsel %vm265_vm0, %v254_v56, 0.0 }
  0x30   : > { %822 = vmatpush3.msra.mxu0 %v714_v46  ;;  %869 = vmatpush3.msra.mxu1 %v714_v46  ;;  %v284_v43 = vadd.f32 %v283_v38, %v282_v40  ;;  %v247_v46 = vmul.f32 %v964_v9, %v964_v9  ;;  %v251_v9 = vmul.f32 %v1057_v52, %v1057_v52  ;;  %v303_v52 = vsel %vm265_vm0, %v252_v6, 0.0  ;;  %v443_v6 = vld [vmem:[%s1299_s2] sm:$0xff] }
  0x31   : > { %412 = vmatmul.mubr.f32.vlgmr.msra.gmra.mxu0 %v337_v3  ;;  %427 = vmatmul.mubr.f32.vlgmr.msra.gmra.mxu1 %v343_v4  ;;  %v255_v3 = vmul.f32 %v1031_v31, %v1031_v31  ;;  %v305_v47 = vsel %vm265_vm0, %v253_v60, 0.0  ;;  %v311_v31 = vsel %vm265_vm0, %v256_v8, 0.0  ;;  %v264_v38 = vmul.f32 %v957_v5, %v957_v5  ;;  %v446_v60 = vld [vmem:[%s1299_s2 + $0x18] sm:$0xff] }
  0x32   : > { %416 = vmatprep.mubr.f32.mxu0 %v340_v12  ;;  %431 = vmatprep.mubr.f32.mxu1 %v346_v14  ;;  %v286_v45 = vadd.f32 %v285_v21, %v284_v43  ;;  %v293_v53 = vsel %vm265_vm0, %v247_v46, 0.0  ;;  %v301_v0 = vsel %vm265_vm0, %v251_v9, 0.0  ;;  %v257_v14 = vmul.f32 %v1013_v25, %v1013_v25 }
  0x33   : > { %v309_v35 = vsel %vm265_vm0, %v255_v3, 0.0  ;;  %v315_v25 = vsel %vm265_vm0, %v258_v20, 0.0  ;;  %v325_v40 = vsel %vm265_vm0, %v263_v36, 0.0  ;;  %v327_v10 = vsel %vm265_vm0, %v264_v38, 0.0  ;;  %v708_v3 = vld [vmem:[%s1299_s2 + $0x48] sm:$0xff] }
  0x34   : > { %v288_v49 = vadd.f32 %v287_v17, %v286_v45  ;;  %v313_v28 = vsel %vm265_vm0, %v257_v14, 0.0 }
  0x35   : > { %417 = vmatmul.mubr.f32.gmra.mxu0 %v339_v30  ;;  %432 = vmatmul.mubr.f32.gmra.mxu1 %v345_v27  ;;  %v260_v30 = vmul.f32 %v986_v16, %v986_v16  ;;  %v321_v16 = vsel %vm265_vm0, %v261_v32, 0.0 }
  0x36   : > { %421 = vmatprep.mubr.f32.mxu0 %v342_v33  ;;  %v290_v51 = vadd.f32 %v289_v48, %v288_v49 }
  0x37   : > { %v319_v19 = vsel %vm265_vm0, %v260_v30, 0.0 }
  0x38   : > { %v292_v55 = vadd.f32 %v291_v15, %v290_v51 }
  0x39   : > { %422 = vmatmul.mubr.f32.gmra.mxu0 %v341_v39 }
  0x3a   : > { %v294_v58 = vadd.f32 %v293_v53, %v292_v55 }
  0x3c   : > { %v296_v61 = vadd.f32 %v295_v11, %v294_v58 }
  0x3e   : > { %v298_v63 = vadd.f32 %v297_v59, %v296_v61 }
  0x40   : > { %v300_v1 = vadd.f32 %v299_v62, %v298_v63  ;;  %v704_v62 = vld [vmem:[%s1299_s2 + $0x28] sm:$0xff] }
  0x42   : > { %v302_v2 = vadd.f32 %v301_v0, %v300_v1 }
  0x44   : > { %v304_v4 = vadd.f32 %v303_v52, %v302_v2  ;;  %v707_v52 = vld [vmem:[%s1299_s2 + $0x40] sm:$0xff] }
  0x45   : > { %v447_v2 = vld [vmem:[%s1299_s2 + $0x20] sm:$0xff] }
  0x46   : > { %v306_v12 = vadd.f32 %v305_v47, %v304_v4 }
  0x48   : > { %v308_v18 = vadd.f32 %v307_v41, %v306_v12  ;;  %v444_v41 = vld [vmem:[%s1299_s2 + $0x8] sm:$0xff]  ;;  %v705_v12 = vld [vmem:[%s1299_s2 + $0x30] sm:$0xff] }
  0x4a   : > { %v310_v24 = vadd.f32 %v309_v35, %v308_v18 }
  0x4c   : > { %v312_v29 = vadd.f32 %v311_v31, %v310_v24 }
  0x4e   : > { %v314_v27 = vadd.f32 %v313_v28, %v312_v29  ;;  %v445_v28 = vld [vmem:[%s1299_s2 + $0x10] sm:$0xff]  ;;  %v706_v29 = vld [vmem:[%s1299_s2 + $0x38] sm:$0xff] }
  0x50   : > { %v316_v33 = vadd.f32 %v315_v25, %v314_v27 }
  0x52   : > { %v318_v34 = vadd.f32 %v317_v22, %v316_v33 }
  0x54   : > { %v320_v37 = vadd.f32 %v319_v19, %v318_v34 }
  0x56   : > { %v322_v39 = vadd.f32 %v321_v16, %v320_v37 }
  0x58   : > { %v324_v42 = vadd.f32 %v323_v13, %v322_v39 }
  0x5a   : > { %v326_v21 = vadd.f32 %v325_v40, %v324_v42 }
  0x5c   : > { %v328_v43 = vadd.f32 %v327_v10, %v326_v21 }
  0x5e   : > { %v329_v44 = vrot.slane %v328_v43, 4 }
  0x60   : > { %v330_v17 = vadd.f32 %v329_v44, %v328_v43 }
  0x62   : > { %v331_v45 = vrot.slane %v330_v17, 2 }
  0x64   : > { %v332_v7 = vadd.f32 %v331_v45, %v330_v17 }
  0x66   : > { %v333_v46 = vrot.slane %v332_v7, 1 }
  0x68   : > { %v334_v48 = vadd.f32 %v333_v46, %v332_v7 }
  0x6a   : > { %v335_v49 = vmax.f32 %v334_v48, 1e-08 }
  0x6c   : > { %878 = vrsqrt.f32 %v335_v49 }
  0x79   : > { %v879_v50 = vpop.eup %878 }
  0x7a   : > { %v437_v53 = vmul.f32 20.0, %v879_v50 }
  0xf1   : > { %v823_v5 = vpop.f32.mrf.mxu0  ;;  %v832_v15 = vpop.f32.mrf.mxu1 }
  0xf3   : > { %v824_v51 = vpop.f32.mrf.mxu0  ;;  %v833_v54 = vpop.f32.mrf.mxu1 }
  0xf4   : > { %v825_v55 = vadd.f32 %v824_v51, %v823_v5  ;;  %v834_v11 = vadd.f32 %v833_v54, %v832_v15 }
  0xf5   : > { %v826_v57 = vpop.f32.mrf.mxu0  ;;  %v835_v58 = vpop.f32.mrf.mxu1 }
  0xf6   : > { %v438_v9 = vmul.f32 %v825_v55, %v437_v53  ;;  %v441_v63 = vmul.f32 %v834_v11, %v437_v53 }
  0xf7   : > { %v827_v59 = vpop.f32.mrf.mxu0  ;;  %v836_v61 = vpop.f32.mrf.mxu1 }
  0xf8   : > { %v828_v0 = vadd.f32 %v827_v59, %v826_v57  ;;  %v837_v1 = vadd.f32 %v836_v61, %v835_v58  ;;  %v1188_v47 = vadd.f32 %v443_v6, %v438_v9  ;;  %v1190_v4 = vadd.f32 %v704_v62, %v438_v9 }
  0xf9   : > { %v829_v56 = vpop.f32.mrf.mxu0  ;;  %v1198_v20 = vadd.f32 %v446_v60, %v441_v63  ;;  %v1200_v31 = vadd.f32 %v707_v52, %v441_v63 }
  0xfa   : > { %v439_v8 = vmul.f32 %v828_v0, %v437_v53  ;;  %v442_v14 = vmul.f32 %v837_v1, %v437_v53  ;;  %v453_v32 = vsel %vm265_vm0, %v1188_v47, -inf  ;;  %v531_v22 = vsel %vm265_vm0, %v1190_v4, -inf }
  0xfb   : > { %v830_v35 = vpop.f32.mrf.mxu0  ;;  %v456_v37 = vsel %vm265_vm0, %v1198_v20, -inf  ;;  %v534_v38 = vsel %vm265_vm0, %v1200_v31, -inf }
  0xfc   : > { %v831_v18 = vadd.f32 %v830_v35, %v829_v56  ;;  %v1202_v24 = vadd.f32 %v447_v2, %v442_v14  ;;  %v1204_v26 = vadd.f32 %v708_v3, %v442_v14  ;;  %v1212_v30 = vadd.f32 %v444_v41, %v439_v8 }
  0xfd   : > { %v1214_v25 = vadd.f32 %v705_v12, %v439_v8 }
  0xfe   : > { %v440_v27 = vmul.f32 %v831_v18, %v437_v53  ;;  %v457_v33 = vsel %vm265_vm0, %v1202_v24, -inf  ;;  %v535_v23 = vsel %vm265_vm0, %v1204_v26, -inf  ;;  %v454_v13 = vsel %vm265_vm0, %v1212_v30, -inf }
  0xff   : > { %v458_v19 = vmax.f32 %v453_v32, %v457_v33  ;;  %v536_v34 = vmax.f32 %v531_v22, %v535_v23  ;;  %v532_v39 = vsel %vm265_vm0, %v1214_v25, -inf  ;;  %v598_v53 = vlaneseq }
 0x100   : > { %v1224_v36 = vadd.f32 %v445_v28, %v440_v27  ;;  %v1226_v16 = vadd.f32 %v706_v29, %v440_v27 }
 0x101   : > { %v459_v10 = vmax.f32 %v458_v19, %v454_v13  ;;  %v537_v21 = vmax.f32 %v536_v34, %v532_v39  ;;  %v599_v58 = vshrl.u32 %v598_v53, 7 }
 0x102   : > { %v455_v40 = vsel %vm265_vm0, %v1224_v36, -inf  ;;  %v533_v42 = vsel %vm265_vm0, %v1226_v16, -inf }
 0x103   : > { %v460_v43 = vmax.f32 %v455_v40, %v456_v37  ;;  %v538_v44 = vmax.f32 %v533_v42, %v534_v38  ;;  %v600_v8 = vadd.s32 8, %v599_v58  ;;  %v601_v41 = vadd.s32 16, %v599_v58 }
 0x104   : > { %v602_v12 = vadd.s32 24, %v599_v58  ;;  %v603_v18 = vadd.s32 32, %v599_v58 }
 0x105   : > { %v461_v17 = vmax.f32 %v459_v10, %v460_v43  ;;  %v539_v45 = vmax.f32 %v537_v21, %v538_v44 }
 0x107   : > { %v462_v7 = vrot.slane %v461_v17, 4  ;;  %v540_v46 = vrot.slane %v539_v45, 4 }
 0x109   : > { %v463_v48 = vmax.f32 %v461_v17, %v462_v7  ;;  %v541_v49 = vmax.f32 %v539_v45, %v540_v46 }
 0x10b   : > { %v464_v50 = vrot.slane %v463_v48, 2  ;;  %v542_v5 = vrot.slane %v541_v49, 2 }
 0x10d   : > { %v465_v15 = vmax.f32 %v463_v48, %v464_v50  ;;  %v543_v51 = vmax.f32 %v541_v49, %v542_v5 }
 0x10f   : > { %v466_v54 = vrot.slane %v465_v15, 1  ;;  %v544_v55 = vrot.slane %v543_v51, 1 }
 0x111   : > { %v467_v11 = vmax.f32 %v465_v15, %v466_v54  ;;  %v545_v57 = vmax.f32 %v543_v51, %v544_v55 }
 0x113   : > { %v468_v9 = vsub.f32 %v1188_v47, %v467_v11  ;;  %v469_v59 = vsub.f32 %v1212_v30, %v467_v11  ;;  %v470_v61 = vsub.f32 %v1224_v36, %v467_v11  ;;  %v471_v6 = vsub.f32 %v1198_v20, %v467_v11 }
 0x114   : > { %v472_v62 = vsub.f32 %v1202_v24, %v467_v11  ;;  %v546_v63 = vsub.f32 %v1190_v4, %v545_v57  ;;  %v547_v60 = vsub.f32 %v1214_v25, %v545_v57  ;;  %v548_v0 = vsub.f32 %v1226_v16, %v545_v57 }
 0x115   : > { %v473_v1 = vmul.f32 1.442695, %v468_v9  ;;  %v475_v56 = vmul.f32 1.442695, %v469_v59  ;;  %v477_v52 = vmul.f32 1.442695, %v470_v61  ;;  %v549_v2 = vsub.f32 %v1200_v31, %v545_v57 }
 0x116   : > { %v479_v3 = vmul.f32 1.442695, %v471_v6  ;;  %v481_v14 = vmul.f32 1.442695, %v472_v62  ;;  %v550_v35 = vsub.f32 %v1204_v26, %v545_v57  ;;  %v551_v28 = vmul.f32 1.442695, %v546_v63 }
 0x117   : > { %880 = vpow2.f32 %v473_v1  ;;  %v553_v29 = vmul.f32 1.442695, %v547_v60  ;;  %vm604_vm1 = vcmp.ge.f32.partialorder %v1190_v4, %v545_v57  ;;  %v555_v27 = vmul.f32 1.442695, %v548_v0 }
 0x118   : > { %882 = vpow2.f32 %v475_v56  ;;  %v557_v32 = vmul.f32 1.442695, %v549_v2  ;;  %vm608_vm2 = vcmp.ge.f32.partialorder %v1204_v26, %v545_v57  ;;  %vm605_vm3 = vcmp.ge.f32.partialorder %v1214_v25, %v545_v57 }
 0x119   : > { %884 = vpow2.f32 %v477_v52  ;;  %vm606_vm4 = vcmp.ge.f32.partialorder %v1226_v16, %v545_v57  ;;  %v609_v22 = vsel %vm604_vm1, %v599_v58, 1073741824  ;;  %vm607_vm5 = vcmp.ge.f32.partialorder %v1200_v31, %v545_v57 }
 0x11a   : > { %886 = vpow2.f32 %v479_v3  ;;  %v613_v33 = vsel %vm608_vm2, %v603_v18, 1073741824  ;;  %v614_v23 = vsel %vm265_vm0, %v609_v22, 2147483647  ;;  %v559_v19 = vmul.f32 1.442695, %v550_v35 }
 0x11b   : > { %888 = vpow2.f32 %v481_v14  ;;  %v610_v34 = vsel %vm605_vm3, %v600_v8, 1073741824  ;;  %v618_v37 = vsel %vm265_vm0, %v613_v33, 2147483647  ;;  %v611_v38 = vsel %vm606_vm4, %v601_v41, 1073741824 }
 0x11c   : > { %890 = vpow2.f32 %v551_v28  ;;  %v612_v13 = vsel %vm607_vm5, %v602_v12, 1073741824  ;;  %vm619_vm6 = vcmp.lt.s32.totalorder %v614_v23, %v618_v37  ;;  %v615_v40 = vsel %vm265_vm0, %v610_v34, 2147483647 }
 0x11d   : > { %892 = vpow2.f32 %v553_v29  ;;  %v620_v39 = vsel %vm619_vm6, %v614_v23, %v618_v37  ;;  %v616_v42 = vsel %vm265_vm0, %v611_v38, 2147483647  ;;  %v617_v10 = vsel %vm265_vm0, %v612_v13, 2147483647 }
 0x11e   : > { %894 = vpow2.f32 %v555_v27  ;;  %vm621_vm7 = vcmp.lt.s32.totalorder %v620_v39, %v615_v40  ;;  %vm623_vm8 = vcmp.lt.s32.totalorder %v616_v42, %v617_v10 }
 0x11f   : > { %896 = vpow2.f32 %v557_v32  ;;  %v622_v45 = vsel %vm621_vm7, %v620_v39, %v615_v40  ;;  %v624_v51 = vsel %vm623_vm8, %v616_v42, %v617_v10 }
 0x120   : > { %898 = vpow2.f32 %v559_v19  ;;  %vm625_vm9 = vcmp.lt.s32.totalorder %v622_v45, %v624_v51 }
 0x121   : > { %v626_v0 = vsel %vm625_vm9, %v622_v45, %v624_v51 }
 0x122   : > { %v627_v33 = vrot.slane %v626_v0, 4 }
 0x124   : > { %v881_v21 = vpop.eup %880  ;;  %vm628_vm10 = vcmp.lt.s32.totalorder %v626_v0, %v627_v33 }
 0x125   : > { %v883_v43 = vpop.eup %882  ;;  %v483_v44 = vsel %vm265_vm0, %v881_v21, 0.0  ;;  %v498_v17 = vmul.f32 %v881_v21, %v1188_v47 }
 0x126   : > { %v885_v7 = vpop.eup %884  ;;  %v484_v46 = vsel %vm265_vm0, %v883_v43, 0.0  ;;  %v499_v48 = vmul.f32 %v883_v43, %v1212_v30 }
 0x127   : > { %v887_v49 = vpop.eup %886  ;;  %v485_v50 = vadd.f32 %v484_v46, %v483_v44  ;;  %v500_v5 = vmul.f32 %v885_v7, %v1224_v36  ;;  %v503_v15 = vsel %vm265_vm0, %v498_v17, 0.0  ;;  %v486_v54 = vsel %vm265_vm0, %v885_v7, 0.0 }
 0x128   : > { %v889_v53 = vpop.eup %888  ;;  %v504_v55 = vsel %vm265_vm0, %v499_v48, 0.0  ;;  %v501_v57 = vmul.f32 %v887_v49, %v1198_v20  ;;  %v488_v30 = vsel %vm265_vm0, %v887_v49, 0.0  ;;  %v629_v46 = vsel %vm628_vm10, %v626_v0, %v627_v33 }
 0x129   : > { %v891_v47 = vpop.eup %890  ;;  %v487_v11 = vadd.f32 %v486_v54, %v485_v50  ;;  %v505_v58 = vadd.f32 %v504_v55, %v503_v15  ;;  %v506_v59 = vsel %vm265_vm0, %v500_v5, 0.0  ;;  %v490_v56 = vsel %vm265_vm0, %v889_v53, 0.0 }
 0x12a   : > { %v893_v9 = vpop.eup %892  ;;  %v561_v36 = vsel %vm265_vm0, %v891_v47, 0.0  ;;  %v576_v61 = vmul.f32 %v891_v47, %v1190_v4  ;;  %v502_v20 = vmul.f32 %v889_v53, %v1202_v24  ;;  %v508_v8 = vsel %vm265_vm0, %v501_v57, 0.0 }
 0x12b   : > { %v895_v6 = vpop.eup %894  ;;  %v489_v62 = vadd.f32 %v488_v30, %v487_v11  ;;  %v507_v63 = vadd.f32 %v506_v59, %v505_v58  ;;  %v562_v60 = vsel %vm265_vm0, %v893_v9, 0.0  ;;  %v577_v2 = vmul.f32 %v893_v9, %v1214_v25 }
 0x12c   : > { %v897_v1 = vpop.eup %896  ;;  %v563_v52 = vadd.f32 %v562_v60, %v561_v36  ;;  %v564_v41 = vsel %vm265_vm0, %v895_v6, 0.0  ;;  %v578_v4 = vmul.f32 %v895_v6, %v1226_v16  ;;  %v581_v18 = vsel %vm265_vm0, %v576_v61, 0.0 }
 0x12d   : > { %v491_v3 = vadd.f32 %v490_v56, %v489_v62  ;;  %v899_v12 = vpop.eup %898  ;;  %v509_v14 = vadd.f32 %v508_v8, %v507_v63  ;;  %v566_v29 = vsel %vm265_vm0, %v897_v1, 0.0  ;;  %v579_v24 = vmul.f32 %v897_v1, %v1200_v31 }
 0x12e   : > { %v565_v35 = vadd.f32 %v564_v41, %v563_v52  ;;  %v582_v27 = vsel %vm265_vm0, %v577_v2, 0.0  ;;  %v510_v25 = vsel %vm265_vm0, %v502_v20, 0.0  ;;  %v568_v16 = vsel %vm265_vm0, %v899_v12, 0.0 }
 0x12f   : > { %v492_v28 = vrot.slane %v491_v3, 4  ;;  %v583_v22 = vadd.f32 %v582_v27, %v581_v18  ;;  %v580_v19 = vmul.f32 %v899_v12, %v1204_v26  ;;  %v584_v34 = vsel %vm265_vm0, %v578_v4, 0.0 }
 0x130   : > { %v567_v32 = vadd.f32 %v566_v29, %v565_v35  ;;  %v511_v37 = vadd.f32 %v510_v25, %v509_v14  ;;  %v586_v31 = vsel %vm265_vm0, %v579_v24, 0.0  ;;  %v630_v5 = vrot.slane %v629_v46, 2 }
 0x131   : > { %v493_v23 = vadd.f32 %v492_v28, %v491_v3  ;;  %v585_v13 = vadd.f32 %v584_v34, %v583_v22  ;;  %v588_v21 = vsel %vm265_vm0, %v580_v19, 0.0 }
 0x132   : > { %v569_v38 = vadd.f32 %v568_v16, %v567_v32  ;;  %v512_v43 = vrot.slane %v511_v37, 4  ;;  %vm631_vm11 = vcmp.lt.s32.totalorder %v629_v46, %v630_v5 }
 0x133   : > { %v494_v39 = vrot.slane %v493_v23, 2  ;;  %v587_v42 = vadd.f32 %v586_v31, %v585_v13  ;;  %v632_v11 = vsel %vm631_vm11, %v629_v46, %v630_v5 }
 0x134   : > { %v570_v40 = vrot.slane %v569_v38, 4  ;;  %v513_v49 = vadd.f32 %v512_v43, %v511_v37  ;;  %v633_v58 = vrot.slane %v632_v11, 1 }
 0x135   : > { %v495_v10 = vadd.f32 %v494_v39, %v493_v23  ;;  %v589_v17 = vadd.f32 %v588_v21, %v587_v42 }
 0x136   : > { %v571_v44 = vadd.f32 %v570_v40, %v569_v38  ;;  %v514_v53 = vrot.slane %v513_v49, 2  ;;  %vm634_vm12 = vcmp.lt.s32.totalorder %v632_v11, %v633_v58 }
 0x137   : > { %v496_v45 = vrot.slane %v495_v10, 1  ;;  %v590_v26 = vrot.slane %v589_v17, 4  ;;  %v635_v62 = vsel %vm634_vm12, %v632_v11, %v633_v58 }
 0x138   : > { %v572_v7 = vrot.slane %v571_v44, 2  ;;  %v515_v47 = vadd.f32 %v514_v53, %v513_v49  ;;  %v636_v0 = vcvt.s32.f32 %v635_v62 }
 0x139   : > { %v497_v48 = vadd.f32 %v496_v45, %v495_v10  ;;  %v591_v51 = vadd.f32 %v590_v26, %v589_v17 }
 0x13a   : > { %v573_v50 = vadd.f32 %v572_v7, %v571_v44  ;;  %v516_v9 = vrot.slane %v515_v47, 1 }
 0x13b   : > { %900 = vrcp.f32 %v497_v48  ;;  %v592_v55 = vrot.slane %v591_v51, 2 }
 0x13c   : > { %v574_v15 = vrot.slane %v573_v50, 1  ;;  %v517_v36 = vadd.f32 %v516_v9, %v515_v47 }
 0x13d   : > { %v593_v57 = vadd.f32 %v592_v55, %v591_v51 }
 0x13e   : > { %v575_v54 = vadd.f32 %v574_v15, %v573_v50 }
 0x13f   : > { %v594_v30 = vrot.slane %v593_v57, 1 }
 0x140   : > { %902 = vrcp.f32 %v575_v54 }
 0x141   : > { %v595_v6 = vadd.f32 %v594_v30, %v593_v57 }
 0x148   : > { %v901_v59 = vpop.eup %900 }
 0x149   : > { %v519_v61 = vmul.f32 %v901_v59, %v517_v36 }
 0x14d   : > { %v903_v63 = vpop.eup %902 }
 0x14e   : > { %v597_v60 = vmul.f32 %v903_v63, %v595_v6 }
 0x150   : > { %v638_v1 = vsel %vm637_vm13, %v519_v61, %v597_v60 }
 0x151   : > { %v640_v56 = vsel %vm639_vm14, %v638_v1, %v636_v0 }
 0x152   : > { %642 = vst.msk [vmem:[%s168_s9] sm:$0x7] %vm641_vm15, %v640_v56 }
 0x153 PF: > { %s13_s12 = sadd.s32 1, %s910_s12  }
 0x154   : > { %p10_p4 = scmp.ge.s32.totalorder %s13_s12, 4  }
 0x156   :  { %12 = sbr.rel (!%p10_p4) target bundleno = 1 (0x1), region = 63 }

// kernel: squeeze.8
= control target key start
LH: loop header
LB: loop body
LE: loop exit
PB: predicated region body
PF: predicated region fallthrough
CT: control target
= control target key end

     0   :  { %s131_s8 = smov 104   ;;  %s132_s9 = smov 112   ;;  %vm8_vm0 = vcmask 64512   ;;  %s222_s0 = inlined_call_operand.vmem [shape: f32[128], index: 0, kind: input, shape index: {}]   ;;  %s223_s1 = inlined_call_operand.vmem [shape: f32[2,1,8,8], index: 1, kind: output, shape index: {}]  }
   0x1   :  { %v5_v0 = vld [vmem:[%s222_s0] sm:$0x1]  ;;  %s130_s0 = smov 120   ;;  %s133_s10 = smov 96  }
   0x2   :  { %6 = vst [vmem:[#allocation0] sm:$0x1] %v5_v0  ;;  %s134_s11 = smov 88   ;;  %s135_s12 = smov 80  }
   0x3   :  { %s136_s13 = smov 72   ;;  %s137_s14 = smov 64  }
   0x4   :  { %s138_s17 = smov 56   ;;  %s139_s18 = smov 48  }
   0x5   :  { %s140_s19 = smov 40   ;;  %s141_s20 = smov 32  }
   0x6   :  { %s142_s21 = smov 24   ;;  %s143_s22 = smov 16  }
   0x7   :  { %s144_s23 = smov 8  }
   0x9   :  { %v10_v1 = vld [vmem:[#allocation0] sm:$0x1]  }
   0xa   :  { %v22_v2 = vld [vmem:[#allocation0] sm:$0x1]   ;;  %11 = vrot.lane.b32.xlu0 %v10_v1, %s130_s0 }
   0xb   :  { %23 = vrot.lane.b32.xlu1 %v22_v2, %s131_s8  ;;  %v16_v3 = vld [vmem:[#allocation0] sm:$0x1]  }
   0xc   :  { %v28_v4 = vld [vmem:[#allocation0] sm:$0x1]  }
   0xd   :  { %v34_v5 = vld [vmem:[#allocation0] sm:$0x1]  }
   0xe   :  { %17 = vrot.lane.b32.xlu0 %v16_v3, %s132_s9  ;;  %v40_v6 = vld [vmem:[#allocation0] sm:$0x1]  }
   0xf   :  { %29 = vrot.lane.b32.xlu1 %v28_v4, %s133_s10  ;;  %v46_v7 = vld [vmem:[#allocation0] sm:$0x1]  }
  0x10   :  { %v52_v8 = vld [vmem:[#allocation0] sm:$0x1]  }
  0x11   :  { %v58_v9 = vld [vmem:[#allocation0] sm:$0x1]  }
  0x12   :  { %35 = vrot.lane.b32.xlu0 %v34_v5, %s134_s11  ;;  %v64_v10 = vld [vmem:[#allocation0] sm:$0x1]  }
  0x13   :  { %41 = vrot.lane.b32.xlu1 %v40_v6, %s135_s12  ;;  %v7_v11 = vld [vmem:[#allocation0] sm:$0x1]  }
  0x14   :  { %9 = vst.msk [vmem:[%s223_s1] sm:$0x1] %vm8_vm0, %v7_v11   ;;  %v70_v12 = vld [vmem:[#allocation0] sm:$0x1]  }
  0x15   :  { %v76_v13 = vld [vmem:[#allocation0] sm:$0x1]  }
  0x16   :  { %47 = vrot.lane.b32.xlu0 %v46_v7, %s136_s13  ;;  %v82_v14 = vld [vmem:[#allocation0] sm:$0x1]  }
  0x17   :  { %53 = vrot.lane.b32.xlu1 %v52_v8, %s137_s14  ;;  %v88_v15 = vld [vmem:[#allocation0] sm:$0x1]  }
  0x18   :  { %v94_v16 = vld [vmem:[#allocation0] sm:$0x1]  }
  0x1a   :  { %59 = vrot.lane.b32.xlu0 %v58_v9, %s138_s17 }
  0x1b   :  { %65 = vrot.lane.b32.xlu1 %v64_v10, %s139_s18 }
  0x1e   :  { %71 = vrot.lane.b32.xlu0 %v70_v12, %s140_s19 }
  0x1f   :  { %77 = vrot.lane.b32.xlu1 %v76_v13, %s141_s20 }
  0x22   :  { %83 = vrot.lane.b32.xlu0 %v82_v14, %s142_s21 }
  0x23   :  { %89 = vrot.lane.b32.xlu1 %v88_v15, %s143_s22 }
  0x26   :  { %95 = vrot.lane.b32.xlu0 %v94_v16, %s144_s23 }
  0x7c   :  { %v12_v17 = vpop.permute.xlu0 %11  }
  0x7d   :  { %v24_v18 = vpop.permute.xlu1 %23   ;;  %100 = vst.msk [vmem:[%s223_s1 + $0x1] sm:$0x1] %vm8_vm0, %v12_v17  }
  0x7e   :  { %102 = vst.msk [vmem:[%s223_s1 + $0x3] sm:$0x1] %vm8_vm0, %v24_v18  }
  0x80   :  { %v18_v19 = vpop.permute.xlu0 %17  }
  0x81   :  { %v30_v20 = vpop.permute.xlu1 %29   ;;  %101 = vst.msk [vmem:[%s223_s1 + $0x2] sm:$0x1] %vm8_vm0, %v18_v19  }
  0x82   :  { %103 = vst.msk [vmem:[%s223_s1 + $0x4] sm:$0x1] %vm8_vm0, %v30_v20  }
  0x84   :  { %v36_v21 = vpop.permute.xlu0 %35  }
  0x85   :  { %v42_v22 = vpop.permute.xlu1 %41   ;;  %104 = vst.msk [vmem:[%s223_s1 + $0x5] sm:$0x1] %vm8_vm0, %v36_v21  }
  0x86   :  { %105 = vst.msk [vmem:[%s223_s1 + $0x6] sm:$0x1] %vm8_vm0, %v42_v22  }
  0x88   :  { %v48_v23 = vpop.permute.xlu0 %47  }
  0x89   :  { %v54_v24 = vpop.permute.xlu1 %53   ;;  %106 = vst.msk [vmem:[%s223_s1 + $0x7] sm:$0x1] %vm8_vm0, %v48_v23  }
  0x8a   :  { %107 = vst.msk [vmem:[%s223_s1 + $0x8] sm:$0x1] %vm8_vm0, %v54_v24  }
  0x8c   :  { %v60_v25 = vpop.permute.xlu0 %59  }
  0x8d   :  { %v66_v26 = vpop.permute.xlu1 %65   ;;  %108 = vst.msk [vmem:[%s223_s1 + $0x9] sm:$0x1] %vm8_vm0, %v60_v25  }
  0x8e   :  { %109 = vst.msk [vmem:[%s223_s1 + $0xa] sm:$0x1] %vm8_vm0, %v66_v26  }
  0x90   :  { %v72_v27 = vpop.permute.xlu0 %71  }
  0x91   :  { %v78_v28 = vpop.permute.xlu1 %77   ;;  %110 = vst.msk [vmem:[%s223_s1 + $0xb] sm:$0x1] %vm8_vm0, %v72_v27  }
  0x92   :  { %111 = vst.msk [vmem:[%s223_s1 + $0xc] sm:$0x1] %vm8_vm0, %v78_v28  }
  0x94   :  { %v84_v29 = vpop.permute.xlu0 %83  }
  0x95   :  { %v90_v30 = vpop.permute.xlu1 %89   ;;  %112 = vst.msk [vmem:[%s223_s1 + $0xd] sm:$0x1] %vm8_vm0, %v84_v29  }
  0x96   :  { %113 = vst.msk [vmem:[%s223_s1 + $0xe] sm:$0x1] %vm8_vm0, %v90_v30  }
  0x98   :  { %v96_v31 = vpop.permute.xlu0 %95  }
  0x99   :  { %114 = vst.msk [vmem:[%s223_s1 + $0xf] sm:$0x1] %vm8_vm0, %v96_v31  }

// kernel: squeeze.7
= control target key start
LH: loop header
LB: loop body
LE: loop exit
PB: predicated region body
PF: predicated region fallthrough
CT: control target
= control target key end

     0   :  { %s67_s8 = smov 104   ;;  %vm8_vm0 = vcmask 64512   ;;  %s68_s11 = smov 112   ;;  %s118_s0 = inlined_call_operand.vmem [shape: f32[2,64], index: 0, kind: input, shape index: {}]   ;;  %s119_s1 = inlined_call_operand.vmem [shape: f32[2,1,8,8], index: 1, kind: output, shape index: {}]  }
   0x1   :  { %v5_v0 = vld [vmem:[%s118_s0] sm:$0x3]  ;;  %s66_s0 = smov 120   ;;  %s69_s12 = smov 96  }
   0x2   :  { %6 = vst [vmem:[#allocation0] sm:$0x3] %v5_v0  ;;  %s70_s13 = smov 88   ;;  %s71_s14 = smov 80  }
   0x3   :  { %s72_s15 = smov 72  }
   0x9   :  { %v10_v1 = vld [vmem:[#allocation0] sm:$0x3]  }
   0xa   :  { %v22_v2 = vld [vmem:[#allocation0] sm:$0x3]   ;;  %11 = vrot.lane.b32.xlu0 %v10_v1, %s66_s0 }
   0xb   :  { %23 = vrot.lane.b32.xlu1 %v22_v2, %s67_s8  ;;  %v16_v3 = vld [vmem:[#allocation0] sm:$0x3]  }
   0xc   :  { %v28_v4 = vld [vmem:[#allocation0] sm:$0x3]  }
   0xd   :  { %v7_v5 = vld [vmem:[#allocation0] sm:$0x3]  }
   0xe   :  { %9 = vst.msk [vmem:[%s119_s1] ss:$8 sm:$0x3] %vm8_vm0, %v7_v5   ;;  %17 = vrot.lane.b32.xlu0 %v16_v3, %s68_s11  ;;  %v34_v6 = vld [vmem:[#allocation0] sm:$0x3]  }
   0xf   :  { %29 = vrot.lane.b32.xlu1 %v28_v4, %s69_s12  ;;  %v40_v7 = vld [vmem:[#allocation0] sm:$0x3]  }
  0x10   :  { %v46_v8 = vld [vmem:[#allocation0] sm:$0x3]  }
  0x12   :  { %35 = vrot.lane.b32.xlu0 %v34_v6, %s70_s13 }
  0x13   :  { %41 = vrot.lane.b32.xlu1 %v40_v7, %s71_s14 }
  0x16   :  { %47 = vrot.lane.b32.xlu0 %v46_v8, %s72_s15 }
  0x7c   :  { %v12_v9 = vpop.permute.xlu0 %11  }
  0x7d   :  { %v24_v10 = vpop.permute.xlu1 %23   ;;  %52 = vst.msk [vmem:[%s119_s1 + $0x1] ss:$8 sm:$0x3] %vm8_vm0, %v12_v9  }
  0x7e   :  { %54 = vst.msk [vmem:[%s119_s1 + $0x3] ss:$8 sm:$0x3] %vm8_vm0, %v24_v10  }
  0x80   :  { %v18_v11 = vpop.permute.xlu0 %17  }
  0x81   :  { %v30_v12 = vpop.permute.xlu1 %29   ;;  %53 = vst.msk [vmem:[%s119_s1 + $0x2] ss:$8 sm:$0x3] %vm8_vm0, %v18_v11  }
  0x82   :  { %55 = vst.msk [vmem:[%s119_s1 + $0x4] ss:$8 sm:$0x3] %vm8_vm0, %v30_v12  }
  0x84   :  { %v36_v13 = vpop.permute.xlu0 %35  }
  0x85   :  { %v42_v14 = vpop.permute.xlu1 %41   ;;  %56 = vst.msk [vmem:[%s119_s1 + $0x5] ss:$8 sm:$0x3] %vm8_vm0, %v36_v13  }
  0x86   :  { %57 = vst.msk [vmem:[%s119_s1 + $0x6] ss:$8 sm:$0x3] %vm8_vm0, %v42_v14  }
  0x88   :  { %v48_v15 = vpop.permute.xlu0 %47  }
  0x89   :  { %58 = vst.msk [vmem:[%s119_s1 + $0x7] ss:$8 sm:$0x3] %vm8_vm0, %v48_v15  }

// kernel: squeeze.9
= control target key start
LH: loop header
LB: loop body
LE: loop exit
PB: predicated region body
PF: predicated region fallthrough
CT: control target
= control target key end

     0   :  { %s197_s0 = inlined_call_operand.vmem [shape: f32[128], index: 0, kind: input, shape index: {}]   ;;  %s198_s1 = inlined_call_operand.hbm [shape: f32[2,8,8], index: 1, kind: output, shape index: {}]  }
   0x1   :  { %v6_v0 = vld [vmem:[%s197_s0] sm:$0x1] }
   0x2   :  { %7 = vst [vmem:[#allocation2] sm:$0x1] %v6_v0 }
   0x3   :  { %2 = vsyncpa [#allocation1], 0  ;;  %s149_s0 = smov 120   ;;  %s150_s8 = smov 104   ;;  %vm9_vm0 = vcmask 64512  }
   0x4   :  { %s151_s9 = smov 112   ;;  %s152_s10 = smov 96  }
   0x5   :  { %s153_s11 = smov 88   ;;  %s154_s12 = smov 80  }
   0x6   :  { %s155_s13 = smov 72   ;;  %s156_s14 = smov 64  }
   0x7   :  { %s157_s15 = smov 56   ;;  %s158_s16 = smov 48  }
   0x8   :  { %s159_s17 = smov 40   ;;  %s160_s18 = smov 32  }
   0x9   :  { %v11_v1 = vld [vmem:[#allocation2] sm:$0x1]   ;;  %s161_s19 = smov 24   ;;  %s162_s20 = smov 16  }
   0xa   :  { %v23_v2 = vld [vmem:[#allocation2] sm:$0x1]   ;;  %12 = vrot.lane.b32.xlu0 %v11_v1, %s149_s0  ;;  %s163_s21 = smov 8   ;;  %s164_s22 = smov [#allocation0]  }
   0xb   :  { %24 = vrot.lane.b32.xlu1 %v23_v2, %s150_s8  ;;  %v17_v3 = vld [vmem:[#allocation2] sm:$0x1]   ;;  %s105_s23 = sshll.u32 %s164_s22, 4  ;;  %s106_s23 = int_to_ptr.vmem [resolvable:$true] %s105_s23 }
   0xc   :  { %v29_v4 = vld [vmem:[#allocation2] sm:$0x1]   ;;  %s127_s24 = scalar_lea.vmem %s106_s23, 256  ;;  %p132_p1 = scmp.lt.s32.totalorder %s106_s23, %s106_s23 }
   0xd   :  { %v35_v5 = vld [vmem:[#allocation2] sm:$0x1]   ;;  %p128_p0 = scmp.ne.s32.totalorder %s106_s23, %s127_s24  ;;  %p133_p2 = scmp.lt.s32.totalorder %s127_s24, %s127_s24 }
   0xe   :  { %18 = vrot.lane.b32.xlu0 %v17_v3, %s151_s9  ;;  %v41_v6 = vld [vmem:[#allocation2] sm:$0x1]  }
   0xf   :  { %30 = vrot.lane.b32.xlu1 %v29_v4, %s152_s10  ;;  %v47_v7 = vld [vmem:[#allocation2] sm:$0x1]   ;;  %p134_p3 = por %p133_p2, %p132_p1 }
  0x10   :  { %v53_v8 = vld [vmem:[#allocation2] sm:$0x1]  }
  0x11   :  { %v59_v9 = vld [vmem:[#allocation2] sm:$0x1]   ;;  %p135_p4 = pnand %p134_p3, %p128_p0 }
  0x12   :  { %36 = vrot.lane.b32.xlu0 %v35_v5, %s153_s11  ;;  %v65_v10 = vld [vmem:[#allocation2] sm:$0x1]  }
  0x13   :  { %42 = vrot.lane.b32.xlu1 %v41_v6, %s154_s12  ;;  %v8_v11 = vld [vmem:[#allocation2] sm:$0x1]  }
  0x14   :  { %10 = vst.msk [vmem:[#allocation0] sm:$0x1] %vm9_vm0, %v8_v11   ;;  %v71_v12 = vld [vmem:[#allocation2] sm:$0x1]  }
  0x15   :  { %v77_v13 = vld [vmem:[#allocation2] sm:$0x1]  }
  0x16   :  { %48 = vrot.lane.b32.xlu0 %v47_v7, %s155_s13  ;;  %v83_v14 = vld [vmem:[#allocation2] sm:$0x1]  }
  0x17   :  { %54 = vrot.lane.b32.xlu1 %v53_v8, %s156_s14  ;;  %v89_v15 = vld [vmem:[#allocation2] sm:$0x1]  }
  0x18   :  { %v95_v16 = vld [vmem:[#allocation2] sm:$0x1]  }
  0x1a   :  { %60 = vrot.lane.b32.xlu0 %v59_v9, %s157_s15 }
  0x1b   :  { %66 = vrot.lane.b32.xlu1 %v65_v10, %s158_s16 }
  0x1e   :  { %72 = vrot.lane.b32.xlu0 %v71_v12, %s159_s17 }
  0x1f   :  { %78 = vrot.lane.b32.xlu1 %v77_v13, %s160_s18 }
  0x22   :  { %84 = vrot.lane.b32.xlu0 %v83_v14, %s161_s19 }
  0x23   :  { %90 = vrot.lane.b32.xlu1 %v89_v15, %s162_s20 }
  0x26   :  { %96 = vrot.lane.b32.xlu0 %v95_v16, %s163_s21 }
  0x7c   :  { %v13_v17 = vpop.permute.xlu0 %12  }
  0x7d   :  { %v25_v18 = vpop.permute.xlu1 %24   ;;  %16 = vst.msk [vmem:[#allocation0 + $0x1] sm:$0x1] %vm9_vm0, %v13_v17  }
  0x7e   :  { %28 = vst.msk [vmem:[#allocation0 + $0x3] sm:$0x1] %vm9_vm0, %v25_v18  }
  0x80   :  { %v19_v19 = vpop.permute.xlu0 %18  }
  0x81   :  { %v31_v20 = vpop.permute.xlu1 %30   ;;  %22 = vst.msk [vmem:[#allocation0 + $0x2] sm:$0x1] %vm9_vm0, %v19_v19  }
  0x82   :  { %34 = vst.msk [vmem:[#allocation0 + $0x4] sm:$0x1] %vm9_vm0, %v31_v20  }
  0x84   :  { %v37_v21 = vpop.permute.xlu0 %36  }
  0x85   :  { %v43_v22 = vpop.permute.xlu1 %42   ;;  %40 = vst.msk [vmem:[#allocation0 + $0x5] sm:$0x1] %vm9_vm0, %v37_v21  }
  0x86   :  { %46 = vst.msk [vmem:[#allocation0 + $0x6] sm:$0x1] %vm9_vm0, %v43_v22  }
  0x88   :  { %v49_v23 = vpop.permute.xlu0 %48  }
  0x89   :  { %v55_v24 = vpop.permute.xlu1 %54   ;;  %52 = vst.msk [vmem:[#allocation0 + $0x7] sm:$0x1] %vm9_vm0, %v49_v23  }
  0x8a   :  { %58 = vst.msk [vmem:[#allocation0 + $0x8] sm:$0x1] %vm9_vm0, %v55_v24  }
  0x8c   :  { %v61_v25 = vpop.permute.xlu0 %60  }
  0x8d   :  { %v67_v26 = vpop.permute.xlu1 %66   ;;  %64 = vst.msk [vmem:[#allocation0 + $0x9] sm:$0x1] %vm9_vm0, %v61_v25  }
  0x8e   :  { %70 = vst.msk [vmem:[#allocation0 + $0xa] sm:$0x1] %vm9_vm0, %v67_v26  }
  0x90   :  { %v73_v27 = vpop.permute.xlu0 %72  }
  0x91   :  { %v79_v28 = vpop.permute.xlu1 %78   ;;  %76 = vst.msk [vmem:[#allocation0 + $0xb] sm:$0x1] %vm9_vm0, %v73_v27  }
  0x92   :  { %82 = vst.msk [vmem:[#allocation0 + $0xc] sm:$0x1] %vm9_vm0, %v79_v28  }
  0x94   :  { %v85_v29 = vpop.permute.xlu0 %84  }
  0x95   :  { %v91_v30 = vpop.permute.xlu1 %90   ;;  %88 = vst.msk [vmem:[#allocation0 + $0xd] sm:$0x1] %vm9_vm0, %v85_v29  }
  0x96   :  { %94 = vst.msk [vmem:[#allocation0 + $0xe] sm:$0x1] %vm9_vm0, %v91_v30  }
  0x98   :  { %v97_v31 = vpop.permute.xlu0 %96  }
  0x99   :  { %100 = vst.msk [vmem:[#allocation0 + $0xf] sm:$0x1] %vm9_vm0, %v97_v31  }
  0x9a   :  { %138 = shalt.err (!%p135_p4)
}
  0x9b   :  { %108 = dma.vmem_to_hbm [thread:$0]  %s106_s23, 256, %s198_s1, [#allocation1]  }
  0x9c   :  { %147 = dma.done.wait [#allocation1], 256  }
  0x9d   :  { %148 = vsyncadd [#allocation1], 4294967040 }
  0x9e   :  { %110 = vsyncpa [#allocation1], 1 }

// kernel: few_shot_seg_forward.7
= control target key start
LH: loop header
LB: loop body
LE: loop exit
PB: predicated region body
PF: predicated region fallthrough
CT: control target
= control target key end

     0   :  { %vm20_vm0 = vcmask 64512   ;;  %s1282_s0 = inlined_call_operand.vmem [shape: f32[128,8], index: 0, kind: input, shape index: {}]   ;;  %s1283_s1 = inlined_call_operand.vmem [shape: f32[8,128], index: 1, kind: input, shape index: {}]   ;;  %s1284_s2 = inlined_call_operand.vmem [shape: f32[32,8], index: 2, kind: input, shape index: {}]   ;;  %s1285_s3 = inlined_call_operand.hbm [shape: f32[4,128,128], index: 3, kind: output, shape index: {}]  }
   0x1   :  { %v19_v0 = vld [vmem:[%s1283_s1] sm:$0xff]  ;;  %v16_v2 = vld [vmem:[%s1284_s2 + $0x8] sm:$0xff]  ;;  %v17_v3 = vld [vmem:[%s1284_s2 + $0x10] sm:$0xff] }
   0x2   :  { %v15_v1 = vld [vmem:[%s1284_s2] sm:$0xff]  ;;  %986 = vmatprep.subr.mxu0 %v19_v0 }
   0x3   :  { %988 = vmatprep.mubr.msk.f32.mxu0 %vm20_vm0, %v15_v1 }
   0x4   :  { %8 = vsyncpa [#allocation3], 0  ;;  %987 = vmatpush3.msra.mxu0 %v19_v0  ;;  %1098 = vmatprep.subr.mxu1 %v19_v0  ;;  %v18_v4 = vld [vmem:[%s1284_s2 + $0x18] sm:$0xff]  ;;  %v118_v5 = vld [vmem:[%s1282_s0] sm:$0xff] }
   0x5   :  { %989 = vmatmul.mubr.msk.f32.vlgmr.msra.gmra.mxu0 %vm20_vm0, %v16_v2  ;;  %1099 = vmatpush3.msra.mxu1 %v19_v0  ;;  %v119_v7 = vld [vmem:[%s1282_s0 + $0x8] sm:$0xff]  ;;  %v120_v10 = vld [vmem:[%s1282_s0 + $0x10] sm:$0xff]  ;;  %v121_v12 = vld [vmem:[%s1282_s0 + $0x18] sm:$0xff] }
   0x6   :  { %991 = vmatprep.mubr.msk.f32.mxu1 %vm20_vm0, %v17_v3  ;;  %1022 = vmatprep.mubr.msk.f32.mxu0 %vm20_vm0, %v118_v5  ;;  %v122_v13 = vld [vmem:[%s1282_s0 + $0x20] sm:$0xff]  ;;  %v123_v14 = vld [vmem:[%s1282_s0 + $0x28] sm:$0xff]  ;;  %v124_v15 = vld [vmem:[%s1282_s0 + $0x30] sm:$0xff] }
   0x7   :  { %992 = vmatmul.mubr.msk.f32.vlgmr.msra.gmra.mxu1 %vm20_vm0, %v18_v4  ;;  %v125_v16 = vld [vmem:[%s1282_s0 + $0x38] sm:$0xff]  ;;  %v126_v17 = vld [vmem:[%s1282_s0 + $0x40] sm:$0xff]  ;;  %v127_v18 = vld [vmem:[%s1282_s0 + $0x48] sm:$0xff] }
   0x8   :  { %996 = vmatprep.mubr.msk.f32.mxu1 %vm20_vm0, %v118_v5  ;;  %v128_v19 = vld [vmem:[%s1282_s0 + $0x50] sm:$0xff]  ;;  %v129_v20 = vld [vmem:[%s1282_s0 + $0x58] sm:$0xff]  ;;  %v130_v21 = vld [vmem:[%s1282_s0 + $0x60] sm:$0xff] }
   0x9   :  { %v131_v22 = vld [vmem:[%s1282_s0 + $0x68] sm:$0xff]  ;;  %v132_v23 = vld [vmem:[%s1282_s0 + $0x70] sm:$0xff]  ;;  %v133_v24 = vld [vmem:[%s1282_s0 + $0x78] sm:$0xff]  ;;  %s1125_s0 = smov [#allocation2]  }
   0xa   :  { %s834_s24 = sshll.u32 %s1125_s0, 4  ;;  %s835_s24 = int_to_ptr.vmem [resolvable:$true] %s834_s24 }
   0xb   :  { %s1103_s2 = scalar_lea.vmem %s835_s24, 8192  ;;  %p1108_p1 = scmp.lt.s32.totalorder %s835_s24, %s835_s24 }
   0xc   :  { %p1104_p0 = scmp.ne.s32.totalorder %s835_s24, %s1103_s2  ;;  %p1109_p2 = scmp.lt.s32.totalorder %s1103_s2, %s1103_s2 }
   0xe   :  { %p1110_p3 = por %p1109_p2, %p1108_p1 }
  0x10   :  { %p1111_p4 = pnand %p1110_p3, %p1104_p0 }
  0xc5   :  { %v990_v6 = vpop.f32.mrf.mxu0 }
  0xc6   :  { %1020 = vmatprep.subr.mxu0 %v990_v6 }
  0xc7   :  { %v99_v8 = vpop.f32.mrf.mxu0  ;;  %v993_v9 = vpop.f32.mrf.mxu1  ;;  %1021 = vmatpush3.msra.mxu0 %v990_v6 }
  0xc8   :  { %994 = vmatprep.subr.mxu1 %v99_v8  ;;  %1072 = vmatprep.subr.mxu0 %v993_v9 }
  0xc9   :  { %v109_v11 = vpop.f32.mrf.mxu1  ;;  %995 = vmatpush3.msra.mxu1 %v99_v8  ;;  %1023 = vmatmul.mubr.msk.f32.vlgmr.msra.gmra.mxu0 %vm20_vm0, %v119_v7 }
  0xca   :  { %1046 = vmatprep.subr.mxu1 %v109_v11  ;;  %1073 = vmatpush3.msra.mxu0 %v993_v9 }
  0xcb   :  { %997 = vmatmul.mubr.msk.f32.vlgmr.msra.gmra.mxu1 %vm20_vm0, %v119_v7  ;;  %1025 = vmatprep.mubr.msk.f32.mxu0 %vm20_vm0, %v120_v10 }
  0xcc   :  { %1047 = vmatpush3.msra.mxu1 %v109_v11  ;;  %999 = vmatprep.mubr.msk.f32.mxu1 %vm20_vm0, %v120_v10 }
  0xcd   :  { %1026 = vmatmul.mubr.msk.f32.gmra.mxu0 %vm20_vm0, %v121_v12 }
  0xce   :  { %1028 = vmatprep.mubr.msk.f32.mxu0 %vm20_vm0, %v122_v13 }
  0xcf   :  { %1000 = vmatmul.mubr.msk.f32.gmra.mxu1 %vm20_vm0, %v121_v12 }
  0xd0   :  { %1002 = vmatprep.mubr.msk.f32.mxu1 %vm20_vm0, %v122_v13 }
  0xd1   :  { %1029 = vmatmul.mubr.msk.f32.gmra.mxu0 %vm20_vm0, %v123_v14 }
  0xd2   :  { %1031 = vmatprep.mubr.msk.f32.mxu0 %vm20_vm0, %v124_v15 }
  0xd3   :  { %1003 = vmatmul.mubr.msk.f32.gmra.mxu1 %vm20_vm0, %v123_v14 }
  0xd4   :  { %1005 = vmatprep.mubr.msk.f32.mxu1 %vm20_vm0, %v124_v15 }
  0xd5   :  { %1032 = vmatmul.mubr.msk.f32.gmra.mxu0 %vm20_vm0, %v125_v16 }
  0xd6   :  { %1034 = vmatprep.mubr.msk.f32.mxu0 %vm20_vm0, %v126_v17 }
  0xd7   :  { %1006 = vmatmul.mubr.msk.f32.gmra.mxu1 %vm20_vm0, %v125_v16 }
  0xd8   :  { %1008 = vmatprep.mubr.msk.f32.mxu1 %vm20_vm0, %v126_v17 }
  0xd9   :  { %1035 = vmatmul.mubr.msk.f32.gmra.mxu0 %vm20_vm0, %v127_v18 }
  0xda   :  { %1037 = vmatprep.mubr.msk.f32.mxu0 %vm20_vm0, %v128_v19 }
  0xdb   :  { %1009 = vmatmul.mubr.msk.f32.gmra.mxu1 %vm20_vm0, %v127_v18 }
  0xdc   :  { %1011 = vmatprep.mubr.msk.f32.mxu1 %vm20_vm0, %v128_v19 }
  0xdd   :  { %1038 = vmatmul.mubr.msk.f32.gmra.mxu0 %vm20_vm0, %v129_v20 }
  0xde   :  { %1040 = vmatprep.mubr.msk.f32.mxu0 %vm20_vm0, %v130_v21 }
  0xdf   :  { %1012 = vmatmul.mubr.msk.f32.gmra.mxu1 %vm20_vm0, %v129_v20 }
  0xe0   :  { %1014 = vmatprep.mubr.msk.f32.mxu1 %vm20_vm0, %v130_v21 }
  0xe1   :  { %1041 = vmatmul.mubr.msk.f32.gmra.mxu0 %vm20_vm0, %v131_v22 }
  0xe2   :  { %1043 = vmatprep.mubr.msk.f32.mxu0 %vm20_vm0, %v132_v23 }
  0xe3   :  { %1015 = vmatmul.mubr.msk.f32.gmra.mxu1 %vm20_vm0, %v131_v22 }
  0xe4   :  { %1017 = vmatprep.mubr.msk.f32.mxu1 %vm20_vm0, %v132_v23 }
  0xe5   :  { %1044 = vmatmul.mubr.msk.f32.gmra.mxu0 %vm20_vm0, %v133_v24 }
  0xe6   :  { %1074 = vmatprep.mubr.msk.f32.mxu0 %vm20_vm0, %v118_v5 }
  0xe7   :  { %1018 = vmatmul.mubr.msk.f32.gmra.mxu1 %vm20_vm0, %v133_v24 }
  0xe8   :  { %1048 = vmatprep.mubr.msk.f32.mxu1 %vm20_vm0, %v118_v5 }
  0xe9   :  { %1075 = vmatmul.mubr.msk.f32.vlgmr.msra.gmra.mxu0 %vm20_vm0, %v119_v7 }
  0xea   :  { %1077 = vmatprep.mubr.msk.f32.mxu0 %vm20_vm0, %v120_v10 }
  0xeb   :  { %1049 = vmatmul.mubr.msk.f32.vlgmr.msra.gmra.mxu1 %vm20_vm0, %v119_v7 }
  0xec   :  { %1051 = vmatprep.mubr.msk.f32.mxu1 %vm20_vm0, %v120_v10 }
  0xed   :  { %1078 = vmatmul.mubr.msk.f32.gmra.mxu0 %vm20_vm0, %v121_v12 }
  0xee   :  { %1080 = vmatprep.mubr.msk.f32.mxu0 %vm20_vm0, %v122_v13 }
  0xef   :  { %1052 = vmatmul.mubr.msk.f32.gmra.mxu1 %vm20_vm0, %v121_v12 }
  0xf0   :  { %1054 = vmatprep.mubr.msk.f32.mxu1 %vm20_vm0, %v122_v13 }
  0xf1   :  { %1081 = vmatmul.mubr.msk.f32.gmra.mxu0 %vm20_vm0, %v123_v14 }
  0xf2   :  { %1083 = vmatprep.mubr.msk.f32.mxu0 %vm20_vm0, %v124_v15 }
  0xf3   :  { %1055 = vmatmul.mubr.msk.f32.gmra.mxu1 %vm20_vm0, %v123_v14 }
  0xf4   :  { %1057 = vmatprep.mubr.msk.f32.mxu1 %vm20_vm0, %v124_v15 }
  0xf5   :  { %1084 = vmatmul.mubr.msk.f32.gmra.mxu0 %vm20_vm0, %v125_v16 }
  0xf6   :  { %1086 = vmatprep.mubr.msk.f32.mxu0 %vm20_vm0, %v126_v17 }
  0xf7   :  { %1058 = vmatmul.mubr.msk.f32.gmra.mxu1 %vm20_vm0, %v125_v16 }
  0xf8   :  { %1060 = vmatprep.mubr.msk.f32.mxu1 %vm20_vm0, %v126_v17 }
  0xf9   :  { %1087 = vmatmul.mubr.msk.f32.gmra.mxu0 %vm20_vm0, %v127_v18 }
  0xfa   :  { %1089 = vmatprep.mubr.msk.f32.mxu0 %vm20_vm0, %v128_v19 }
  0xfb   :  { %1061 = vmatmul.mubr.msk.f32.gmra.mxu1 %vm20_vm0, %v127_v18 }
  0xfc   :  { %1063 = vmatprep.mubr.msk.f32.mxu1 %vm20_vm0, %v128_v19 }
  0xfd   :  { %1090 = vmatmul.mubr.msk.f32.gmra.mxu0 %vm20_vm0, %v129_v20 }
  0xfe   :  { %1092 = vmatprep.mubr.msk.f32.mxu0 %vm20_vm0, %v130_v21 }
  0xff   :  { %1064 = vmatmul.mubr.msk.f32.gmra.mxu1 %vm20_vm0, %v129_v20 }
 0x100   :  { %1066 = vmatprep.mubr.msk.f32.mxu1 %vm20_vm0, %v130_v21 }
 0x101   :  { %1093 = vmatmul.mubr.msk.f32.gmra.mxu0 %vm20_vm0, %v131_v22 }
 0x102   :  { %1095 = vmatprep.mubr.msk.f32.mxu0 %vm20_vm0, %v132_v23 }
 0x103   :  { %1067 = vmatmul.mubr.msk.f32.gmra.mxu1 %vm20_vm0, %v131_v22 }
 0x104   :  { %1069 = vmatprep.mubr.msk.f32.mxu1 %vm20_vm0, %v132_v23 }
 0x105   :  { %1096 = vmatmul.mubr.msk.f32.gmra.mxu0 %vm20_vm0, %v133_v24 }
 0x107   :  { %1070 = vmatmul.mubr.msk.f32.gmra.mxu1 %vm20_vm0, %v133_v24 }
 0x189   :  { %v1024_v25 = vpop.f32.mrf.mxu0 }
 0x18a   :  { %490 = vst [vmem:[#allocation2 + $0x88] sm:$0xff] %v1024_v25 }
 0x18b   :  { %v998_v26 = vpop.f32.mrf.mxu1  ;;  %v409_v27 = vpop.f32.mrf.mxu0 }
 0x18c   :  { %328 = vst [vmem:[#allocation2 + $0x8] sm:$0xff] %v998_v26  ;;  %489 = vst [vmem:[#allocation2 + $0x80] sm:$0xff] %v409_v27 }
 0x18d   :  { %v248_v28 = vpop.f32.mrf.mxu1  ;;  %v1027_v29 = vpop.f32.mrf.mxu0 }
 0x18e   :  { %327 = vst [vmem:[#allocation2] sm:$0xff] %v248_v28  ;;  %492 = vst [vmem:[#allocation2 + $0x98] sm:$0xff] %v1027_v29 }
 0x18f   :  { %v1001_v30 = vpop.f32.mrf.mxu1  ;;  %v419_v31 = vpop.f32.mrf.mxu0 }
 0x190   :  { %330 = vst [vmem:[#allocation2 + $0x18] sm:$0xff] %v1001_v30  ;;  %491 = vst [vmem:[#allocation2 + $0x90] sm:$0xff] %v419_v31 }
 0x191   :  { %v258_v32 = vpop.f32.mrf.mxu1  ;;  %v1030_v33 = vpop.f32.mrf.mxu0 }
 0x192   :  { %329 = vst [vmem:[#allocation2 + $0x10] sm:$0xff] %v258_v32  ;;  %494 = vst [vmem:[#allocation2 + $0xa8] sm:$0xff] %v1030_v33 }
 0x193   :  { %v1004_v34 = vpop.f32.mrf.mxu1  ;;  %v429_v35 = vpop.f32.mrf.mxu0 }
 0x194   :  { %332 = vst [vmem:[#allocation2 + $0x28] sm:$0xff] %v1004_v34  ;;  %493 = vst [vmem:[#allocation2 + $0xa0] sm:$0xff] %v429_v35 }
 0x195   :  { %v268_v36 = vpop.f32.mrf.mxu1  ;;  %v1033_v37 = vpop.f32.mrf.mxu0 }
 0x196   :  { %331 = vst [vmem:[#allocation2 + $0x20] sm:$0xff] %v268_v36  ;;  %496 = vst [vmem:[#allocation2 + $0xb8] sm:$0xff] %v1033_v37 }
 0x197   :  { %v1007_v38 = vpop.f32.mrf.mxu1  ;;  %v439_v39 = vpop.f32.mrf.mxu0 }
 0x198   :  { %334 = vst [vmem:[#allocation2 + $0x38] sm:$0xff] %v1007_v38  ;;  %495 = vst [vmem:[#allocation2 + $0xb0] sm:$0xff] %v439_v39 }
 0x199   :  { %v278_v40 = vpop.f32.mrf.mxu1  ;;  %v1036_v41 = vpop.f32.mrf.mxu0 }
 0x19a   :  { %333 = vst [vmem:[#allocation2 + $0x30] sm:$0xff] %v278_v40  ;;  %498 = vst [vmem:[#allocation2 + $0xc8] sm:$0xff] %v1036_v41 }
 0x19b   :  { %v1010_v42 = vpop.f32.mrf.mxu1  ;;  %v449_v43 = vpop.f32.mrf.mxu0 }
 0x19c   :  { %336 = vst [vmem:[#allocation2 + $0x48] sm:$0xff] %v1010_v42  ;;  %497 = vst [vmem:[#allocation2 + $0xc0] sm:$0xff] %v449_v43 }
 0x19d   :  { %v288_v44 = vpop.f32.mrf.mxu1  ;;  %v1039_v45 = vpop.f32.mrf.mxu0 }
 0x19e   :  { %335 = vst [vmem:[#allocation2 + $0x40] sm:$0xff] %v288_v44  ;;  %500 = vst [vmem:[#allocation2 + $0xd8] sm:$0xff] %v1039_v45 }
 0x19f   :  { %v1013_v46 = vpop.f32.mrf.mxu1  ;;  %v459_v47 = vpop.f32.mrf.mxu0 }
 0x1a0   :  { %338 = vst [vmem:[#allocation2 + $0x58] sm:$0xff] %v1013_v46  ;;  %499 = vst [vmem:[#allocation2 + $0xd0] sm:$0xff] %v459_v47 }
 0x1a1   :  { %v298_v48 = vpop.f32.mrf.mxu1  ;;  %v1042_v49 = vpop.f32.mrf.mxu0 }
 0x1a2   :  { %337 = vst [vmem:[#allocation2 + $0x50] sm:$0xff] %v298_v48  ;;  %502 = vst [vmem:[#allocation2 + $0xe8] sm:$0xff] %v1042_v49 }
 0x1a3   :  { %v1016_v50 = vpop.f32.mrf.mxu1  ;;  %v469_v51 = vpop.f32.mrf.mxu0 }
 0x1a4   :  { %340 = vst [vmem:[#allocation2 + $0x68] sm:$0xff] %v1016_v50  ;;  %501 = vst [vmem:[#allocation2 + $0xe0] sm:$0xff] %v469_v51 }
 0x1a5   :  { %v308_v52 = vpop.f32.mrf.mxu1  ;;  %v1045_v53 = vpop.f32.mrf.mxu0 }
 0x1a6   :  { %339 = vst [vmem:[#allocation2 + $0x60] sm:$0xff] %v308_v52  ;;  %504 = vst [vmem:[#allocation2 + $0xf8] sm:$0xff] %v1045_v53 }
 0x1a7   :  { %v1019_v54 = vpop.f32.mrf.mxu1  ;;  %v479_v55 = vpop.f32.mrf.mxu0 }
 0x1a8   :  { %342 = vst [vmem:[#allocation2 + $0x78] sm:$0xff] %v1019_v54  ;;  %503 = vst [vmem:[#allocation2 + $0xf0] sm:$0xff] %v479_v55 }
 0x1a9   :  { %v318_v56 = vpop.f32.mrf.mxu1  ;;  %v1076_v57 = vpop.f32.mrf.mxu0 }
 0x1aa   :  { %341 = vst [vmem:[#allocation2 + $0x70] sm:$0xff] %v318_v56  ;;  %814 = vst [vmem:[#allocation2 + $0x188] sm:$0xff] %v1076_v57 }
 0x1ab   :  { %v1050_v58 = vpop.f32.mrf.mxu1  ;;  %v733_v59 = vpop.f32.mrf.mxu0 }
 0x1ac   :  { %652 = vst [vmem:[#allocation2 + $0x108] sm:$0xff] %v1050_v58  ;;  %813 = vst [vmem:[#allocation2 + $0x180] sm:$0xff] %v733_v59 }
 0x1ad   :  { %v571_v60 = vpop.f32.mrf.mxu1  ;;  %v1079_v61 = vpop.f32.mrf.mxu0 }
 0x1ae   :  { %651 = vst [vmem:[#allocation2 + $0x100] sm:$0xff] %v571_v60  ;;  %816 = vst [vmem:[#allocation2 + $0x198] sm:$0xff] %v1079_v61 }
 0x1af   :  { %v1053_v62 = vpop.f32.mrf.mxu1  ;;  %v743_v63 = vpop.f32.mrf.mxu0 }
 0x1b0   :  { %654 = vst [vmem:[#allocation2 + $0x118] sm:$0xff] %v1053_v62  ;;  %815 = vst [vmem:[#allocation2 + $0x190] sm:$0xff] %v743_v63 }
 0x1b1   :  { %v581_v0 = vpop.f32.mrf.mxu1  ;;  %v1082_v1 = vpop.f32.mrf.mxu0 }
 0x1b2   :  { %653 = vst [vmem:[#allocation2 + $0x110] sm:$0xff] %v581_v0  ;;  %818 = vst [vmem:[#allocation2 + $0x1a8] sm:$0xff] %v1082_v1 }
 0x1b3   :  { %v1056_v2 = vpop.f32.mrf.mxu1  ;;  %v753_v3 = vpop.f32.mrf.mxu0 }
 0x1b4   :  { %656 = vst [vmem:[#allocation2 + $0x128] sm:$0xff] %v1056_v2  ;;  %817 = vst [vmem:[#allocation2 + $0x1a0] sm:$0xff] %v753_v3 }
 0x1b5   :  { %v591_v4 = vpop.f32.mrf.mxu1  ;;  %v1085_v5 = vpop.f32.mrf.mxu0 }
 0x1b6   :  { %655 = vst [vmem:[#allocation2 + $0x120] sm:$0xff] %v591_v4  ;;  %820 = vst [vmem:[#allocation2 + $0x1b8] sm:$0xff] %v1085_v5 }
 0x1b7   :  { %v1059_v6 = vpop.f32.mrf.mxu1  ;;  %v763_v7 = vpop.f32.mrf.mxu0 }
 0x1b8   :  { %658 = vst [vmem:[#allocation2 + $0x138] sm:$0xff] %v1059_v6  ;;  %819 = vst [vmem:[#allocation2 + $0x1b0] sm:$0xff] %v763_v7 }
 0x1b9   :  { %v601_v8 = vpop.f32.mrf.mxu1  ;;  %v1088_v9 = vpop.f32.mrf.mxu0 }
 0x1ba   :  { %657 = vst [vmem:[#allocation2 + $0x130] sm:$0xff] %v601_v8  ;;  %822 = vst [vmem:[#allocation2 + $0x1c8] sm:$0xff] %v1088_v9 }
 0x1bb   :  { %v1062_v10 = vpop.f32.mrf.mxu1  ;;  %v773_v11 = vpop.f32.mrf.mxu0 }
 0x1bc   :  { %660 = vst [vmem:[#allocation2 + $0x148] sm:$0xff] %v1062_v10  ;;  %821 = vst [vmem:[#allocation2 + $0x1c0] sm:$0xff] %v773_v11 }
 0x1bd   :  { %v611_v12 = vpop.f32.mrf.mxu1  ;;  %v1091_v13 = vpop.f32.mrf.mxu0 }
 0x1be   :  { %659 = vst [vmem:[#allocation2 + $0x140] sm:$0xff] %v611_v12  ;;  %824 = vst [vmem:[#allocation2 + $0x1d8] sm:$0xff] %v1091_v13 }
 0x1bf   :  { %v1065_v14 = vpop.f32.mrf.mxu1  ;;  %v783_v15 = vpop.f32.mrf.mxu0 }
 0x1c0   :  { %662 = vst [vmem:[#allocation2 + $0x158] sm:$0xff] %v1065_v14  ;;  %823 = vst [vmem:[#allocation2 + $0x1d0] sm:$0xff] %v783_v15 }
 0x1c1   :  { %v621_v16 = vpop.f32.mrf.mxu1  ;;  %v1094_v17 = vpop.f32.mrf.mxu0 }
 0x1c2   :  { %661 = vst [vmem:[#allocation2 + $0x150] sm:$0xff] %v621_v16  ;;  %826 = vst [vmem:[#allocation2 + $0x1e8] sm:$0xff] %v1094_v17 }
 0x1c3   :  { %v1068_v18 = vpop.f32.mrf.mxu1  ;;  %v793_v19 = vpop.f32.mrf.mxu0 }
 0x1c4   :  { %664 = vst [vmem:[#allocation2 + $0x168] sm:$0xff] %v1068_v18  ;;  %825 = vst [vmem:[#allocation2 + $0x1e0] sm:$0xff] %v793_v19 }
 0x1c5   :  { %v631_v20 = vpop.f32.mrf.mxu1  ;;  %v1097_v21 = vpop.f32.mrf.mxu0 }
 0x1c6   :  { %663 = vst [vmem:[#allocation2 + $0x160] sm:$0xff] %v631_v20  ;;  %828 = vst [vmem:[#allocation2 + $0x1f8] sm:$0xff] %v1097_v21 }
 0x1c7   :  { %v1071_v22 = vpop.f32.mrf.mxu1  ;;  %v803_v23 = vpop.f32.mrf.mxu0 }
 0x1c8   :  { %666 = vst [vmem:[#allocation2 + $0x178] sm:$0xff] %v1071_v22  ;;  %827 = vst [vmem:[#allocation2 + $0x1f0] sm:$0xff] %v803_v23 }
 0x1c9   :  { %v641_v24 = vpop.f32.mrf.mxu1 }
 0x1ca   :  { %665 = vst [vmem:[#allocation2 + $0x170] sm:$0xff] %v641_v24 }
 0x1cb   :  { %1114 = shalt.err (!%p1111_p4)
}
 0x1cc   :  { %s1126_s25 = smov 128   ;;  %s1127_s26 = smov 8  }
 0x1cd   :  { %840 = dma.vmem_to_hbm [thread:$0]  %s835_s24, 8192, %s1285_s3, [#allocation3], %s1126_s25, %s1126_s25, %s1127_s26  }
 0x1ce   :  { %1123 = dma.done.wait [#allocation3], 8192  }
 0x1cf   :  { %1124 = vsyncadd [#allocation3], 4294959104 }
 0x1d0   :  { %844 = vsyncpa [#allocation3], 1 }

</bundles_post_ra>
